<compile_context>
chip_gen: v6e
topology: v6e:2x2x1
jax: 0.10.0
libtpu: 0.0.40
codegen_flags: <defaults>
</compile_context>

<pallas_src>
import functools

import jax
import jax.numpy as jnp
from jax.experimental import pallas as pl
from jax.experimental.pallas import tpu as pltpu


# ---------------------------------------------------------------------------
# Pallas kernels
# ---------------------------------------------------------------------------
def _conv_relu_pool_kernel(p_ref, w_ref, b_ref, o_ref, *, n_rows):
    # p_ref: [4*N, K*K*C] bf16, rows quadrant-major (dy, dx, b, ph, pw)
    # w_ref: [K*K*C, OC] bf16; b_ref: [1, OC] f32; o_ref: [N, OC] bf16
    n = n_rows
    # One tall bf16 matmul with f32 accumulation -> single uninterrupted MXU push.
    y = jnp.dot(p_ref[...], w_ref[...], preferred_element_type=jnp.float32)
    # 2x2 max-pool = max over the four quadrant row-blocks (VPU; n % 8 == 0).
    m = jnp.maximum(jnp.maximum(y[0 * n:1 * n], y[1 * n:2 * n]),
                    jnp.maximum(y[2 * n:3 * n], y[3 * n:4 * n]))
    # Bias + ReLU once after the max (max(y)+b == max(y+b); ReLU monotone).
    o_ref[...] = jnp.maximum(m + b_ref[...], 0.0).astype(o_ref.dtype)


def _conv_fc_fused_kernel(p_ref, w2_ref, b2_ref, wf1_ref, bf1_ref,
                          wf2_ref, bf2_ref, wf3_ref, bf3_ref, o_ref,
                          *, n_pos, b_pad, n_batch):
    # p_ref:  [4*n_pos*b_pad, K*K*C] bf16, rows quadrant-major (dy, dx, ph, pw, b)
    # w2_ref: [K*K*C, 16] bf16;  b2_ref: [1, 16] f32
    # wf1_ref:[n_pos*16, l1] bf16, rows ordered (p, c);  bf1_ref: [1, l1] f32
    # wf2_ref:[l1, l2] bf16;  wf3_ref:[l2, 10] bf16;  o_ref: [n_batch, 10] f32
    n = n_pos * b_pad
    # conv2 as one tall matmul over the quadrant-major patch matrix.
    y = jnp.dot(p_ref[...], w2_ref[...], preferred_element_type=jnp.float32)
    # 2x2 max-pool across the 4 quadrant row-blocks (n % 8 == 0 -> tile-aligned).
    m = jnp.maximum(jnp.maximum(y[0 * n:1 * n], y[1 * n:2 * n]),
                    jnp.maximum(y[2 * n:3 * n], y[3 * n:4 * n]))     # [n, 16]
    h2 = jnp.maximum(m + b2_ref[...], 0.0)                           # f32, rows (p, b)
    # fc1 fused with the x.view(-1, 16*5*5) flatten: sum over the 25 pooled spatial
    # positions of [b_pad, 16] @ [16, l1] partials (weight rows pre-permuted to
    # (p, c) order). All row slices are 8-sublane / 16-row (bf16) tile aligned.
    c2 = h2.shape[-1]
    parts = [
        jnp.dot(h2[p * b_pad:(p + 1) * b_pad, :].astype(jnp.bfloat16),
                wf1_ref[p * c2:(p + 1) * c2, :],
                preferred_element_type=jnp.float32)
        for p in range(n_pos)
    ]
    h = functools.reduce(jnp.add, parts)                             # [b_pad, l1]
    h = jnp.maximum(h + bf1_ref[...], 0.0).astype(jnp.bfloat16)
    h = jnp.dot(h, wf2_ref[...], preferred_element_type=jnp.float32)
    h = jnp.maximum(h + bf2_ref[...], 0.0).astype(jnp.bfloat16)
    h = jnp.dot(h, wf3_ref[...], preferred_element_type=jnp.float32)
    h = h + bf3_ref[...]
    # Drop the padded batch rows at the store.
    o_ref[...] = h[:n_batch].astype(o_ref.dtype)


# ---------------------------------------------------------------------------
# pallas_call wrappers (whole-array VMEM residency, no grid at these shapes)
# ---------------------------------------------------------------------------
def _vmem_specs(n):
    return [pl.BlockSpec(memory_space=pltpu.MemorySpace.VMEM) for _ in range(n)]


def conv_relu_pool(patches, w_mat, b_row, *, n_rows):
    oc = w_mat.shape[1]
    return pl.pallas_call(
        functools.partial(_conv_relu_pool_kernel, n_rows=n_rows),
        out_shape=jax.ShapeDtypeStruct((n_rows, oc), jnp.bfloat16),
        in_specs=_vmem_specs(3),
        out_specs=pl.BlockSpec(memory_space=pltpu.MemorySpace.VMEM),
    )(patches, w_mat, b_row)


def conv_fc_fused(patches, prep, *, n_pos, b_pad, n_batch):
    n_out = prep["wf3"].shape[1]
    kernel = functools.partial(_conv_fc_fused_kernel,
                               n_pos=n_pos, b_pad=b_pad, n_batch=n_batch)
    return pl.pallas_call(
        kernel,
        out_shape=jax.ShapeDtypeStruct((n_batch, n_out), jnp.float32),
        in_specs=_vmem_specs(9),
        out_specs=pl.BlockSpec(memory_space=pltpu.MemorySpace.VMEM),
    )(patches, prep["w2"], prep["b2"], prep["wf1"], prep["bf1"],
      prep["wf2"], prep["bf2"], prep["wf3"], prep["bf3"])


# ---------------------------------------------------------------------------
# Glue: quadrant-major im2col built from STRIDED slices (no big 6-D transpose)
# ---------------------------------------------------------------------------
def _pool_quadrant_taps(x, K, dy, dx):
    # x: [B, H, W, C] -> [B, PH, PW, K*K*C]; features ordered (kh, kw, c).
    _, H, W, _ = x.shape
    PH, PW = (H - K + 1) // 2, (W - K + 1) // 2
    taps = [x[:, dy + kh: dy + kh + 2 * PH: 2, dx + kw: dx + kw + 2 * PW: 2, :]
            for kh in range(K) for kw in range(K)]
    return jnp.concatenate(taps, axis=-1)


def _im2col_pool_quadrants_batch_major(x, K):
    # Rows ordered (dy, dx, b, ph, pw); quadrant block = B*PH*PW rows.
    B = x.shape[0]
    quads = []
    for dy in range(2):
        for dx in range(2):
            q = _pool_quadrant_taps(x, K, dy, dx)           # [B, PH, PW, F]
            quads.append(q.reshape(B * q.shape[1] * q.shape[2], -1))
    return jnp.concatenate(quads, axis=0)                   # [4*B*PH*PW, F]


def _im2col_pool_quadrants_spatial_major(x, K, b_pad):
    # Rows ordered (dy, dx, ph, pw, b) with batch zero-padded to b_pad so every
    # quadrant block and every per-position slice is 8-sublane aligned.
    B = x.shape[0]
    if b_pad > B:
        x = jnp.pad(x, ((0, b_pad - B), (0, 0), (0, 0), (0, 0)))
    quads = []
    for dy in range(2):
        for dx in range(2):
            q = _pool_quadrant_taps(x, K, dy, dx)           # [b_pad, PH, PW, F]
            q = jnp.transpose(q, (1, 2, 0, 3))              # [PH, PW, b_pad, F]
            quads.append(q.reshape(-1, q.shape[-1]))
    return jnp.concatenate(quads, axis=0)                   # [4*PH*PW*b_pad, F]


# ---------------------------------------------------------------------------
# One-time weight re-layout + bf16 cast (no per-forward weight transposes)
# ---------------------------------------------------------------------------
def prepare_params(params):
    bf16, f32 = jnp.bfloat16, jnp.float32

    def conv_w(w):  # [OC, C, K, K] -> [K*K*C, OC] matching (kh, kw, c) patches
        oc = w.shape[0]
        return jnp.transpose(w, (2, 3, 1, 0)).reshape(-1, oc).astype(bf16)

    fc1_w = params["fc1_w"]                       # [l1, 400], cols in (c, h, w)
    l1 = fc1_w.shape[0]
    wf1 = (fc1_w.reshape(l1, 16, 25)              # [j, c, p]  (p = h*5 + w)
           .transpose(2, 1, 0)                    # [p, c, j]
           .reshape(25 * 16, l1)                  # rows in (p, c) order
           .astype(bf16))
    return {
        "w1": conv_w(params["conv1_w"]),
        "b1": params["conv1_b"].reshape(1, -1).astype(f32),
        "w2": conv_w(params["conv2_w"]),
        "b2": params["conv2_b"].reshape(1, -1).astype(f32),
        "wf1": wf1,
        "bf1": params["fc1_b"].reshape(1, -1).astype(f32),
        "wf2": params["fc2_w"].T.astype(bf16),
        "bf2": params["fc2_b"].reshape(1, -1).astype(f32),
        "wf3": params["fc3_w"].T.astype(bf16),
        "bf3": params["fc3_b"].reshape(1, -1).astype(f32),
    }


# ---------------------------------------------------------------------------
# Forward pass (matches torch Net.forward semantics)
# ---------------------------------------------------------------------------
def net_forward(x_nchw, prep):
    B = x_nchw.shape[0]
    K = 5
    b_pad = -(-B // 8) * 8       # batch padded to sublane multiple for conv2+fc

    x = jnp.transpose(x_nchw, (0, 2, 3, 1)).astype(jnp.bfloat16)   # NHWC + bf16, once

    # conv1 -> relu -> maxpool(2,2): one kernel, one tall matmul.
    p1 = _im2col_pool_quadrants_batch_major(x, K)                  # [4*B*196, 75]
    h1 = conv_relu_pool(p1, prep["w1"], prep["b1"], n_rows=B * 196)
    h1 = h1.reshape(B, 14, 14, 6)                                  # contiguous NHWC

    # conv2 -> relu -> maxpool -> flatten -> fc1 -> relu -> fc2 -> relu -> fc3,
    # all inside ONE fused kernel (intermediates never leave VMEM).
    p2 = _im2col_pool_quadrants_spatial_major(h1, K, b_pad)        # [4*25*b_pad, 150]
    return conv_fc_fused(p2, prep, n_pos=25, b_pad=b_pad, n_batch=B)


# ---------------------------------------------------------------------------
# Deterministic parameter init (PyTorch-default-style uniform bounds)
# ---------------------------------------------------------------------------
def init_params(key, l1=120, l2=84):
    def uni(k, shape, fan_in):
        bound = 1.0 / jnp.sqrt(jnp.float32(fan_in))
        return jax.random.uniform(k, shape, jnp.float32, -bound, bound)

    ks = jax.random.split(key, 10)
    return {
        "conv1_w": uni(ks[0], (6, 3, 5, 5), 3 * 25),
        "conv1_b": uni(ks[1], (6,), 3 * 25),
        "conv2_w": uni(ks[2], (16, 6, 5, 5), 6 * 25),
        "conv2_b": uni(ks[3], (16,), 6 * 25),
        "fc1_w": uni(ks[4], (l1, 16 * 5 * 5), 16 * 5 * 5),
        "fc1_b": uni(ks[5], (l1,), 16 * 5 * 5),
        "fc2_w": uni(ks[6], (l2, l1), l1),
        "fc2_b": uni(ks[7], (l2,), l1),
        "fc3_w": uni(ks[8], (10, l2), l2),
        "fc3_b": uni(ks[9], (10,), l2),
    }


# Pure-JAX f32 reference (sanity check against the Pallas path, original layouts)
def net_reference(x, params):
    def conv(h, w, b):
        y = jax.lax.conv_general_dilated(
            h, w, (1, 1), "VALID", dimension_numbers=("NCHW", "OIHW", "NCHW"))
        return y + b.reshape(1, -1, 1, 1)

    def pool(h):
        return jax.lax.reduce_window(
            h, -jnp.inf, jax.lax.max, (1, 1, 2, 2), (1, 1, 2, 2), "VALID")

    h = pool(jax.nn.relu(conv(x, params["conv1_w"], params["conv1_b"])))
    h = pool(jax.nn.relu(conv(h, params["conv2_w"], params["conv2_b"])))
    h = h.reshape(h.shape[0], -1)
    h = jax.nn.relu(h @ params["fc1_w"].T + params["fc1_b"])
    h = jax.nn.relu(h @ params["fc2_w"].T + params["fc2_b"])
    return h @ params["fc3_w"].T + params["fc3_b"]


if __name__ == "__main__":
    key = jax.random.PRNGKey(0)
    pkey, xkey = jax.random.split(key)
    params = init_params(pkey)
    prep = prepare_params(params)   # one-time weight re-layout + bf16 cast
    # CIFAR geometry is forced by the 16*5*5 flatten: input must be 3x32x32.
    x = jax.random.normal(xkey, (2, 3, 32, 32), jnp.float32)

    out = jax.jit(net_forward)(x, prep)
    out = jax.block_until_ready(out)

    ref = net_reference(x, params)
    assert out.shape == (2, 10)
    err = float(jnp.max(jnp.abs(out - ref)))
    # bf16 MXU operands with f32 accumulation -> slightly looser tolerance than pure f32.
    assert jnp.allclose(out, ref, atol=2e-2, rtol=2e-2), err
    print("KERNEL_OK")
</pallas_src>

<mosaic_0001>
module attributes {stable_mosaic.version = 11 : i64} {
  func.func @_conv_relu_pool_kernel(%arg0: memref<1568x75xbf16, #tpu.memory_space<vmem>>, %arg1: memref<75x6xbf16, #tpu.memory_space<vmem>>, %arg2: memref<1x6xf32, #tpu.memory_space<vmem>>, %arg3: memref<392x6xbf16, #tpu.memory_space<vmem>>) attributes {dimension_semantics = [], scalar_prefetch = 0 : i64, scratch_operands = 0 : i64, tpu.core_type = #tpu.core_type<tc>} {
    %c0 = arith.constant 0 : index
    %c0_0 = arith.constant 0 : index
    %0 = vector.load %arg0[%c0, %c0_0] : memref<1568x75xbf16, #tpu.memory_space<vmem>>, vector<1568x75xbf16>
    %c0_1 = arith.constant 0 : index
    %c0_2 = arith.constant 0 : index
    %1 = vector.load %arg1[%c0_1, %c0_2] : memref<75x6xbf16, #tpu.memory_space<vmem>>, vector<75x6xbf16>
    %cst = arith.constant dense<0.000000e+00> : vector<1568x6xf32>
    %2 = tpu.matmul %0, %1, %cst {dimension_numbers = #tpu.dot_dimension_numbers<[1], [0], [0], [1], [0, 0, 1, 1], [], []>} : vector<1568x75xbf16>, vector<75x6xbf16>, vector<1568x6xf32> -> vector<1568x6xf32>
    %3 = vector.extract_strided_slice %2 {offsets = [0, 0], sizes = [392, 6], strides = [1, 1]} : vector<1568x6xf32> to vector<392x6xf32>
    %4 = vector.extract_strided_slice %2 {offsets = [392, 0], sizes = [392, 6], strides = [1, 1]} : vector<1568x6xf32> to vector<392x6xf32>
    %5 = arith.maximumf %3, %4 : vector<392x6xf32>
    %6 = vector.extract_strided_slice %2 {offsets = [784, 0], sizes = [392, 6], strides = [1, 1]} : vector<1568x6xf32> to vector<392x6xf32>
    %7 = vector.extract_strided_slice %2 {offsets = [1176, 0], sizes = [392, 6], strides = [1, 1]} : vector<1568x6xf32> to vector<392x6xf32>
    %8 = arith.maximumf %6, %7 : vector<392x6xf32>
    %9 = arith.maximumf %5, %8 : vector<392x6xf32>
    %c0_3 = arith.constant 0 : index
    %c0_4 = arith.constant 0 : index
    %10 = vector.load %arg2[%c0_3, %c0_4] : memref<1x6xf32, #tpu.memory_space<vmem>>, vector<1x6xf32>
    %11 = vector.broadcast %10 : vector<1x6xf32> to vector<392x6xf32>
    %12 = arith.addf %9, %11 : vector<392x6xf32>
    %cst_5 = arith.constant 0.000000e+00 : f32
    %13 = vector.broadcast %cst_5 : f32 to vector<392x6xf32>
    %14 = arith.maximumf %12, %13 : vector<392x6xf32>
    %15 = arith.truncf %14 : vector<392x6xf32> to vector<392x6xbf16>
    %c0_6 = arith.constant 0 : index
    %c0_7 = arith.constant 0 : index
    %16 = vector.load %arg3[%c0_6, %c0_7] : memref<392x6xbf16, #tpu.memory_space<vmem>>, vector<392x6xbf16>
    tpu.vector_store %arg3[%c0_6, %c0_7], %15 {strides = array<i32>} : memref<392x6xbf16, #tpu.memory_space<vmem>>, vector<392x6xbf16>,
    return
  }
}

module attributes {stable_mosaic.version = 11 : i64} {
  func.func @_conv_fc_fused_kernel(%arg0: memref<800x150xbf16, #tpu.memory_space<vmem>>, %arg1: memref<150x16xbf16, #tpu.memory_space<vmem>>, %arg2: memref<1x16xf32, #tpu.memory_space<vmem>>, %arg3: memref<400x120xbf16, #tpu.memory_space<vmem>>, %arg4: memref<1x120xf32, #tpu.memory_space<vmem>>, %arg5: memref<120x84xbf16, #tpu.memory_space<vmem>>, %arg6: memref<1x84xf32, #tpu.memory_space<vmem>>, %arg7: memref<84x10xbf16, #tpu.memory_space<vmem>>, %arg8: memref<1x10xf32, #tpu.memory_space<vmem>>, %arg9: memref<2x10xf32, #tpu.memory_space<vmem>>) attributes {dimension_semantics = [], scalar_prefetch = 0 : i64, scratch_operands = 0 : i64, tpu.core_type = #tpu.core_type<tc>} {
    %c0 = arith.constant 0 : index
    %c0_0 = arith.constant 0 : index
    %0 = vector.load %arg0[%c0, %c0_0] : memref<800x150xbf16, #tpu.memory_space<vmem>>, vector<800x150xbf16>
    %c0_1 = arith.constant 0 : index
    %c0_2 = arith.constant 0 : index
    %1 = vector.load %arg1[%c0_1, %c0_2] : memref<150x16xbf16, #tpu.memory_space<vmem>>, vector<150x16xbf16>
    %cst = arith.constant dense<0.000000e+00> : vector<800x16xf32>
    %2 = tpu.matmul %0, %1, %cst {dimension_numbers = #tpu.dot_dimension_numbers<[1], [0], [0], [1], [0, 0, 1, 1], [], []>} : vector<800x150xbf16>, vector<150x16xbf16>, vector<800x16xf32> -> vector<800x16xf32>
    %3 = vector.extract_strided_slice %2 {offsets = [0, 0], sizes = [200, 16], strides = [1, 1]} : vector<800x16xf32> to vector<200x16xf32>
    %4 = vector.extract_strided_slice %2 {offsets = [200, 0], sizes = [200, 16], strides = [1, 1]} : vector<800x16xf32> to vector<200x16xf32>
    %5 = arith.maximumf %3, %4 : vector<200x16xf32>
    %6 = vector.extract_strided_slice %2 {offsets = [400, 0], sizes = [200, 16], strides = [1, 1]} : vector<800x16xf32> to vector<200x16xf32>
    %7 = vector.extract_strided_slice %2 {offsets = [600, 0], sizes = [200, 16], strides = [1, 1]} : vector<800x16xf32> to vector<200x16xf32>
    %8 = arith.maximumf %6, %7 : vector<200x16xf32>
    %9 = arith.maximumf %5, %8 : vector<200x16xf32>
    %c0_3 = arith.constant 0 : index
    %c0_4 = arith.constant 0 : index
    %10 = vector.load %arg2[%c0_3, %c0_4] : memref<1x16xf32, #tpu.memory_space<vmem>>, vector<1x16xf32>
    %11 = vector.broadcast %10 : vector<1x16xf32> to vector<200x16xf32>
    %12 = arith.addf %9, %11 : vector<200x16xf32>
    %cst_5 = arith.constant 0.000000e+00 : f32
    %13 = vector.broadcast %cst_5 : f32 to vector<200x16xf32>
    %14 = arith.maximumf %12, %13 : vector<200x16xf32>
    %15 = vector.extract_strided_slice %14 {offsets = [0, 0], sizes = [8, 16], strides = [1, 1]} : vector<200x16xf32> to vector<8x16xf32>
    %16 = arith.truncf %15 : vector<8x16xf32> to vector<8x16xbf16>
    %c0_6 = arith.constant 0 : index
    %c0_7 = arith.constant 0 : index
    %17 = vector.load %arg3[%c0_6, %c0_7] : memref<400x120xbf16, #tpu.memory_space<vmem>>, vector<16x120xbf16>
    %cst_8 = arith.constant dense<0.000000e+00> : vector<8x120xf32>
    %18 = tpu.matmul %16, %17, %cst_8 {dimension_numbers = #tpu.dot_dimension_numbers<[1], [0], [0], [1], [0, 0, 1, 1], [], []>} : vector<8x16xbf16>, vector<16x120xbf16>, vector<8x120xf32> -> vector<8x120xf32>
    %19 = vector.extract_strided_slice %14 {offsets = [8, 0], sizes = [8, 16], strides = [1, 1]} : vector<200x16xf32> to vector<8x16xf32>
    %20 = arith.truncf %19 : vector<8x16xf32> to vector<8x16xbf16>
    %c16 = arith.constant 16 : index
    %c0_9 = arith.constant 0 : index
    %21 = vector.load %arg3[%c16, %c0_9] : memref<400x120xbf16, #tpu.memory_space<vmem>>, vector<16x120xbf16>
    %cst_10 = arith.constant dense<0.000000e+00> : vector<8x120xf32>
    %22 = tpu.matmul %20, %21, %cst_10 {dimension_numbers = #tpu.dot_dimension_numbers<[1], [0], [0], [1], [0, 0, 1, 1], [], []>} : vector<8x16xbf16>, vector<16x120xbf16>, vector<8x120xf32> -> vector<8x120xf32>
    %23 = vector.extract_strided_slice %14 {offsets = [16, 0], sizes = [8, 16], strides = [1, 1]} : vector<200x16xf32> to vector<8x16xf32>
    %24 = arith.truncf %23 : vector<8x16xf32> to vector<8x16xbf16>
    %c32 = arith.constant 32 : index
    %c0_11 = arith.constant 0 : index
    %25 = vector.load %arg3[%c32, %c0_11] : memref<400x120xbf16, #tpu.memory_space<vmem>>, vector<16x120xbf16>
    %cst_12 = arith.constant dense<0.000000e+00> : vector<8x120xf32>
    %26 = tpu.matmul %24, %25, %cst_12 {dimension_numbers = #tpu.dot_dimension_numbers<[1], [0], [0], [1], [0, 0, 1, 1], [], []>} : vector<8x16xbf16>, vector<16x120xbf16>, vector<8x120xf32> -> vector<8x120xf32>
    %27 = vector.extract_strided_slice %14 {offsets = [24, 0], sizes = [8, 16], strides = [1, 1]} : vector<200x16xf32> to vector<8x16xf32>
    %28 = arith.truncf %27 : vector<8x16xf32> to vector<8x16xbf16>
    %c48 = arith.constant 48 : index
    %c0_13 = arith.constant 0 : index
    %29 = vector.load %arg3[%c48, %c0_13] : memref<400x120xbf16, #tpu.memory_space<vmem>>, vector<16x120xbf16>
    %cst_14 = arith.constant dense<0.000000e+00> : vector<8x120xf32>
    %30 = tpu.matmul %28, %29, %cst_14 {dimension_numbers = #tpu.dot_dimension_numbers<[1], [0], [0], [1], [0, 0, 1, 1], [], []>} : vector<8x16xbf16>, vector<16x120xbf16>, vector<8x120xf32> -> vector<8x120xf32>
    %31 = vector.extract_strided_slice %14 {offsets = [32, 0], sizes = [8, 16], strides = [1, 1]} : vector<200x16xf32> to vector<8x16xf32>
    %32 = arith.truncf %31 : vector<8x16xf32> to vector<8x16xbf16>
    %c64 = arith.constant 64 : index
    %c0_15 = arith.constant 0 : index
    %33 = vector.load %arg3[%c64, %c0_15] : memref<400x120xbf16, #tpu.memory_space<vmem>>, vector<16x120xbf16>
    %cst_16 = arith.constant dense<0.000000e+00> : vector<8x120xf32>
    %34 = tpu.matmul %32, %33, %cst_16 {dimension_numbers = #tpu.dot_dimension_numbers<[1], [0], [0], [1], [0, 0, 1, 1], [], []>} : vector<8x16xbf16>, vector<16x120xbf16>, vector<8x120xf32> -> vector<8x120xf32>
    %35 = vector.extract_strided_slice %14 {offsets = [40, 0], sizes = [8, 16], strides = [1, 1]} : vector<200x16xf32> to vector<8x16xf32>
    %36 = arith.truncf %35 : vector<8x16xf32> to vector<8x16xbf16>
    %c80 = arith.constant 80 : index
    %c0_17 = arith.constant 0 : index
    %37 = vector.load %arg3[%c80, %c0_17] : memref<400x120xbf16, #tpu.memory_space<vmem>>, vector<16x120xbf16>
    %cst_18 = arith.constant dense<0.000000e+00> : vector<8x120xf32>
    %38 = tpu.matmul %36, %37, %cst_18 {dimension_numbers = #tpu.dot_dimension_numbers<[1], [0], [0], [1], [0, 0, 1, 1], [], []>} : vector<8x16xbf16>, vector<16x120xbf16>, vector<8x120xf32> -> vector<8x120xf32>
    %39 = vector.extract_strided_slice %14 {offsets = [48, 0], sizes = [8, 16], strides = [1, 1]} : vector<200x16xf32> to vector<8x16xf32>
    %40 = arith.truncf %39 : vector<8x16xf32> to vector<8x16xbf16>
    %c96 = arith.constant 96 : index
    %c0_19 = arith.constant 0 : index
    %41 = vector.load %arg3[%c96, %c0_19] : memref<400x120xbf16, #tpu.memory_space<vmem>>, vector<16x120xbf16>
    %cst_20 = arith.constant dense<0.000000e+00> : vector<8x120xf32>
    %42 = tpu.matmul %40, %41, %cst_20 {dimension_numbers = #tpu.dot_dimension_numbers<[1], [0], [0], [1], [0, 0, 1, 1], [], []>} : vector<8x16xbf16>, vector<16x120xbf16>, vector<8x120xf32> -> vector<8x120xf32>
    %43 = vector.extract_strided_slice %14 {offsets = [56, 0], sizes = [8, 16], strides = [1, 1]} : vector<200x16xf32> to vector<8x16xf32>
    %44 = arith.truncf %43 : vector<8x16xf32> to vector<8x16xbf16>
    %c112 = arith.constant 112 : index
    %c0_21 = arith.constant 0 : index
    %45 = vector.load %arg3[%c112, %c0_21] : memref<400x120xbf16, #tpu.memory_space<vmem>>, vector<16x120xbf16>
    %cst_22 = arith.constant dense<0.000000e+00> : vector<8x120xf32>
    %46 = tpu.matmul %44, %45, %cst_22 {dimension_numbers = #tpu.dot_dimension_numbers<[1], [0], [0], [1], [0, 0, 1, 1], [], []>} : vector<8x16xbf16>, vector<16x120xbf16>, vector<8x120xf32> -> vector<8x120xf32>
    %47 = vector.extract_strided_slice %14 {offsets = [64, 0], sizes = [8, 16], strides = [1, 1]} : vector<200x16xf32> to vector<8x16xf32>
    %48 = arith.truncf %47 : vector<8x16xf32> to vector<8x16xbf16>
    %c128 = arith.constant 128 : index
    %c0_23 = arith.constant 0 : index
    %49 = vector.load %arg3[%c128, %c0_23] : memref<400x120xbf16, #tpu.memory_space<vmem>>, vector<16x120xbf16>
    %cst_24 = arith.constant dense<0.000000e+00> : vector<8x120xf32>
    %50 = tpu.matmul %48, %49, %cst_24 {dimension_numbers = #tpu.dot_dimension_numbers<[1], [0], [0], [1], [0, 0, 1, 1], [], []>} : vector<8x16xbf16>, vector<16x120xbf16>, vector<8x120xf32> -> vector<8x120xf32>
    %51 = vector.extract_strided_slice %14 {offsets = [72, 0], sizes = [8, 16], strides = [1, 1]} : vector<200x16xf32> to vector<8x16xf32>
    %52 = arith.truncf %51 : vector<8x16xf32> to vector<8x16xbf16>
    %c144 = arith.constant 144 : index
    %c0_25 = arith.constant 0 : index
    %53 = vector.load %arg3[%c144, %c0_25] : memref<400x120xbf16, #tpu.memory_space<vmem>>, vector<16x120xbf16>
    %cst_26 = arith.constant dense<0.000000e+00> : vector<8x120xf32>
    %54 = tpu.matmul %52, %53, %cst_26 {dimension_numbers = #tpu.dot_dimension_numbers<[1], [0], [0], [1], [0, 0, 1, 1], [], []>} : vector<8x16xbf16>, vector<16x120xbf16>, vector<8x120xf32> -> vector<8x120xf32>
    %55 = vector.extract_strided_slice %14 {offsets = [80, 0], sizes = [8, 16], strides = [1, 1]} : vector<200x16xf32> to vector<8x16xf32>
    %56 = arith.truncf %55 : vector<8x16xf32> to vector<8x16xbf16>
    %c160 = arith.constant 160 : index
    %c0_27 = arith.constant 0 : index
    %57 = vector.load %arg3[%c160, %c0_27] : memref<400x120xbf16, #tpu.memory_space<vmem>>, vector<16x120xbf16>
    %cst_28 = arith.constant dense<0.000000e+00> : vector<8x120xf32>
    %58 = tpu.matmul %56, %57, %cst_28 {dimension_numbers = #tpu.dot_dimension_numbers<[1], [0], [0], [1], [0, 0, 1, 1], [], []>} : vector<8x16xbf16>, vector<16x120xbf16>, vector<8x120xf32> -> vector<8x120xf32>
    %59 = vector.extract_strided_slice %14 {offsets = [88, 0], sizes = [8, 16], strides = [1, 1]} : vector<200x16xf32> to vector<8x16xf32>
    %60 = arith.truncf %59 : vector<8x16xf32> to vector<8x16xbf16>
    %c176 = arith.constant 176 : index
    %c0_29 = arith.constant 0 : index
    %61 = vector.load %arg3[%c176, %c0_29] : memref<400x120xbf16, #tpu.memory_space<vmem>>, vector<16x120xbf16>
    %cst_30 = arith.constant dense<0.000000e+00> : vector<8x120xf32>
    %62 = tpu.matmul %60, %61, %cst_30 {dimension_numbers = #tpu.dot_dimension_numbers<[1], [0], [0], [1], [0, 0, 1, 1], [], []>} : vector<8x16xbf16>, vector<16x120xbf16>, vector<8x120xf32> -> vector<8x120xf32>
    %63 = vector.extract_strided_slice %14 {offsets = [96, 0], sizes = [8, 16], strides = [1, 1]} : vector<200x16xf32> to vector<8x16xf32>
    %64 = arith.truncf %63 : vector<8x16xf32> to vector<8x16xbf16>
    %c192 = arith.constant 192 : index
    %c0_31 = arith.constant 0 : index
    %65 = vector.load %arg3[%c192, %c0_31] : memref<400x120xbf16, #tpu.memory_space<vmem>>, vector<16x120xbf16>
    %cst_32 = arith.constant dense<0.000000e+00> : vector<8x120xf32>
    %66 = tpu.matmul %64, %65, %cst_32 {dimension_numbers = #tpu.dot_dimension_numbers<[1], [0], [0], [1], [0, 0, 1, 1], [], []>} : vector<8x16xbf16>, vector<16x120xbf16>, vector<8x120xf32> -> vector<8x120xf32>
    %67 = vector.extract_strided_slice %14 {offsets = [104, 0], sizes = [8, 16], strides = [1, 1]} : vector<200x16xf32> to vector<8x16xf32>
    %68 = arith.truncf %67 : vector<8x16xf32> to vector<8x16xbf16>
    %c208 = arith.constant 208 : index
    %c0_33 = arith.constant 0 : index
    %69 = vector.load %arg3[%c208, %c0_33] : memref<400x120xbf16, #tpu.memory_space<vmem>>, vector<16x120xbf16>
    %cst_34 = arith.constant dense<0.000000e+00> : vector<8x120xf32>
    %70 = tpu.matmul %68, %69, %cst_34 {dimension_numbers = #tpu.dot_dimension_numbers<[1], [0], [0], [1], [0, 0, 1, 1], [], []>} : vector<8x16xbf16>, vector<16x120xbf16>, vector<8x120xf32> -> vector<8x120xf32>
    %71 = vector.extract_strided_slice %14 {offsets = [112, 0], sizes = [8, 16], strides = [1, 1]} : vector<200x16xf32> to vector<8x16xf32>
    %72 = arith.truncf %71 : vector<8x16xf32> to vector<8x16xbf16>
    %c224 = arith.constant 224 : index
    %c0_35 = arith.constant 0 : index
    %73 = vector.load %arg3[%c224, %c0_35] : memref<400x120xbf16, #tpu.memory_space<vmem>>, vector<16x120xbf16>
    %cst_36 = arith.constant dense<0.000000e+00> : vector<8x120xf32>
    %74 = tpu.matmul %72, %73, %cst_36 {dimension_numbers = #tpu.dot_dimension_numbers<[1], [0], [0], [1], [0, 0, 1, 1], [], []>} : vector<8x16xbf16>, vector<16x120xbf16>, vector<8x120xf32> -> vector<8x120xf32>
    %75 = vector.extract_strided_slice %14 {offsets = [120, 0], sizes = [8, 16], strides = [1, 1]} : vector<200x16xf32> to vector<8x16xf32>
    %76 = arith.truncf %75 : vector<8x16xf32> to vector<8x16xbf16>
    %c240 = arith.constant 240 : index
    %c0_37 = arith.constant 0 : index
    %77 = vector.load %arg3[%c240, %c0_37] : memref<400x120xbf16, #tpu.memory_space<vmem>>, vector<16x120xbf16>
    %cst_38 = arith.constant dense<0.000000e+00> : vector<8x120xf32>
    %78 = tpu.matmul %76, %77, %cst_38 {dimension_numbers = #tpu.dot_dimension_numbers<[1], [0], [0], [1], [0, 0, 1, 1], [], []>} : vector<8x16xbf16>, vector<16x120xbf16>, vector<8x120xf32> -> vector<8x120xf32>
    %79 = vector.extract_strided_slice %14 {offsets = [128, 0], sizes = [8, 16], strides = [1, 1]} : vector<200x16xf32> to vector<8x16xf32>
    %80 = arith.truncf %79 : vector<8x16xf32> to vector<8x16xbf16>
    %c256 = arith.constant 256 : index
    %c0_39 = arith.constant 0 : index
    %81 = vector.load %arg3[%c256, %c0_39] : memref<400x120xbf16, #tpu.memory_space<vmem>>, vector<16x120xbf16>
    %cst_40 = arith.constant dense<0.000000e+00> : vector<8x120xf32>
    %82 = tpu.matmul %80, %81, %cst_40 {dimension_numbers = #tpu.dot_dimension_numbers<[1], [0], [0], [1], [0, 0, 1, 1], [], []>} : vector<8x16xbf16>, vector<16x120xbf16>, vector<8x120xf32> -> vector<8x120xf32>
    %83 = vector.extract_strided_slice %14 {offsets = [136, 0], sizes = [8, 16], strides = [1, 1]} : vector<200x16xf32> to vector<8x16xf32>
    %84 = arith.truncf %83 : vector<8x16xf32> to vector<8x16xbf16>
    %c272 = arith.constant 272 : index
    %c0_41 = arith.constant 0 : index
    %85 = vector.load %arg3[%c272, %c0_41] : memref<400x120xbf16, #tpu.memory_space<vmem>>, vector<16x120xbf16>
    %cst_42 = arith.constant dense<0.000000e+00> : vector<8x120xf32>
    %86 = tpu.matmul %84, %85, %cst_42 {dimension_numbers = #tpu.dot_dimension_numbers<[1], [0], [0], [1], [0, 0, 1, 1], [], []>} : vector<8x16xbf16>, vector<16x120xbf16>, vector<8x120xf32> -> vector<8x120xf32>
    %87 = vector.extract_strided_slice %14 {offsets = [144, 0], sizes = [8, 16], strides = [1, 1]} : vector<200x16xf32> to vector<8x16xf32>
    %88 = arith.truncf %87 : vector<8x16xf32> to vector<8x16xbf16>
    %c288 = arith.constant 288 : index
    %c0_43 = arith.constant 0 : index
    %89 = vector.load %arg3[%c288, %c0_43] : memref<400x120xbf16, #tpu.memory_space<vmem>>, vector<16x120xbf16>
    %cst_44 = arith.constant dense<0.000000e+00> : vector<8x120xf32>
    %90 = tpu.matmul %88, %89, %cst_44 {dimension_numbers = #tpu.dot_dimension_numbers<[1], [0], [0], [1], [0, 0, 1, 1], [], []>} : vector<8x16xbf16>, vector<16x120xbf16>, vector<8x120xf32> -> vector<8x120xf32>
    %91 = vector.extract_strided_slice %14 {offsets = [152, 0], sizes = [8, 16], strides = [1, 1]} : vector<200x16xf32> to vector<8x16xf32>
    %92 = arith.truncf %91 : vector<8x16xf32> to vector<8x16xbf16>
    %c304 = arith.constant 304 : index
    %c0_45 = arith.constant 0 : index
    %93 = vector.load %arg3[%c304, %c0_45] : memref<400x120xbf16, #tpu.memory_space<vmem>>, vector<16x120xbf16>
    %cst_46 = arith.constant dense<0.000000e+00> : vector<8x120xf32>
    %94 = tpu.matmul %92, %93, %cst_46 {dimension_numbers = #tpu.dot_dimension_numbers<[1], [0], [0], [1], [0, 0, 1, 1], [], []>} : vector<8x16xbf16>, vector<16x120xbf16>, vector<8x120xf32> -> vector<8x120xf32>
    %95 = vector.extract_strided_slice %14 {offsets = [160, 0], sizes = [8, 16], strides = [1, 1]} : vector<200x16xf32> to vector<8x16xf32>
    %96 = arith.truncf %95 : vector<8x16xf32> to vector<8x16xbf16>
    %c320 = arith.constant 320 : index
    %c0_47 = arith.constant 0 : index
    %97 = vector.load %arg3[%c320, %c0_47] : memref<400x120xbf16, #tpu.memory_space<vmem>>, vector<16x120xbf16>
    %cst_48 = arith.constant dense<0.000000e+00> : vector<8x120xf32>
    %98 = tpu.matmul %96, %97, %cst_48 {dimension_numbers = #tpu.dot_dimension_numbers<[1], [0], [0], [1], [0, 0, 1, 1], [], []>} : vector<8x16xbf16>, vector<16x120xbf16>, vector<8x120xf32> -> vector<8x120xf32>
    %99 = vector.extract_strided_slice %14 {offsets = [168, 0], sizes = [8, 16], strides = [1, 1]} : vector<200x16xf32> to vector<8x16xf32>
    %100 = arith.truncf %99 : vector<8x16xf32> to vector<8x16xbf16>
    %c336 = arith.constant 336 : index
    %c0_49 = arith.constant 0 : index
    %101 = vector.load %arg3[%c336, %c0_49] : memref<400x120xbf16, #tpu.memory_space<vmem>>, vector<16x120xbf16>
    %cst_50 = arith.constant dense<0.000000e+00> : vector<8x120xf32>
    %102 = tpu.matmul %100, %101, %cst_50 {dimension_numbers = #tpu.dot_dimension_numbers<[1], [0], [0], [1], [0, 0, 1, 1], [], []>} : vector<8x16xbf16>, vector<16x120xbf16>, vector<8x120xf32> -> vector<8x120xf32>
    %103 = vector.extract_strided_slice %14 {offsets = [176, 0], sizes = [8, 16], strides = [1, 1]} : vector<200x16xf32> to vector<8x16xf32>
    %104 = arith.truncf %103 : vector<8x16xf32> to vector<8x16xbf16>
    %c352 = arith.constant 352 : index
    %c0_51 = arith.constant 0 : index
    %105 = vector.load %arg3[%c352, %c0_51] : memref<400x120xbf16, #tpu.memory_space<vmem>>, vector<16x120xbf16>
    %cst_52 = arith.constant dense<0.000000e+00> : vector<8x120xf32>
    %106 = tpu.matmul %104, %105, %cst_52 {dimension_numbers = #tpu.dot_dimension_numbers<[1], [0], [0], [1], [0, 0, 1, 1], [], []>} : vector<8x16xbf16>, vector<16x120xbf16>, vector<8x120xf32> -> vector<8x120xf32>
    %107 = vector.extract_strided_slice %14 {offsets = [184, 0], sizes = [8, 16], strides = [1, 1]} : vector<200x16xf32> to vector<8x16xf32>
    %108 = arith.truncf %107 : vector<8x16xf32> to vector<8x16xbf16>
    %c368 = arith.constant 368 : index
    %c0_53 = arith.constant 0 : index
    %109 = vector.load %arg3[%c368, %c0_53] : memref<400x120xbf16, #tpu.memory_space<vmem>>, vector<16x120xbf16>
    %cst_54 = arith.constant dense<0.000000e+00> : vector<8x120xf32>
    %110 = tpu.matmul %108, %109, %cst_54 {dimension_numbers = #tpu.dot_dimension_numbers<[1], [0], [0], [1], [0, 0, 1, 1], [], []>} : vector<8x16xbf16>, vector<16x120xbf16>, vector<8x120xf32> -> vector<8x120xf32>
    %111 = vector.extract_strided_slice %14 {offsets = [192, 0], sizes = [8, 16], strides = [1, 1]} : vector<200x16xf32> to vector<8x16xf32>
    %112 = arith.truncf %111 : vector<8x16xf32> to vector<8x16xbf16>
    %c384 = arith.constant 384 : index
    %c0_55 = arith.constant 0 : index
    %113 = vector.load %arg3[%c384, %c0_55] : memref<400x120xbf16, #tpu.memory_space<vmem>>, vector<16x120xbf16>
    %cst_56 = arith.constant dense<0.000000e+00> : vector<8x120xf32>
    %114 = tpu.matmul %112, %113, %cst_56 {dimension_numbers = #tpu.dot_dimension_numbers<[1], [0], [0], [1], [0, 0, 1, 1], [], []>} : vector<8x16xbf16>, vector<16x120xbf16>, vector<8x120xf32> -> vector<8x120xf32>
    %115 = arith.addf %18, %22 : vector<8x120xf32>
    %116 = arith.addf %115, %26 : vector<8x120xf32>
    %117 = arith.addf %116, %30 : vector<8x120xf32>
    %118 = arith.addf %117, %34 : vector<8x120xf32>
    %119 = arith.addf %118, %38 : vector<8x120xf32>
    %120 = arith.addf %119, %42 : vector<8x120xf32>
    %121 = arith.addf %120, %46 : vector<8x120xf32>
    %122 = arith.addf %121, %50 : vector<8x120xf32>
    %123 = arith.addf %122, %54 : vector<8x120xf32>
    %124 = arith.addf %123, %58 : vector<8x120xf32>
    %125 = arith.addf %124, %62 : vector<8x120xf32>
    %126 = arith.addf %125, %66 : vector<8x120xf32>
    %127 = arith.addf %126, %70 : vector<8x120xf32>
    %128 = arith.addf %127, %74 : vector<8x120xf32>
    %129 = arith.addf %128, %78 : vector<8x120xf32>
    %130 = arith.addf %129, %82 : vector<8x120xf32>
    %131 = arith.addf %130, %86 : vector<8x120xf32>
    %132 = arith.addf %131, %90 : vector<8x120xf32>
    %133 = arith.addf %132, %94 : vector<8x120xf32>
    %134 = arith.addf %133, %98 : vector<8x120xf32>
    %135 = arith.addf %134, %102 : vector<8x120xf32>
    %136 = arith.addf %135, %106 : vector<8x120xf32>
    %137 = arith.addf %136, %110 : vector<8x120xf32>
    %138 = arith.addf %137, %114 : vector<8x120xf32>
    %c0_57 = arith.constant 0 : index
    %c0_58 = arith.constant 0 : index
    %139 = vector.load %arg4[%c0_57, %c0_58] : memref<1x120xf32, #tpu.memory_space<vmem>>, vector<1x120xf32>
    %140 = vector.broadcast %139 : vector<1x120xf32> to vector<8x120xf32>
    %141 = arith.addf %138, %140 : vector<8x120xf32>
    %cst_59 = arith.constant 0.000000e+00 : f32
    %142 = vector.broadcast %cst_59 : f32 to vector<8x120xf32>
    %143 = arith.maximumf %141, %142 : vector<8x120xf32>
    %144 = arith.truncf %143 : vector<8x120xf32> to vector<8x120xbf16>
    %c0_60 = arith.constant 0 : index
    %c0_61 = arith.constant 0 : index
    %145 = vector.load %arg5[%c0_60, %c0_61] : memref<120x84xbf16, #tpu.memory_space<vmem>>, vector<120x84xbf16>
    %cst_62 = arith.constant dense<0.000000e+00> : vector<8x84xf32>
    %146 = tpu.matmul %144, %145, %cst_62 {dimension_numbers = #tpu.dot_dimension_numbers<[1], [0], [0], [1], [0, 0, 1, 1], [], []>} : vector<8x120xbf16>, vector<120x84xbf16>, vector<8x84xf32> -> vector<8x84xf32>
    %c0_63 = arith.constant 0 : index
    %c0_64 = arith.constant 0 : index
    %147 = vector.load %arg6[%c0_63, %c0_64] : memref<1x84xf32, #tpu.memory_space<vmem>>, vector<1x84xf32>
    %148 = vector.broadcast %147 : vector<1x84xf32> to vector<8x84xf32>
    %149 = arith.addf %146, %148 : vector<8x84xf32>
    %cst_65 = arith.constant 0.000000e+00 : f32
    %150 = vector.broadcast %cst_65 : f32 to vector<8x84xf32>
    %151 = arith.maximumf %149, %150 : vector<8x84xf32>
    %152 = arith.truncf %151 : vector<8x84xf32> to vector<8x84xbf16>
    %c0_66 = arith.constant 0 : index
    %c0_67 = arith.constant 0 : index
    %153 = vector.load %arg7[%c0_66, %c0_67] : memref<84x10xbf16, #tpu.memory_space<vmem>>, vector<84x10xbf16>
    %cst_68 = arith.constant dense<0.000000e+00> : vector<8x10xf32>
    %154 = tpu.matmul %152, %153, %cst_68 {dimension_numbers = #tpu.dot_dimension_numbers<[1], [0], [0], [1], [0, 0, 1, 1], [], []>} : vector<8x84xbf16>, vector<84x10xbf16>, vector<8x10xf32> -> vector<8x10xf32>
    %c0_69 = arith.constant 0 : index
    %c0_70 = arith.constant 0 : index
    %155 = vector.load %arg8[%c0_69, %c0_70] : memref<1x10xf32, #tpu.memory_space<vmem>>, vector<1x10xf32>
    %156 = vector.broadcast %155 : vector<1x10xf32> to vector<8x10xf32>
    %157 = arith.addf %154, %156 : vector<8x10xf32>
    %158 = vector.extract_strided_slice %157 {offsets = [0, 0], sizes = [2, 10], strides = [1, 1]} : vector<8x10xf32> to vector<2x10xf32>
    %c0_71 = arith.constant 0 : index
    %c0_72 = arith.constant 0 : index
    %159 = vector.load %arg9[%c0_71, %c0_72] : memref<2x10xf32, #tpu.memory_space<vmem>>, vector<2x10xf32>
    tpu.vector_store %arg9[%c0_71, %c0_72], %158 {strides = array<i32>} : memref<2x10xf32, #tpu.memory_space<vmem>>, vector<2x10xf32>,
    return
  }
}

</mosaic_0001>

<bundles_post_ra>
// kernel: net_forward.2
= control target key start
LH: loop header
LB: loop body
LE: loop exit
PB: predicated region body
PF: predicated region fallthrough
CT: control target
= control target key end

     0   :  { %vm1035_vm0 = vcmask 1044480   ;;  %vm1036_vm1 = vcmask 1045504   ;;  %v3085_v1 = vmov 65535   ;;  %vm740_vm2 = vcmask 613376   ;;  %s4063_s1 = inlined_call_operand.vmem [shape: bf16[75,6], index: 1, kind: input, shape index: {}]   ;;  %s4064_s0 = inlined_call_operand.vmem [shape: bf16[1568,75], index: 0, kind: input, shape index: {}]   ;;  %s4065_s2 = inlined_call_operand.vmem [shape: f32[1,6], index: 2, kind: input, shape index: {}]   ;;  %s4066_s3 = inlined_call_operand.vmem [shape: bf16[392,6], index: 3, kind: output, shape index: {}]  }
   0x1   :  { %v2982_v0 = vld [vmem:[%s4063_s1 + $0x20] sm:$0x3f]   ;;  %v1037_v2 = vsel %vm1035_vm0, 4294967295, %v3085_v1  ;;  %v2983_v5 = vld [vmem:[%s4063_s1 + $0x18] sm:$0xff]   ;;  %v2988_v7 = vld [vmem:[%s4064_s0 + $0x190] sm:$0xff]   ;;  %vm2308_vm3 = vcmask 44032  }
   0x2   :  { %v1038_v3 = vsel %vm1036_vm1, %v1037_v2, 0  ;;  %v2987_v6 = vld [vmem:[%s4064_s0] sm:$0xff]   ;;  %v2984_v8 = vld [vmem:[%s4063_s1 + $0x10] sm:$0xff]   ;;  %2875 = vmatprep.mubr.msk.bf16.mxu1 %vm740_vm2, %v2988_v7  ;;  %v2985_v9 = vld [vmem:[%s4063_s1 + $0x8] sm:$0xff]  }
   0x3   :  { %v1040_v4 = vand.u32 %v2982_v0, %v1038_v3  ;;  %2775 = vmatprep.mubr.msk.bf16.mxu0 %vm740_vm2, %v2987_v6  ;;  %v2986_v10 = vld [vmem:[%s4063_s1] sm:$0xff]   ;;  %v2989_v11 = vld [vmem:[%s4064_s0 + $0x8] sm:$0xff]   ;;  %v2990_v12 = vld [vmem:[%s4064_s0 + $0x198] sm:$0xff]  }
   0x4   :  { %v2991_v13 = vld [vmem:[%s4064_s0 + $0x10] sm:$0xff]   ;;  %v2992_v14 = vld [vmem:[%s4064_s0 + $0x1a0] sm:$0xff]   ;;  %v2993_v15 = vld [vmem:[%s4064_s0 + $0x18] sm:$0xff]  }
   0x5   :  { %2765 = vmatprep.subr.bf16.mxu0 %v1040_v4  ;;  %2971 = vmatprep.subr.bf16.mxu1 %v1040_v4  ;;  %v2994_v16 = vld [vmem:[%s4064_s0 + $0x1a8] sm:$0xff]   ;;  %v2995_v17 = vld [vmem:[%s4064_s0 + $0x20] sm:$0xff]   ;;  %v2996_v18 = vld [vmem:[%s4064_s0 + $0x1b0] sm:$0xff]  }
   0x6   :  { %2766 = vmatpush3.bf16.msra.mxu0 %v1040_v4  ;;  %2976 = vmatpush3.bf16.msra.mxu1 %v1040_v4  ;;  %v2997_v19 = vld [vmem:[%s4064_s0 + $0x28] sm:$0xff]   ;;  %v2998_v20 = vld [vmem:[%s4064_s0 + $0x1b8] sm:$0xff]   ;;  %v2999_v21 = vld [vmem:[%s4064_s0 + $0x30] sm:$0xff]  }
   0x7   :  { %2767 = vmatprep.subr.bf16.mxu0 %v2983_v5  ;;  %2972 = vmatprep.subr.bf16.mxu1 %v2983_v5  ;;  %v3000_v22 = vld [vmem:[%s4064_s0 + $0x1c0] sm:$0xff]   ;;  %v3001_v23 = vld [vmem:[%s4064_s0 + $0x38] sm:$0xff]   ;;  %v3002_v24 = vld [vmem:[%s4064_s0 + $0x1c8] sm:$0xff]  }
   0x8   :  { %v3003_v25 = vld [vmem:[%s4064_s0 + $0x40] sm:$0xff]   ;;  %v3004_v26 = vld [vmem:[%s4064_s0 + $0x1d0] sm:$0xff]   ;;  %v3005_v27 = vld [vmem:[%s4064_s0 + $0x48] sm:$0xff]  }
   0x9   :  { %v3006_v28 = vld [vmem:[%s4064_s0 + $0x1d8] sm:$0xff]   ;;  %v3007_v29 = vld [vmem:[%s4064_s0 + $0x50] sm:$0xff]   ;;  %v3008_v30 = vld [vmem:[%s4064_s0 + $0x1e0] sm:$0xff]  }
   0xa   :  { %2768 = vmatpush3.bf16.msra.mxu0 %v2983_v5  ;;  %2977 = vmatpush3.bf16.msra.mxu1 %v2983_v5  ;;  %v3009_v31 = vld [vmem:[%s4064_s0 + $0x58] sm:$0xff]   ;;  %v3010_v32 = vld [vmem:[%s4064_s0 + $0x1e8] sm:$0xff]   ;;  %v3011_v33 = vld [vmem:[%s4064_s0 + $0x60] sm:$0xff]  }
   0xb   :  { %2769 = vmatprep.subr.bf16.mxu0 %v2984_v8  ;;  %2973 = vmatprep.subr.bf16.mxu1 %v2984_v8  ;;  %v3012_v34 = vld [vmem:[%s4064_s0 + $0x1f0] sm:$0xff]   ;;  %v3013_v35 = vld [vmem:[%s4064_s0 + $0x68] sm:$0xff]   ;;  %v3014_v36 = vld [vmem:[%s4064_s0 + $0x1f8] sm:$0xff]  }
   0xc   :  { %v3015_v37 = vld [vmem:[%s4064_s0 + $0x70] sm:$0xff]   ;;  %v3016_v38 = vld [vmem:[%s4064_s0 + $0x200] sm:$0xff]   ;;  %v3017_v39 = vld [vmem:[%s4064_s0 + $0x78] sm:$0xff]  }
   0xd   :  { %v3018_v40 = vld [vmem:[%s4064_s0 + $0x208] sm:$0xff]   ;;  %v3019_v41 = vld [vmem:[%s4064_s0 + $0x80] sm:$0xff]   ;;  %v3020_v42 = vld [vmem:[%s4064_s0 + $0x210] sm:$0xff]  }
   0xe   :  { %2770 = vmatpush3.bf16.msra.mxu0 %v2984_v8  ;;  %2978 = vmatpush3.bf16.msra.mxu1 %v2984_v8  ;;  %v3021_v43 = vld [vmem:[%s4064_s0 + $0x88] sm:$0xff]   ;;  %v3022_v44 = vld [vmem:[%s4064_s0 + $0x218] sm:$0xff]   ;;  %v3023_v45 = vld [vmem:[%s4064_s0 + $0x90] sm:$0xff]  }
   0xf   :  { %2771 = vmatprep.subr.bf16.mxu0 %v2985_v9  ;;  %2974 = vmatprep.subr.bf16.mxu1 %v2985_v9  ;;  %v3024_v46 = vld [vmem:[%s4064_s0 + $0x220] sm:$0xff]   ;;  %v3025_v47 = vld [vmem:[%s4064_s0 + $0x98] sm:$0xff]   ;;  %v3026_v48 = vld [vmem:[%s4064_s0 + $0x228] sm:$0xff]  }
  0x10   :  { %v3027_v49 = vld [vmem:[%s4064_s0 + $0xa0] sm:$0xff]   ;;  %v3028_v50 = vld [vmem:[%s4064_s0 + $0x230] sm:$0xff]   ;;  %v3029_v51 = vld [vmem:[%s4064_s0 + $0xa8] sm:$0xff]  }
  0x11   :  { %v3030_v52 = vld [vmem:[%s4064_s0 + $0x238] sm:$0xff]   ;;  %v3031_v53 = vld [vmem:[%s4064_s0 + $0xb0] sm:$0xff]   ;;  %v3032_v54 = vld [vmem:[%s4064_s0 + $0x240] sm:$0xff]  }
  0x12   :  { %2772 = vmatpush3.bf16.msra.mxu0 %v2985_v9  ;;  %2979 = vmatpush3.bf16.msra.mxu1 %v2985_v9  ;;  %v3033_v55 = vld [vmem:[%s4064_s0 + $0xb8] sm:$0xff]   ;;  %v3034_v56 = vld [vmem:[%s4064_s0 + $0x248] sm:$0xff]   ;;  %v3035_v57 = vld [vmem:[%s4064_s0 + $0xc0] sm:$0xff]  }
  0x13   :  { %2773 = vmatprep.subr.bf16.mxu0 %v2986_v10  ;;  %2975 = vmatprep.subr.bf16.mxu1 %v2986_v10  ;;  %v3036_v58 = vld [vmem:[%s4064_s0 + $0x250] sm:$0xff]   ;;  %v3037_v59 = vld [vmem:[%s4064_s0 + $0xc8] sm:$0xff]   ;;  %v3038_v60 = vld [vmem:[%s4064_s0 + $0x258] sm:$0xff]  }
  0x14   :  { %v3039_v61 = vld [vmem:[%s4064_s0 + $0xd0] sm:$0xff]   ;;  %v3040_v62 = vld [vmem:[%s4064_s0 + $0x260] sm:$0xff]   ;;  %v3041_v63 = vld [vmem:[%s4064_s0 + $0xd8] sm:$0xff]  }
  0x15   :  { %v3042_v0 = vld [vmem:[%s4064_s0 + $0x268] sm:$0xff]   ;;  %v3043_v1 = vld [vmem:[%s4064_s0 + $0xe0] sm:$0xff]   ;;  %v3044_v2 = vld [vmem:[%s4064_s0 + $0x270] sm:$0xff]  }
  0x16   :  { %2774 = vmatpush3.bf16.msra.mxu0 %v2986_v10  ;;  %2980 = vmatpush3.bf16.msra.mxu1 %v2986_v10  ;;  %v3045_v3 = vld [vmem:[%s4064_s0 + $0xe8] sm:$0xff]   ;;  %v3046_v4 = vld [vmem:[%s4064_s0 + $0x278] sm:$0xff]   ;;  %v3047_v5 = vld [vmem:[%s4064_s0 + $0xf0] sm:$0xff]  }
  0x17   :  { %v3048_v6 = vld [vmem:[%s4064_s0 + $0x280] sm:$0xff]   ;;  %v3049_v7 = vld [vmem:[%s4064_s0 + $0xf8] sm:$0xff]   ;;  %v3050_v8 = vld [vmem:[%s4064_s0 + $0x288] sm:$0xff]  }
  0x18   :  { %v3051_v9 = vld [vmem:[%s4064_s0 + $0x100] sm:$0xff]   ;;  %v3052_v10 = vld [vmem:[%s4064_s0 + $0x290] sm:$0xff]  }
  0x19   :  { %2776 = vmatmul.mubr.msk.bf16.vlgmr.msra.gmra.mxu0 %vm740_vm2, %v2989_v11  ;;  %2876 = vmatmul.mubr.msk.bf16.vlgmr.msra.gmra.mxu1 %vm740_vm2, %v2990_v12  ;;  %v3053_v11 = vld [vmem:[%s4064_s0 + $0x108] sm:$0xff]   ;;  %v3054_v12 = vld [vmem:[%s4064_s0 + $0x298] sm:$0xff]  }
  0x1a   :  { %2779 = vmatprep.mubr.msk.bf16.mxu0 %vm740_vm2, %v2991_v13  ;;  %2879 = vmatprep.mubr.msk.bf16.mxu1 %vm740_vm2, %v2992_v14  ;;  %v3055_v13 = vld [vmem:[%s4064_s0 + $0x110] sm:$0xff]   ;;  %v3056_v14 = vld [vmem:[%s4064_s0 + $0x2a0] sm:$0xff]  }
  0x21   :  { %2780 = vmatmul.mubr.msk.bf16.gmra.mxu0 %vm740_vm2, %v2993_v15  ;;  %2880 = vmatmul.mubr.msk.bf16.gmra.mxu1 %vm740_vm2, %v2994_v16  ;;  %v3057_v15 = vld [vmem:[%s4064_s0 + $0x118] sm:$0xff]   ;;  %v3058_v16 = vld [vmem:[%s4064_s0 + $0x2a8] sm:$0xff]  }
  0x22   :  { %2783 = vmatprep.mubr.msk.bf16.mxu0 %vm740_vm2, %v2995_v17  ;;  %2883 = vmatprep.mubr.msk.bf16.mxu1 %vm740_vm2, %v2996_v18  ;;  %v3059_v17 = vld [vmem:[%s4064_s0 + $0x120] sm:$0xff]   ;;  %v3060_v18 = vld [vmem:[%s4064_s0 + $0x2b0] sm:$0xff]  }
  0x29   :  { %2784 = vmatmul.mubr.msk.bf16.gmra.mxu0 %vm740_vm2, %v2997_v19  ;;  %2884 = vmatmul.mubr.msk.bf16.gmra.mxu1 %vm740_vm2, %v2998_v20  ;;  %v3061_v19 = vld [vmem:[%s4064_s0 + $0x128] sm:$0xff]   ;;  %v3062_v20 = vld [vmem:[%s4064_s0 + $0x2b8] sm:$0xff]  }
  0x2a   :  { %2787 = vmatprep.mubr.msk.bf16.mxu0 %vm740_vm2, %v2999_v21  ;;  %2887 = vmatprep.mubr.msk.bf16.mxu1 %vm740_vm2, %v3000_v22  ;;  %v3063_v21 = vld [vmem:[%s4064_s0 + $0x130] sm:$0xff]   ;;  %v3064_v22 = vld [vmem:[%s4064_s0 + $0x2c0] sm:$0xff]  }
  0x31   :  { %2788 = vmatmul.mubr.msk.bf16.gmra.mxu0 %vm740_vm2, %v3001_v23  ;;  %2888 = vmatmul.mubr.msk.bf16.gmra.mxu1 %vm740_vm2, %v3002_v24  ;;  %v3065_v23 = vld [vmem:[%s4064_s0 + $0x138] sm:$0xff]   ;;  %v3066_v24 = vld [vmem:[%s4064_s0 + $0x2c8] sm:$0xff]  }
  0x32   :  { %2791 = vmatprep.mubr.msk.bf16.mxu0 %vm740_vm2, %v3003_v25  ;;  %2891 = vmatprep.mubr.msk.bf16.mxu1 %vm740_vm2, %v3004_v26  ;;  %v3067_v25 = vld [vmem:[%s4064_s0 + $0x140] sm:$0xff]   ;;  %v3068_v26 = vld [vmem:[%s4064_s0 + $0x2d0] sm:$0xff]  }
  0x39   :  { %2792 = vmatmul.mubr.msk.bf16.gmra.mxu0 %vm740_vm2, %v3005_v27  ;;  %2892 = vmatmul.mubr.msk.bf16.gmra.mxu1 %vm740_vm2, %v3006_v28  ;;  %v3069_v27 = vld [vmem:[%s4064_s0 + $0x148] sm:$0xff]   ;;  %v3070_v28 = vld [vmem:[%s4064_s0 + $0x2d8] sm:$0xff]  }
  0x3a   :  { %2795 = vmatprep.mubr.msk.bf16.mxu0 %vm740_vm2, %v3007_v29  ;;  %2895 = vmatprep.mubr.msk.bf16.mxu1 %vm740_vm2, %v3008_v30  ;;  %v3071_v29 = vld [vmem:[%s4064_s0 + $0x150] sm:$0xff]   ;;  %v3072_v30 = vld [vmem:[%s4064_s0 + $0x2e0] sm:$0xff]  }
  0x41   :  { %2796 = vmatmul.mubr.msk.bf16.gmra.mxu0 %vm740_vm2, %v3009_v31  ;;  %2896 = vmatmul.mubr.msk.bf16.gmra.mxu1 %vm740_vm2, %v3010_v32  ;;  %v3073_v31 = vld [vmem:[%s4064_s0 + $0x158] sm:$0xff]   ;;  %v3074_v32 = vld [vmem:[%s4064_s0 + $0x2e8] sm:$0xff]  }
  0x42   :  { %2799 = vmatprep.mubr.msk.bf16.mxu0 %vm740_vm2, %v3011_v33  ;;  %2899 = vmatprep.mubr.msk.bf16.mxu1 %vm740_vm2, %v3012_v34  ;;  %v3075_v33 = vld [vmem:[%s4064_s0 + $0x160] sm:$0xff]   ;;  %v3076_v34 = vld [vmem:[%s4064_s0 + $0x2f0] sm:$0xff]  }
  0x49   :  { %2800 = vmatmul.mubr.msk.bf16.gmra.mxu0 %vm740_vm2, %v3013_v35  ;;  %2900 = vmatmul.mubr.msk.bf16.gmra.mxu1 %vm740_vm2, %v3014_v36  ;;  %v3077_v35 = vld [vmem:[%s4064_s0 + $0x168] sm:$0xff]   ;;  %v3078_v36 = vld [vmem:[%s4064_s0 + $0x2f8] sm:$0xff]  }
  0x4a   :  { %2803 = vmatprep.mubr.msk.bf16.mxu0 %vm740_vm2, %v3015_v37  ;;  %2903 = vmatprep.mubr.msk.bf16.mxu1 %vm740_vm2, %v3016_v38  ;;  %v3079_v37 = vld [vmem:[%s4064_s0 + $0x170] sm:$0xff]   ;;  %v3080_v38 = vld [vmem:[%s4064_s0 + $0x300] sm:$0xff]  }
  0x51   :  { %2804 = vmatmul.mubr.msk.bf16.gmra.mxu0 %vm740_vm2, %v3017_v39  ;;  %2904 = vmatmul.mubr.msk.bf16.gmra.mxu1 %vm740_vm2, %v3018_v40  ;;  %v3081_v39 = vld [vmem:[%s4064_s0 + $0x178] sm:$0xff]   ;;  %v3082_v40 = vld [vmem:[%s4064_s0 + $0x308] sm:$0xff]  }
  0x52   :  { %2807 = vmatprep.mubr.msk.bf16.mxu0 %vm740_vm2, %v3019_v41  ;;  %2907 = vmatprep.mubr.msk.bf16.mxu1 %vm740_vm2, %v3020_v42  ;;  %v3083_v41 = vld [vmem:[%s4064_s0 + $0x180] sm:$0xff]   ;;  %v3084_v42 = vld [vmem:[%s4064_s0 + $0x188] sm:$0xff]  }
  0x59   :  { %2808 = vmatmul.mubr.msk.bf16.gmra.mxu0 %vm740_vm2, %v3021_v43  ;;  %2908 = vmatmul.mubr.msk.bf16.gmra.mxu1 %vm740_vm2, %v3022_v44 }
  0x5a   :  { %2811 = vmatprep.mubr.msk.bf16.mxu0 %vm740_vm2, %v3023_v45  ;;  %2911 = vmatprep.mubr.msk.bf16.mxu1 %vm740_vm2, %v3024_v46 }
  0x61   :  { %2812 = vmatmul.mubr.msk.bf16.gmra.mxu0 %vm740_vm2, %v3025_v47  ;;  %2912 = vmatmul.mubr.msk.bf16.gmra.mxu1 %vm740_vm2, %v3026_v48 }
  0x62   :  { %2815 = vmatprep.mubr.msk.bf16.mxu0 %vm740_vm2, %v3027_v49  ;;  %2915 = vmatprep.mubr.msk.bf16.mxu1 %vm740_vm2, %v3028_v50 }
  0x69   :  { %2816 = vmatmul.mubr.msk.bf16.gmra.mxu0 %vm740_vm2, %v3029_v51  ;;  %2916 = vmatmul.mubr.msk.bf16.gmra.mxu1 %vm740_vm2, %v3030_v52 }
  0x6a   :  { %2819 = vmatprep.mubr.msk.bf16.mxu0 %vm740_vm2, %v3031_v53  ;;  %2919 = vmatprep.mubr.msk.bf16.mxu1 %vm740_vm2, %v3032_v54 }
  0x71   :  { %2820 = vmatmul.mubr.msk.bf16.gmra.mxu0 %vm740_vm2, %v3033_v55  ;;  %2920 = vmatmul.mubr.msk.bf16.gmra.mxu1 %vm740_vm2, %v3034_v56 }
  0x72   :  { %2823 = vmatprep.mubr.msk.bf16.mxu0 %vm740_vm2, %v3035_v57  ;;  %2923 = vmatprep.mubr.msk.bf16.mxu1 %vm740_vm2, %v3036_v58 }
  0x79   :  { %2824 = vmatmul.mubr.msk.bf16.gmra.mxu0 %vm740_vm2, %v3037_v59  ;;  %2924 = vmatmul.mubr.msk.bf16.gmra.mxu1 %vm740_vm2, %v3038_v60 }
  0x7a   :  { %2827 = vmatprep.mubr.msk.bf16.mxu0 %vm740_vm2, %v3039_v61  ;;  %2927 = vmatprep.mubr.msk.bf16.mxu1 %vm740_vm2, %v3040_v62 }
  0x81   :  { %2828 = vmatmul.mubr.msk.bf16.gmra.mxu0 %vm740_vm2, %v3041_v63  ;;  %2928 = vmatmul.mubr.msk.bf16.gmra.mxu1 %vm740_vm2, %v3042_v0 }
  0x82   :  { %2831 = vmatprep.mubr.msk.bf16.mxu0 %vm740_vm2, %v3043_v1  ;;  %2931 = vmatprep.mubr.msk.bf16.mxu1 %vm740_vm2, %v3044_v2 }
  0x89   :  { %2832 = vmatmul.mubr.msk.bf16.gmra.mxu0 %vm740_vm2, %v3045_v3  ;;  %2932 = vmatmul.mubr.msk.bf16.gmra.mxu1 %vm740_vm2, %v3046_v4 }
  0x8a   :  { %2835 = vmatprep.mubr.msk.bf16.mxu0 %vm740_vm2, %v3047_v5  ;;  %2935 = vmatprep.mubr.msk.bf16.mxu1 %vm740_vm2, %v3048_v6 }
  0x91   :  { %2836 = vmatmul.mubr.msk.bf16.gmra.mxu0 %vm740_vm2, %v3049_v7  ;;  %2936 = vmatmul.mubr.msk.bf16.gmra.mxu1 %vm740_vm2, %v3050_v8 }
  0x92   :  { %2839 = vmatprep.mubr.msk.bf16.mxu0 %vm740_vm2, %v3051_v9  ;;  %2939 = vmatprep.mubr.msk.bf16.mxu1 %vm740_vm2, %v3052_v10 }
  0x99   :  { %2840 = vmatmul.mubr.msk.bf16.gmra.mxu0 %vm740_vm2, %v3053_v11  ;;  %2940 = vmatmul.mubr.msk.bf16.gmra.mxu1 %vm740_vm2, %v3054_v12 }
  0x9a   :  { %2843 = vmatprep.mubr.msk.bf16.mxu0 %vm740_vm2, %v3055_v13  ;;  %2943 = vmatprep.mubr.msk.bf16.mxu1 %vm740_vm2, %v3056_v14 }
  0xa1   :  { %2844 = vmatmul.mubr.msk.bf16.gmra.mxu0 %vm740_vm2, %v3057_v15  ;;  %2944 = vmatmul.mubr.msk.bf16.gmra.mxu1 %vm740_vm2, %v3058_v16 }
  0xa2   :  { %2847 = vmatprep.mubr.msk.bf16.mxu0 %vm740_vm2, %v3059_v17  ;;  %2947 = vmatprep.mubr.msk.bf16.mxu1 %vm740_vm2, %v3060_v18 }
  0xa9   :  { %2848 = vmatmul.mubr.msk.bf16.gmra.mxu0 %vm740_vm2, %v3061_v19  ;;  %2948 = vmatmul.mubr.msk.bf16.gmra.mxu1 %vm740_vm2, %v3062_v20 }
  0xaa   :  { %2851 = vmatprep.mubr.msk.bf16.mxu0 %vm740_vm2, %v3063_v21  ;;  %2951 = vmatprep.mubr.msk.bf16.mxu1 %vm740_vm2, %v3064_v22 }
  0xb1   :  { %2852 = vmatmul.mubr.msk.bf16.gmra.mxu0 %vm740_vm2, %v3065_v23  ;;  %2952 = vmatmul.mubr.msk.bf16.gmra.mxu1 %vm740_vm2, %v3066_v24 }
  0xb2   :  { %2855 = vmatprep.mubr.msk.bf16.mxu0 %vm740_vm2, %v3067_v25  ;;  %2955 = vmatprep.mubr.msk.bf16.mxu1 %vm740_vm2, %v3068_v26 }
  0xb9   :  { %2856 = vmatmul.mubr.msk.bf16.gmra.mxu0 %vm740_vm2, %v3069_v27  ;;  %2956 = vmatmul.mubr.msk.bf16.gmra.mxu1 %vm740_vm2, %v3070_v28 }
  0xba   :  { %2859 = vmatprep.mubr.msk.bf16.mxu0 %vm740_vm2, %v3071_v29  ;;  %2959 = vmatprep.mubr.msk.bf16.mxu1 %vm740_vm2, %v3072_v30 }
  0xc1   :  { %2860 = vmatmul.mubr.msk.bf16.gmra.mxu0 %vm740_vm2, %v3073_v31  ;;  %2960 = vmatmul.mubr.msk.bf16.gmra.mxu1 %vm740_vm2, %v3074_v32 }
  0xc2   :  { %2863 = vmatprep.mubr.msk.bf16.mxu0 %vm740_vm2, %v3075_v33  ;;  %2963 = vmatprep.mubr.msk.bf16.mxu1 %vm740_vm2, %v3076_v34 }
  0xc9   :  { %2864 = vmatmul.mubr.msk.bf16.gmra.mxu0 %vm740_vm2, %v3077_v35  ;;  %2964 = vmatmul.mubr.msk.bf16.gmra.mxu1 %vm740_vm2, %v3078_v36 }
  0xca   :  { %2867 = vmatprep.mubr.msk.bf16.mxu0 %vm740_vm2, %v3079_v37  ;;  %2967 = vmatprep.mubr.msk.bf16.mxu1 %vm740_vm2, %v3080_v38 }
  0xd1   :  { %2868 = vmatmul.mubr.msk.bf16.gmra.mxu0 %vm740_vm2, %v3081_v39  ;;  %2968 = vmatmul.mubr.msk.bf16.gmra.mxu1 %vm740_vm2, %v3082_v40 }
  0xd2   :  { %2871 = vmatprep.mubr.msk.bf16.mxu0 %vm740_vm2, %v3083_v41 }
  0xd9   :  { %v3512_v43 = vpop.f32.mrf.mxu0  ;;  %2872 = vmatmul.mubr.msk.bf16.gmra.mxu0 %vm740_vm2, %v3084_v42  ;;  %v3515_v44 = vpop.f32.mrf.mxu1 }
  0xdb   :  { %v3517_v45 = vpop.f32.mrf.mxu0  ;;  %v3519_v46 = vpop.f32.mrf.mxu1 }
  0xdc   :  { %4067 = vst [vmem:[#allocation2_spill] sm:$0xff] %v3517_v45 }
  0xdd   :  { %v3521_v47 = vpop.f32.mrf.mxu0  ;;  %v3523_v48 = vpop.f32.mrf.mxu1 }
  0xdf   :  { %v3525_v49 = vpop.f32.mrf.mxu0  ;;  %v3527_v50 = vpop.f32.mrf.mxu1 }
  0xe0   :  { %4068 = vst [vmem:[#allocation3_spill] sm:$0xff] %v3525_v49 }
  0xe1   :  { %v3529_v51 = vpop.f32.mrf.mxu0  ;;  %v3531_v52 = vpop.f32.mrf.mxu1 }
  0xe3   :  { %v3533_v53 = vpop.f32.mrf.mxu0  ;;  %v3535_v54 = vpop.f32.mrf.mxu1 }
  0xe5   :  { %v3537_v55 = vpop.f32.mrf.mxu0  ;;  %v3539_v56 = vpop.f32.mrf.mxu1 }
  0xe7   :  { %v3541_v57 = vpop.f32.mrf.mxu0  ;;  %v3543_v58 = vpop.f32.mrf.mxu1 }
  0xe9   :  { %v3545_v59 = vpop.f32.mrf.mxu0  ;;  %v3547_v60 = vpop.f32.mrf.mxu1 }
  0xeb   :  { %v3549_v61 = vpop.f32.mrf.mxu0  ;;  %v3551_v62 = vpop.f32.mrf.mxu1 }
  0xed   :  { %v3553_v63 = vpop.f32.mrf.mxu0  ;;  %v3555_v0 = vpop.f32.mrf.mxu1 }
  0xef   :  { %v3557_v1 = vpop.f32.mrf.mxu0  ;;  %v3559_v2 = vpop.f32.mrf.mxu1 }
  0xf1   :  { %v3561_v3 = vpop.f32.mrf.mxu0  ;;  %v3563_v4 = vpop.f32.mrf.mxu1 }
  0xf3   :  { %v3565_v5 = vpop.f32.mrf.mxu0  ;;  %v3567_v6 = vpop.f32.mrf.mxu1 }
  0xf5   :  { %v3569_v7 = vpop.f32.mrf.mxu0  ;;  %v3571_v8 = vpop.f32.mrf.mxu1 }
  0xf7   :  { %v3573_v9 = vpop.f32.mrf.mxu0  ;;  %v3575_v10 = vpop.f32.mrf.mxu1 }
  0xf9   :  { %v3577_v11 = vpop.f32.mrf.mxu0  ;;  %v3579_v12 = vpop.f32.mrf.mxu1 }
  0xfb   :  { %v3581_v13 = vpop.f32.mrf.mxu0  ;;  %v3583_v14 = vpop.f32.mrf.mxu1 }
  0xfd   :  { %v3585_v15 = vpop.f32.mrf.mxu0  ;;  %v3587_v16 = vpop.f32.mrf.mxu1 }
  0xff   :  { %v3589_v17 = vpop.f32.mrf.mxu0  ;;  %v3591_v18 = vpop.f32.mrf.mxu1 }
 0x101   :  { %v3593_v19 = vpop.f32.mrf.mxu0  ;;  %v3595_v20 = vpop.f32.mrf.mxu1 }
 0x102   :  { %4069 = vst [vmem:[#allocation4_spill] sm:$0xff] %v3595_v20 }
 0x103   :  { %v3597_v21 = vpop.f32.mrf.mxu0  ;;  %v3599_v22 = vpop.f32.mrf.mxu1 }
 0x105   :  { %v3601_v23 = vpop.f32.mrf.mxu0  ;;  %v3603_v24 = vpop.f32.mrf.mxu1 }
 0x106   :  { %4070 = vst [vmem:[#allocation5_spill] sm:$0xff] %v3603_v24 }
 0x107   :  { %v3605_v25 = vpop.f32.mrf.mxu0  ;;  %v3607_v26 = vpop.f32.mrf.mxu1 }
 0x109   :  { %v3609_v27 = vpop.f32.mrf.mxu0  ;;  %v3611_v28 = vpop.f32.mrf.mxu1 }
 0x10a   :  { %4071 = vst [vmem:[#allocation6_spill] sm:$0xff] %v3609_v27  ;;  %4072 = vst [vmem:[#allocation7_spill] sm:$0xff] %v3611_v28 }
 0x10b   :  { %v3613_v29 = vpop.f32.mrf.mxu0  ;;  %v3615_v30 = vpop.f32.mrf.mxu1 }
 0x10c   :  { %4073 = vst [vmem:[#allocation8_spill] sm:$0xff] %v3613_v29  ;;  %4074 = vst [vmem:[#allocation9_spill] sm:$0xff] %v3615_v30 }
 0x10d   :  { %v3617_v31 = vpop.f32.mrf.mxu0  ;;  %v3619_v32 = vpop.f32.mrf.mxu1 }
 0x10e   :  { %4075 = vst [vmem:[#allocation10_spill] sm:$0xff] %v3617_v31  ;;  %4076 = vst [vmem:[#allocation11_spill] sm:$0xff] %v3619_v32 }
 0x10f   :  { %v3621_v33 = vpop.f32.mrf.mxu0  ;;  %v3623_v34 = vpop.f32.mrf.mxu1 }
 0x110   :  { %4077 = vst [vmem:[#allocation12_spill] sm:$0xff] %v3623_v34 }
 0x111   :  { %v3625_v35 = vpop.f32.mrf.mxu0  ;;  %v3627_v36 = vpop.f32.mrf.mxu1 }
 0x112   :  { %4078 = vst [vmem:[#allocation13_spill] sm:$0xff] %v3625_v35  ;;  %4079 = vst [vmem:[#allocation14_spill] sm:$0xff] %v3627_v36 }
 0x113   :  { %v3629_v37 = vpop.f32.mrf.mxu0  ;;  %v3631_v38 = vpop.f32.mrf.mxu1 }
 0x114   :  { %4080 = vst [vmem:[#allocation15_spill] sm:$0xff] %v3629_v37  ;;  %4081 = vst [vmem:[#allocation16_spill] sm:$0xff] %v3631_v38 }
 0x115   :  { %v3633_v39 = vpop.f32.mrf.mxu0  ;;  %v3635_v40 = vpop.f32.mrf.mxu1 }
 0x116   :  { %4082 = vst [vmem:[#allocation17_spill] sm:$0xff] %v3633_v39  ;;  %4083 = vst [vmem:[#allocation18_spill] sm:$0xff] %v3635_v40 }
 0x117   :  { %v3637_v41 = vpop.f32.mrf.mxu0  ;;  %v3639_v42 = vpop.f32.mrf.mxu1 }
 0x118   :  { %4084 = vst [vmem:[#allocation19_spill] sm:$0xff] %v3637_v41  ;;  %4085 = vst [vmem:[#allocation20_spill] sm:$0xff] %v3639_v42 }
 0x119   :  { %v3641_v49 = vpop.f32.mrf.mxu0  ;;  %v3643_v45 = vpop.f32.mrf.mxu1 }
 0x11a   :  { %4086 = vst [vmem:[#allocation21_spill] sm:$0xff] %v3641_v49  ;;  %4087 = vst [vmem:[#allocation22_spill] sm:$0xff] %v3643_v45 }
 0x11b   :  { %v3645_v28 = vpop.f32.mrf.mxu0  ;;  %v3647_v35 = vpop.f32.mrf.mxu1 }
 0x11c   :  { %4088 = vst [vmem:[#allocation23_spill] sm:$0xff] %v3645_v28  ;;  %4089 = vst [vmem:[#allocation24_spill] sm:$0xff] %v3647_v35 }
 0x11d   :  { %v3649_v36 = vpop.f32.mrf.mxu0  ;;  %v3651_v37 = vpop.f32.mrf.mxu1 }
 0x11e   :  { %4090 = vst [vmem:[#allocation25_spill] sm:$0xff] %v3649_v36  ;;  %4091 = vst [vmem:[#allocation26_spill] sm:$0xff] %v3651_v37 }
 0x11f   :  { %v3653_v38 = vpop.f32.mrf.mxu0  ;;  %v3655_v39 = vpop.f32.mrf.mxu1 }
 0x120   :  { %4092 = vst [vmem:[#allocation27_spill] sm:$0xff] %v3653_v38  ;;  %4093 = vst [vmem:[#allocation28_spill] sm:$0xff] %v3655_v39 }
 0x121   :  { %v3657_v40 = vpop.f32.mrf.mxu0  ;;  %v3659_v32 = vpop.f32.mrf.mxu1 }
 0x122   :  { %4094 = vst [vmem:[#allocation29_spill] sm:$0xff] %v3657_v40  ;;  %4095 = vst [vmem:[#allocation30_spill] sm:$0xff] %v3659_v32 }
 0x123   :  { %v3661_v42 = vpop.f32.mrf.mxu0  ;;  %v3663_v49 = vpop.f32.mrf.mxu1 }
 0x124   :  { %4096 = vst [vmem:[#allocation31_spill] sm:$0xff] %v3661_v42  ;;  %4097 = vst [vmem:[#allocation32_spill] sm:$0xff] %v3663_v49 }
 0x125   :  { %v3665_v45 = vpop.f32.mrf.mxu0  ;;  %v3667_v28 = vpop.f32.mrf.mxu1 }
 0x126   :  { %4098 = vst [vmem:[#allocation33_spill] sm:$0xff] %v3665_v45  ;;  %4099 = vst [vmem:[#allocation34_spill] sm:$0xff] %v3667_v28 }
 0x127   :  { %v3669_v35 = vpop.f32.mrf.mxu0  ;;  %v3671_v36 = vpop.f32.mrf.mxu1 }
 0x128   :  { %4100 = vst [vmem:[#allocation35_spill] sm:$0xff] %v3669_v35  ;;  %4101 = vst [vmem:[#allocation36_spill] sm:$0xff] %v3671_v36 }
 0x129   :  { %v3673_v37 = vpop.f32.mrf.mxu0  ;;  %v3675_v38 = vpop.f32.mrf.mxu1 }
 0x12a   :  { %4102 = vst [vmem:[#allocation37_spill] sm:$0xff] %v3673_v37  ;;  %4103 = vst [vmem:[#allocation38_spill] sm:$0xff] %v3675_v38 }
 0x12b   :  { %v3677_v39 = vpop.f32.mrf.mxu0  ;;  %v3679_v40 = vpop.f32.mrf.mxu1 }
 0x12c   :  { %4104 = vst [vmem:[#allocation39_spill] sm:$0xff] %v3677_v39  ;;  %4105 = vst [vmem:[#allocation40_spill] sm:$0xff] %v3679_v40 }
 0x12d   :  { %v3681_v32 = vpop.f32.mrf.mxu0  ;;  %v3683_v42 = vpop.f32.mrf.mxu1 }
 0x12e   :  { %4106 = vst [vmem:[#allocation41_spill] sm:$0xff] %v3681_v32  ;;  %4107 = vst [vmem:[#allocation42_spill] sm:$0xff] %v3683_v42 }
 0x12f   :  { %v3685_v49 = vpop.f32.mrf.mxu0  ;;  %v3687_v45 = vpop.f32.mrf.mxu1 }
 0x130   :  { %4108 = vst [vmem:[#allocation43_spill] sm:$0xff] %v3685_v49  ;;  %4109 = vst [vmem:[#allocation44_spill] sm:$0xff] %v3687_v45 }
 0x131   :  { %v3689_v28 = vpop.f32.mrf.mxu0  ;;  %v3691_v35 = vpop.f32.mrf.mxu1 }
 0x132   :  { %4110 = vst [vmem:[#allocation45_spill] sm:$0xff] %v3689_v28  ;;  %4111 = vst [vmem:[#allocation46_spill] sm:$0xff] %v3691_v35 }
 0x133   :  { %v3693_v36 = vpop.f32.mrf.mxu0  ;;  %v3695_v37 = vpop.f32.mrf.mxu1 }
 0x134   :  { %4112 = vst [vmem:[#allocation47_spill] sm:$0xff] %v3693_v36  ;;  %4113 = vst [vmem:[#allocation48_spill] sm:$0xff] %v3695_v37 }
 0x135   :  { %v3697_v38 = vpop.f32.mrf.mxu0  ;;  %v3699_v39 = vpop.f32.mrf.mxu1 }
 0x136   :  { %4114 = vst [vmem:[#allocation49_spill] sm:$0xff] %v3697_v38  ;;  %4115 = vst [vmem:[#allocation50_spill] sm:$0xff] %v3699_v39 }
 0x137   :  { %v3701_v40 = vpop.f32.mrf.mxu0  ;;  %v3703_v32 = vpop.f32.mrf.mxu1 }
 0x138   :  { %4116 = vst [vmem:[#allocation51_spill] sm:$0xff] %v3701_v40  ;;  %4117 = vst [vmem:[#allocation52_spill] sm:$0xff] %v3703_v32  ;;  %v3718_v32 = vld [vmem:[%s4065_s2] ss:$0 sm:$0xff] }
 0x139   :  { %v3705_v42 = vpop.f32.mrf.mxu0  ;;  %v2925_v49 = vpop.f32.mrf.mxu1 }
 0x13a   :  { %4118 = vst [vmem:[#allocation53_spill] sm:$0xff] %v3705_v42 }
 0x13b   :  { %v3707_v45 = vpop.f32.mrf.mxu0  ;;  %v3709_v28 = vpop.f32.mrf.mxu1 }
 0x13c   :  { %4119 = vst [vmem:[#allocation54_spill] sm:$0xff] %v3707_v45  ;;  %4120 = vst [vmem:[#allocation55_spill] sm:$0xff] %v3709_v28  ;;  %v1911_v45 = vmax.f32 %v3527_v50, %v2925_v49 }
 0x13d   :  { %v2826_v35 = vpop.f32.mrf.mxu0  ;;  %v2926_v31 = vpop.f32.mrf.mxu1 }
 0x13e   :  { %v1861_v38 = vmax.f32 %v3512_v43, %v2826_v35  ;;  %v1912_v24 = vmax.f32 %v3515_v44, %v2926_v31 }
 0x13f   :  { %v3711_v36 = vpop.f32.mrf.mxu0  ;;  %v1671_v37 = vpop.f32.mrf.mxu1 }
 0x140   :  { %4121 = vst [vmem:[#allocation56_spill] sm:$0xff] %v3711_v36  ;;  %v1910_v39 = vmax.f32 %v3519_v46, %v1671_v37 }
 0x141   :  { %v2829_v42 = vpop.f32.mrf.mxu0  ;;  %v2929_v40 = vpop.f32.mrf.mxu1 }
 0x142   :  { %v1959_v41 = vmax.f32 %v1861_v38, %v1910_v39  ;;  %v1864_v36 = vmax.f32 %v3541_v57, %v2829_v42 }
 0x143   :  { %v1284_v28 = vpop.f32.mrf.mxu0  ;;  %v1684_v34 = vpop.f32.mrf.mxu1 }
 0x144   :  { %v2015_v30 = vadd.f32 %v3718_v32, %v1959_v41  ;;  %v1862_v43 = vmax.f32 %v3521_v47, %v1284_v28  ;;  %v1913_v46 = vmax.f32 %v3523_v48, %v1684_v34 }
 0x145   :  { %v2830_v35 = vpop.f32.mrf.mxu0  ;;  %v2930_v37 = vpop.f32.mrf.mxu1 }
 0x146   :  { %v2064_v27 = vmax.f32 %v2015_v30, 0.0  ;;  %v1960_v29 = vmax.f32 %v1862_v43, %v1911_v45  ;;  %v1962_v20 = vmax.f32 %v1864_v36, %v1913_v46  ;;  %v1865_v47 = vmax.f32 %v3529_v51, %v2830_v35 }
 0x147   :  { %v1287_v38 = vpop.f32.mrf.mxu0  ;;  %v1687_v49 = vpop.f32.mrf.mxu1 }
 0x148   :  { %v2615_v50 = vpack.c.bf16 %v2064_v27, %v2064_v27  ;;  %v2016_v39 = vadd.f32 %v3718_v32, %v1960_v29  ;;  %v2018_v41 = vadd.f32 %v3718_v32, %v1962_v20  ;;  %v1863_v57 = vmax.f32 %v3533_v53, %v1287_v38 }
 0x149   :  { %v1914_v48 = vmax.f32 %v3535_v54, %v1687_v49  ;;  %v2833_v28 = vpop.f32.mrf.mxu0  ;;  %v2933_v30 = vpop.f32.mrf.mxu1  ;;  %v1915_v29 = vmax.f32 %v3543_v58, %v2929_v40 }
 0x14a   :  { %2311 = vst.msk [vmem:[%s4066_s3 + $0x8] sm:$0xf] %vm2308_vm3, %v2615_v50  ;;  %v2065_v44 = vmax.f32 %v2016_v39, 0.0  ;;  %v2067_v45 = vmax.f32 %v2018_v41, 0.0  ;;  %v1961_v27 = vmax.f32 %v1863_v57, %v1912_v24  ;;  %v1868_v43 = vmax.f32 %v3557_v1, %v2833_v28 }
 0x14b   :  { %v1963_v31 = vmax.f32 %v1865_v47, %v1914_v48  ;;  %v1300_v20 = vpop.f32.mrf.mxu0  ;;  %v1700_v34 = vpop.f32.mrf.mxu1  ;;  %v1916_v24 = vmax.f32 %v3531_v52, %v2930_v37 }
 0x14c   :  { %v2616_v53 = vpack.c.bf16 %v2065_v44, %v2065_v44  ;;  %v2618_v36 = vpack.c.bf16 %v2067_v45, %v2067_v45  ;;  %v2017_v51 = vadd.f32 %v3718_v32, %v1961_v27  ;;  %v1866_v54 = vmax.f32 %v3537_v55, %v1300_v20 }
 0x14d   :  { %v2019_v42 = vadd.f32 %v3718_v32, %v1963_v31  ;;  %v1917_v46 = vmax.f32 %v3539_v56, %v1700_v34  ;;  %v2834_v35 = vpop.f32.mrf.mxu0  ;;  %v2934_v38 = vpop.f32.mrf.mxu1 }
 0x14e   :  { %2312 = vst.msk [vmem:[%s4066_s3 + $0xc] sm:$0xf] %vm2308_vm3, %v2616_v53  ;;  %2314 = vst.msk [vmem:[%s4066_s3 + $0x14] sm:$0xf] %vm2308_vm3, %v2618_v36  ;;  %v2066_v58 = vmax.f32 %v2017_v51, 0.0  ;;  %v1964_v55 = vmax.f32 %v1866_v54, %v1915_v29  ;;  %v1869_v56 = vmax.f32 %v3545_v59, %v2834_v35 }
 0x14f   :  { %v2068_v40 = vmax.f32 %v2019_v42, 0.0  ;;  %v1966_v1 = vmax.f32 %v1868_v43, %v1917_v46  ;;  %v1303_v49 = vpop.f32.mrf.mxu0  ;;  %v1703_v50 = vpop.f32.mrf.mxu1 }
 0x150   :  { %v2617_v39 = vpack.c.bf16 %v2066_v58, %v2066_v58  ;;  %v2020_v41 = vadd.f32 %v3718_v32, %v1964_v55  ;;  %v1867_v57 = vmax.f32 %v3549_v61, %v1303_v49  ;;  %v1918_v47 = vmax.f32 %v3551_v62, %v1703_v50 }
 0x151   :  { %v2619_v48 = vpack.c.bf16 %v2068_v40, %v2068_v40  ;;  %v2022_v28 = vadd.f32 %v3718_v32, %v1966_v1  ;;  %v2837_v44 = vpop.f32.mrf.mxu0  ;;  %v2937_v45 = vpop.f32.mrf.mxu1  ;;  %v1919_v61 = vmax.f32 %v3559_v2, %v2933_v30 }
 0x152   :  { %2313 = vst.msk [vmem:[%s4066_s3 + $0x10] sm:$0xf] %vm2308_vm3, %v2617_v39  ;;  %v2069_v52 = vmax.f32 %v2020_v41, 0.0  ;;  %v1965_v59 = vmax.f32 %v1867_v57, %v1916_v24  ;;  %v1967_v37 = vmax.f32 %v1869_v56, %v1918_v47  ;;  %v1872_v51 = vmax.f32 %v3573_v9, %v2837_v44 }
 0x153   :  { %2315 = vst.msk [vmem:[%s4066_s3 + $0x18] sm:$0xf] %vm2308_vm3, %v2619_v48  ;;  %v2071_v62 = vmax.f32 %v2022_v28, 0.0  ;;  %v1316_v27 = vpop.f32.mrf.mxu0  ;;  %v1716_v29 = vpop.f32.mrf.mxu1 }
 0x154   :  { %v2620_v31 = vpack.c.bf16 %v2069_v52, %v2069_v52  ;;  %v2021_v20 = vadd.f32 %v3718_v32, %v1965_v59  ;;  %v2023_v34 = vadd.f32 %v3718_v32, %v1967_v37  ;;  %v1870_v53 = vmax.f32 %v3553_v63, %v1316_v27 }
 0x155   :  { %v2622_v36 = vpack.c.bf16 %v2071_v62, %v2071_v62  ;;  %v1921_v54 = vmax.f32 %v3555_v0, %v1716_v29  ;;  %v2838_v42 = vpop.f32.mrf.mxu0  ;;  %v2938_v43 = vpop.f32.mrf.mxu1  ;;  %v1920_v63 = vmax.f32 %v3547_v60, %v2934_v38  ;;  %v1923_v38 = vmax.f32 %v3575_v10, %v2937_v45 }
 0x156   :  { %2316 = vst.msk [vmem:[%s4066_s3 + $0x1c] sm:$0xf] %vm2308_vm3, %v2620_v31  ;;  %v2070_v2 = vmax.f32 %v2021_v20, 0.0  ;;  %v2072_v30 = vmax.f32 %v2023_v34, 0.0  ;;  %v1968_v46 = vmax.f32 %v1870_v53, %v1919_v61  ;;  %v1873_v56 = vmax.f32 %v3561_v3, %v2838_v42 }
 0x157   :  { %2318 = vst.msk [vmem:[%s4066_s3 + $0x24] sm:$0xf] %vm2308_vm3, %v2622_v36  ;;  %v1970_v9 = vmax.f32 %v1872_v51, %v1921_v54  ;;  %v1319_v35 = vpop.f32.mrf.mxu0  ;;  %v1719_v0 = vpop.f32.mrf.mxu1 }
 0x158   :  { %v2621_v58 = vpack.c.bf16 %v2070_v2, %v2070_v2  ;;  %v2623_v55 = vpack.c.bf16 %v2072_v30, %v2072_v30  ;;  %v2024_v24 = vadd.f32 %v3718_v32, %v1968_v46  ;;  %v1871_v40 = vmax.f32 %v3565_v5, %v1319_v35 }
 0x159   :  { %v2026_v1 = vadd.f32 %v3718_v32, %v1970_v9  ;;  %v1922_v49 = vmax.f32 %v3567_v6, %v1719_v0  ;;  %v2841_v50 = vpop.f32.mrf.mxu0  ;;  %v2941_v39 = vpop.f32.mrf.mxu1 }
 0x15a   :  { %2317 = vst.msk [vmem:[%s4066_s3 + $0x20] sm:$0xf] %vm2308_vm3, %v2621_v58  ;;  %2319 = vst.msk [vmem:[%s4066_s3 + $0x28] sm:$0xf] %vm2308_vm3, %v2623_v55  ;;  %v2073_v60 = vmax.f32 %v2024_v24, 0.0  ;;  %v1969_v5 = vmax.f32 %v1871_v40, %v1920_v63  ;;  %v1876_v6 = vmax.f32 %v3589_v17, %v2841_v50 }
 0x15b   :  { %v2075_v41 = vmax.f32 %v2026_v1, 0.0  ;;  %v1971_v3 = vmax.f32 %v1873_v56, %v1922_v49  ;;  %v1332_v57 = vpop.f32.mrf.mxu0  ;;  %v1732_v47 = vpop.f32.mrf.mxu1 }
 0x15c   :  { %v2624_v48 = vpack.c.bf16 %v2073_v60, %v2073_v60  ;;  %v2025_v28 = vadd.f32 %v3718_v32, %v1969_v5  ;;  %v1874_v44 = vmax.f32 %v3569_v7, %v1332_v57  ;;  %v1925_v52 = vmax.f32 %v3571_v8, %v1732_v47 }
 0x15d   :  { %v2626_v59 = vpack.c.bf16 %v2075_v41, %v2075_v41  ;;  %v2027_v37 = vadd.f32 %v3718_v32, %v1971_v3  ;;  %v2842_v61 = vpop.f32.mrf.mxu0  ;;  %v2942_v62 = vpop.f32.mrf.mxu1  ;;  %v1924_v7 = vmax.f32 %v3563_v4, %v2938_v43 }
 0x15e   :  { %2320 = vst.msk [vmem:[%s4066_s3 + $0x2c] sm:$0xf] %vm2308_vm3, %v2624_v48  ;;  %v2074_v10 = vmax.f32 %v2025_v28, 0.0  ;;  %v1972_v17 = vmax.f32 %v1874_v44, %v1923_v38  ;;  %v1974_v45 = vmax.f32 %v1876_v6, %v1925_v52  ;;  %v1877_v51 = vmax.f32 %v3577_v11, %v2842_v61 }
 0x15f   :  { %2322 = vst.msk [vmem:[%s4066_s3 + $0x34] sm:$0xf] %vm2308_vm3, %v2626_v59  ;;  %v2076_v8 = vmax.f32 %v2027_v37, 0.0  ;;  %v1335_v27 = vpop.f32.mrf.mxu0  ;;  %v1735_v29 = vpop.f32.mrf.mxu1  ;;  %v1928_v56 = vmax.f32 %v3579_v12, %v2942_v62 }
 0x160   :  { %v2625_v31 = vpack.c.bf16 %v2074_v10, %v2074_v10  ;;  %v2028_v20 = vadd.f32 %v3718_v32, %v1972_v17  ;;  %v2030_v34 = vadd.f32 %v3718_v32, %v1974_v45  ;;  %v1875_v53 = vmax.f32 %v3581_v13, %v1335_v27  ;;  %v4122_v17 = vld [vmem:[#allocation5_spill] sm:$0xff] }
 0x161   :  { %v2627_v36 = vpack.c.bf16 %v2076_v8, %v2076_v8  ;;  %v1926_v54 = vmax.f32 %v3583_v14, %v1735_v29  ;;  %v2845_v42 = vpop.f32.mrf.mxu0  ;;  %v2945_v2 = vpop.f32.mrf.mxu1  ;;  %v1927_v13 = vmax.f32 %v3591_v18, %v2941_v39 }
 0x162   :  { %2321 = vst.msk [vmem:[%s4066_s3 + $0x30] sm:$0xf] %vm2308_vm3, %v2625_v31  ;;  %v2077_v4 = vmax.f32 %v2028_v20, 0.0  ;;  %v2079_v43 = vmax.f32 %v2030_v34, 0.0  ;;  %v1973_v30 = vmax.f32 %v1875_v53, %v1924_v7  ;;  %v1880_v55 = vmax.f32 %v3605_v25, %v2845_v42 }
 0x163   :  { %2323 = vst.msk [vmem:[%s4066_s3 + $0x38] sm:$0xf] %vm2308_vm3, %v2627_v36  ;;  %v1975_v11 = vmax.f32 %v1877_v51, %v1926_v54  ;;  %v1348_v46 = vpop.f32.mrf.mxu0  ;;  %v1748_v14 = vpop.f32.mrf.mxu1  ;;  %v4124_v54 = vld [vmem:[#allocation8_spill] sm:$0xff] }
 0x164   :  { %v2628_v63 = vpack.c.bf16 %v2077_v4, %v2077_v4  ;;  %v2630_v9 = vpack.c.bf16 %v2079_v43, %v2079_v43  ;;  %v2029_v35 = vadd.f32 %v3718_v32, %v1973_v30  ;;  %v1878_v0 = vmax.f32 %v3585_v15, %v1348_v46  ;;  %v4125_v4 = vld [vmem:[#allocation6_spill] sm:$0xff]  ;;  %v4126_v30 = vld [vmem:[#allocation9_spill] sm:$0xff] }
 0x165   :  { %v2031_v58 = vadd.f32 %v3718_v32, %v1975_v11  ;;  %v1929_v24 = vmax.f32 %v3587_v16, %v1748_v14  ;;  %v2846_v40 = vpop.f32.mrf.mxu0  ;;  %v2946_v1 = vpop.f32.mrf.mxu1 }
 0x166   :  { %2324 = vst.msk [vmem:[%s4066_s3 + $0x3c] sm:$0xf] %vm2308_vm3, %v2628_v63  ;;  %2326 = vst.msk [vmem:[%s4066_s3 + $0x44] sm:$0xf] %vm2308_vm3, %v2630_v9  ;;  %v2078_v18 = vmax.f32 %v2029_v35, 0.0  ;;  %v1976_v15 = vmax.f32 %v1878_v0, %v1927_v13  ;;  %v1881_v16 = vmax.f32 %v3593_v19, %v2846_v40  ;;  %v4127_v9 = vld [vmem:[#allocation12_spill] sm:$0xff] }
 0x167   :  { %v2080_v49 = vmax.f32 %v2031_v58, 0.0  ;;  %v1978_v25 = vmax.f32 %v1880_v55, %v1929_v24  ;;  %v1351_v50 = vpop.f32.mrf.mxu0  ;;  %v1751_v39 = vpop.f32.mrf.mxu1  ;;  %v4128_v55 = vld [vmem:[#allocation19_spill] sm:$0xff] }
 0x168   :  { %v2629_v60 = vpack.c.bf16 %v2078_v18, %v2078_v18  ;;  %v2032_v5 = vadd.f32 %v3718_v32, %v1976_v15  ;;  %v1879_v38 = vmax.f32 %v3597_v21, %v1351_v50  ;;  %v1930_v41 = vmax.f32 %v3599_v22, %v1751_v39 }
 0x169   :  { %v2631_v3 = vpack.c.bf16 %v2080_v49, %v2080_v49  ;;  %v2034_v6 = vadd.f32 %v3718_v32, %v1978_v25  ;;  %v2849_v57 = vpop.f32.mrf.mxu0  ;;  %v2949_v47 = vpop.f32.mrf.mxu1  ;;  %v1931_v21 = vmax.f32 %v3607_v26, %v2945_v2  ;;  %v4130_v25 = vld [vmem:[#allocation11_spill] sm:$0xff] }
 0x16a   :  { %2325 = vst.msk [vmem:[%s4066_s3 + $0x40] sm:$0xf] %vm2308_vm3, %v2629_v60  ;;  %v2081_v12 = vmax.f32 %v2032_v5, 0.0  ;;  %v1977_v19 = vmax.f32 %v1879_v38, %v1928_v56  ;;  %v1979_v48 = vmax.f32 %v1881_v16, %v1930_v41  ;;  %v1884_v10 = vmax.f32 %v3621_v33, %v2849_v57  ;;  %v4129_v56 = vld [vmem:[#allocation10_spill] sm:$0xff] }
 0x16b   :  { %2327 = vst.msk [vmem:[%s4066_s3 + $0x48] sm:$0xf] %vm2308_vm3, %v2631_v3  ;;  %v2083_v22 = vmax.f32 %v2034_v6, 0.0  ;;  %v1364_v28 = vpop.f32.mrf.mxu0  ;;  %v1764_v44 = vpop.f32.mrf.mxu1  ;;  %v1935_v35 = vmax.f32 %v4127_v9, %v2949_v47  ;;  %v4131_v6 = vld [vmem:[#allocation7_spill] sm:$0xff] }
 0x16c   :  { %v2632_v52 = vpack.c.bf16 %v2081_v12, %v2081_v12  ;;  %v2033_v59 = vadd.f32 %v3718_v32, %v1977_v19  ;;  %v2035_v37 = vadd.f32 %v3718_v32, %v1979_v48  ;;  %v1882_v61 = vmax.f32 %v3601_v23, %v1364_v28  ;;  %v4123_v23 = vld [vmem:[#allocation4_spill] sm:$0xff]  ;;  %v4132_v28 = vld [vmem:[#allocation15_spill] sm:$0xff] }
 0x16d   :  { %v2634_v62 = vpack.c.bf16 %v2083_v22, %v2083_v22  ;;  %v1933_v45 = vmax.f32 %v4122_v17, %v1764_v44  ;;  %v2850_v7 = vpop.f32.mrf.mxu0  ;;  %v2950_v8 = vpop.f32.mrf.mxu1  ;;  %v1932_v31 = vmax.f32 %v4123_v23, %v2946_v1 }
 0x16e   :  { %2328 = vst.msk [vmem:[%s4066_s3 + $0x4c] sm:$0xf] %vm2308_vm3, %v2632_v52  ;;  %v2082_v26 = vmax.f32 %v2033_v59, 0.0  ;;  %v2084_v27 = vmax.f32 %v2035_v37, 0.0  ;;  %v1980_v29 = vmax.f32 %v1882_v61, %v1931_v21  ;;  %v1885_v43 = vmax.f32 %v4125_v4, %v2850_v7  ;;  %v4133_v59 = vld [vmem:[#allocation13_spill] sm:$0xff]  ;;  %v4134_v61 = vld [vmem:[#allocation16_spill] sm:$0xff] }
 0x16f   :  { %2330 = vst.msk [vmem:[%s4066_s3 + $0x54] sm:$0xf] %vm2308_vm3, %v2634_v62  ;;  %v1982_v33 = vmax.f32 %v1884_v10, %v1933_v45  ;;  %v1367_v20 = vpop.f32.mrf.mxu0  ;;  %v1767_v34 = vpop.f32.mrf.mxu1  ;;  %v1936_v57 = vmax.f32 %v4131_v6, %v2950_v8 }
 0x170   :  { %v2633_v53 = vpack.c.bf16 %v2082_v26, %v2082_v26  ;;  %v2635_v36 = vpack.c.bf16 %v2084_v27, %v2084_v27  ;;  %v2036_v51 = vadd.f32 %v3718_v32, %v1980_v29  ;;  %v1883_v42 = vmax.f32 %v4124_v54, %v1367_v20  ;;  %v4135_v26 = vld [vmem:[#allocation20_spill] sm:$0xff]  ;;  %v4137_v54 = vld [vmem:[#allocation27_spill] sm:$0xff] }
 0x171   :  { %v2038_v2 = vadd.f32 %v3718_v32, %v1982_v33  ;;  %v1934_v13 = vmax.f32 %v4126_v30, %v1767_v34  ;;  %v2853_v11 = vpop.f32.mrf.mxu0  ;;  %v2953_v46 = vpop.f32.mrf.mxu1 }
 0x172   :  { %2329 = vst.msk [vmem:[%s4066_s3 + $0x50] sm:$0xf] %vm2308_vm3, %v2633_v53  ;;  %2331 = vst.msk [vmem:[%s4066_s3 + $0x58] sm:$0xf] %vm2308_vm3, %v2635_v36  ;;  %v2085_v14 = vmax.f32 %v2036_v51, 0.0  ;;  %v1981_v63 = vmax.f32 %v1883_v42, %v1932_v31  ;;  %v1888_v24 = vmax.f32 %v4128_v55, %v2853_v11  ;;  %v1939_v27 = vmax.f32 %v4135_v26, %v2953_v46  ;;  %v4136_v53 = vld [vmem:[#allocation17_spill] sm:$0xff] }
 0x173   :  { %v2087_v0 = vmax.f32 %v2038_v2, 0.0  ;;  %v1983_v58 = vmax.f32 %v1885_v43, %v1934_v13  ;;  %v1380_v40 = vpop.f32.mrf.mxu0  ;;  %v1780_v1 = vpop.f32.mrf.mxu1  ;;  %v4138_v2 = vld [vmem:[#allocation18_spill] sm:$0xff] }
 0x174   :  { %v2636_v18 = vpack.c.bf16 %v2085_v14, %v2085_v14  ;;  %v2037_v15 = vadd.f32 %v3718_v32, %v1981_v63  ;;  %v1886_v49 = vmax.f32 %v4129_v56, %v1380_v40  ;;  %v1937_v16 = vmax.f32 %v4130_v25, %v1780_v1  ;;  %v4139_v46 = vld [vmem:[#allocation14_spill] sm:$0xff]  ;;  %v4141_v1 = vld [vmem:[#allocation23_spill] sm:$0xff] }
 0x175   :  { %v2638_v50 = vpack.c.bf16 %v2087_v0, %v2087_v0  ;;  %v2039_v39 = vadd.f32 %v3718_v32, %v1983_v58  ;;  %v2854_v60 = vpop.f32.mrf.mxu0  ;;  %v2954_v5 = vpop.f32.mrf.mxu1 }
 0x176   :  { %2332 = vst.msk [vmem:[%s4066_s3 + $0x5c] sm:$0xf] %vm2308_vm3, %v2636_v18  ;;  %v2086_v38 = vmax.f32 %v2037_v15, 0.0  ;;  %v1984_v41 = vmax.f32 %v1886_v49, %v1935_v35  ;;  %v1986_v3 = vmax.f32 %v1888_v24, %v1937_v16  ;;  %v1889_v37 = vmax.f32 %v4133_v59, %v2854_v60  ;;  %v4140_v35 = vld [vmem:[#allocation21_spill] sm:$0xff]  ;;  %v4142_v15 = vld [vmem:[#allocation24_spill] sm:$0xff] }
 0x177   :  { %2334 = vst.msk [vmem:[%s4066_s3 + $0x64] sm:$0xf] %vm2308_vm3, %v2638_v50  ;;  %v2088_v47 = vmax.f32 %v2039_v39, 0.0  ;;  %v1383_v12 = vpop.f32.mrf.mxu0  ;;  %v1783_v19 = vpop.f32.mrf.mxu1  ;;  %v1940_v14 = vmax.f32 %v4139_v46, %v2954_v5 }
 0x178   :  { %v2637_v48 = vpack.c.bf16 %v2086_v38, %v2086_v38  ;;  %v2040_v21 = vadd.f32 %v3718_v32, %v1984_v41  ;;  %v2042_v22 = vadd.f32 %v3718_v32, %v1986_v3  ;;  %v1887_v44 = vmax.f32 %v4132_v28, %v1383_v12  ;;  %v4143_v38 = vld [vmem:[#allocation28_spill] sm:$0xff]  ;;  %v4145_v28 = vld [vmem:[#allocation35_spill] sm:$0xff] }
 0x179   :  { %v2639_v52 = vpack.c.bf16 %v2088_v47, %v2088_v47  ;;  %v1938_v62 = vmax.f32 %v4134_v61, %v1783_v19  ;;  %v2857_v10 = vpop.f32.mrf.mxu0  ;;  %v2957_v17 = vpop.f32.mrf.mxu1 }
 0x17a   :  { %2333 = vst.msk [vmem:[%s4066_s3 + $0x60] sm:$0xf] %vm2308_vm3, %v2637_v48  ;;  %v2089_v45 = vmax.f32 %v2040_v21, 0.0  ;;  %v2091_v7 = vmax.f32 %v2042_v22, 0.0  ;;  %v1985_v8 = vmax.f32 %v1887_v44, %v1936_v57  ;;  %v1892_v42 = vmax.f32 %v4137_v54, %v2857_v10  ;;  %v4144_v48 = vld [vmem:[#allocation25_spill] sm:$0xff] }
 0x17b   :  { %2335 = vst.msk [vmem:[%s4066_s3 + $0x68] sm:$0xf] %vm2308_vm3, %v2639_v52  ;;  %v1987_v29 = vmax.f32 %v1889_v37, %v1938_v62  ;;  %v1396_v23 = vpop.f32.mrf.mxu0  ;;  %v1796_v31 = vpop.f32.mrf.mxu1  ;;  %v1943_v41 = vmax.f32 %v4143_v38, %v2957_v17  ;;  %v4146_v52 = vld [vmem:[#allocation26_spill] sm:$0xff] }
 0x17c   :  { %v2640_v33 = vpack.c.bf16 %v2089_v45, %v2089_v45  ;;  %v2642_v20 = vpack.c.bf16 %v2091_v7, %v2091_v7  ;;  %v2041_v34 = vadd.f32 %v3718_v32, %v1985_v8  ;;  %v1890_v36 = vmax.f32 %v4136_v53, %v1396_v23  ;;  %v4147_v45 = vld [vmem:[#allocation22_spill] sm:$0xff]  ;;  %v4149_v53 = vld [vmem:[#allocation29_spill] sm:$0xff] }
 0x17d   :  { %v2043_v51 = vadd.f32 %v3718_v32, %v1987_v29  ;;  %v1941_v4 = vmax.f32 %v4138_v2, %v1796_v31  ;;  %v2858_v43 = vpop.f32.mrf.mxu0  ;;  %v2958_v30 = vpop.f32.mrf.mxu1 }
 0x17e   :  { %2336 = vst.msk [vmem:[%s4066_s3 + $0x6c] sm:$0xf] %vm2308_vm3, %v2640_v33  ;;  %2338 = vst.msk [vmem:[%s4066_s3 + $0x74] sm:$0xf] %vm2308_vm3, %v2642_v20  ;;  %v2090_v13 = vmax.f32 %v2041_v34, 0.0  ;;  %v1988_v11 = vmax.f32 %v1890_v36, %v1939_v27  ;;  %v1893_v0 = vmax.f32 %v4140_v35, %v2858_v43  ;;  %v1944_v7 = vmax.f32 %v4147_v45, %v2958_v30  ;;  %v4148_v33 = vld [vmem:[#allocation31_spill] sm:$0xff] }
 0x17f   :  { %v2092_v63 = vmax.f32 %v2043_v51, 0.0  ;;  %v1990_v9 = vmax.f32 %v1892_v42, %v1941_v4  ;;  %v1399_v58 = vpop.f32.mrf.mxu0  ;;  %v1799_v55 = vpop.f32.mrf.mxu1  ;;  %v4150_v51 = vld [vmem:[#allocation32_spill] sm:$0xff] }
 0x180   :  { %v2641_v24 = vpack.c.bf16 %v2090_v13, %v2090_v13  ;;  %v2044_v40 = vadd.f32 %v3718_v32, %v1988_v11  ;;  %v1891_v18 = vmax.f32 %v4141_v1, %v1399_v58  ;;  %v1942_v56 = vmax.f32 %v4142_v15, %v1799_v55  ;;  %v4151_v30 = vld [vmem:[#allocation36_spill] sm:$0xff]  ;;  %v4153_v55 = vld [vmem:[#allocation33_spill] sm:$0xff] }
 0x181   :  { %v2643_v49 = vpack.c.bf16 %v2092_v63, %v2092_v63  ;;  %v2046_v25 = vadd.f32 %v3718_v32, %v1990_v9  ;;  %v2861_v16 = vpop.f32.mrf.mxu0  ;;  %v2961_v50 = vpop.f32.mrf.mxu1 }
 0x182   :  { %2337 = vst.msk [vmem:[%s4066_s3 + $0x70] sm:$0xf] %vm2308_vm3, %v2641_v24  ;;  %v2093_v39 = vmax.f32 %v2044_v40, 0.0  ;;  %v1989_v60 = vmax.f32 %v1891_v18, %v1940_v14  ;;  %v1991_v5 = vmax.f32 %v1893_v0, %v1942_v56  ;;  %v1896_v44 = vmax.f32 %v4145_v28, %v2861_v16  ;;  %v4152_v14 = vld [vmem:[#allocation43_spill] sm:$0xff]  ;;  %v4154_v40 = vld [vmem:[#allocation34_spill] sm:$0xff] }
 0x183   :  { %2339 = vst.msk [vmem:[%s4066_s3 + $0x78] sm:$0xf] %vm2308_vm3, %v2643_v49  ;;  %v2095_v3 = vmax.f32 %v2046_v25, 0.0  ;;  %v1412_v6 = vpop.f32.mrf.mxu0  ;;  %v1812_v57 = vpop.f32.mrf.mxu1  ;;  %v1947_v13 = vmax.f32 %v4151_v30, %v2961_v50 }
 0x184   :  { %v2644_v47 = vpack.c.bf16 %v2093_v39, %v2093_v39  ;;  %v2045_v12 = vadd.f32 %v3718_v32, %v1989_v60  ;;  %v2047_v19 = vadd.f32 %v3718_v32, %v1991_v5  ;;  %v1894_v21 = vmax.f32 %v4144_v48, %v1412_v6  ;;  %v4155_v39 = vld [vmem:[#allocation30_spill] sm:$0xff]  ;;  %v4157_v48 = vld [vmem:[#allocation37_spill] sm:$0xff] }
 0x185   :  { %v2646_v22 = vpack.c.bf16 %v2095_v3, %v2095_v3  ;;  %v1945_v59 = vmax.f32 %v4146_v52, %v1812_v57  ;;  %v2862_v37 = vpop.f32.mrf.mxu0  ;;  %v2962_v61 = vpop.f32.mrf.mxu1 }
 0x186   :  { %2340 = vst.msk [vmem:[%s4066_s3 + $0x7c] sm:$0xf] %vm2308_vm3, %v2644_v47  ;;  %v2094_v62 = vmax.f32 %v2045_v12, 0.0  ;;  %v2096_v10 = vmax.f32 %v2047_v19, 0.0  ;;  %v1992_v17 = vmax.f32 %v1894_v21, %v1943_v41  ;;  %v1897_v36 = vmax.f32 %v4149_v53, %v2862_v37  ;;  %v4156_v47 = vld [vmem:[#allocation39_spill] sm:$0xff] }
 0x187   :  { %2342 = vst.msk [vmem:[%s4066_s3 + $0x84] sm:$0xf] %vm2308_vm3, %v2646_v22  ;;  %v1994_v8 = vmax.f32 %v1896_v44, %v1945_v59  ;;  %v1415_v26 = vpop.f32.mrf.mxu0  ;;  %v1815_v27 = vpop.f32.mrf.mxu1  ;;  %v1948_v60 = vmax.f32 %v4155_v39, %v2962_v61  ;;  %v4158_v22 = vld [vmem:[#allocation40_spill] sm:$0xff] }
 0x188   :  { %v2645_v29 = vpack.c.bf16 %v2094_v62, %v2094_v62  ;;  %v2647_v23 = vpack.c.bf16 %v2096_v10, %v2096_v10  ;;  %v2048_v31 = vadd.f32 %v3718_v32, %v1992_v17  ;;  %v1895_v20 = vmax.f32 %v4148_v33, %v1415_v26  ;;  %v4159_v62 = vld [vmem:[#allocation44_spill] sm:$0xff]  ;;  %v4161_v33 = vld [vmem:[#allocation51_spill] sm:$0xff] }
 0x189   :  { %v2050_v34 = vadd.f32 %v3718_v32, %v1994_v8  ;;  %v1946_v54 = vmax.f32 %v4150_v51, %v1815_v27  ;;  %v2865_v42 = vpop.f32.mrf.mxu0  ;;  %v2965_v2 = vpop.f32.mrf.mxu1 }
 0x18a   :  { %2341 = vst.msk [vmem:[%s4066_s3 + $0x80] sm:$0xf] %vm2308_vm3, %v2645_v29  ;;  %2343 = vst.msk [vmem:[%s4066_s3 + $0x88] sm:$0xf] %vm2308_vm3, %v2647_v23  ;;  %v2097_v4 = vmax.f32 %v2048_v31, 0.0  ;;  %v1993_v43 = vmax.f32 %v1895_v20, %v1944_v7  ;;  %v1900_v63 = vmax.f32 %v4152_v14, %v2865_v42  ;;  %v1951_v10 = vmax.f32 %v4159_v62, %v2965_v2  ;;  %v4160_v29 = vld [vmem:[#allocation41_spill] sm:$0xff] }
 0x18b   :  { %v2099_v11 = vmax.f32 %v2050_v34, 0.0  ;;  %v1995_v46 = vmax.f32 %v1897_v36, %v1946_v54  ;;  %v1428_v9 = vpop.f32.mrf.mxu0  ;;  %v1828_v35 = vpop.f32.mrf.mxu1  ;;  %v4162_v34 = vld [vmem:[#allocation42_spill] sm:$0xff]  ;;  %v4174_v62 = vld [vmem:[#allocation55_spill] sm:$0xff] }
 0x18c   :  { %v2648_v0 = vpack.c.bf16 %v2097_v4, %v2097_v4  ;;  %v2049_v58 = vadd.f32 %v3718_v32, %v1993_v43  ;;  %v1898_v24 = vmax.f32 %v4153_v55, %v1428_v9  ;;  %v1949_v1 = vmax.f32 %v4154_v40, %v1828_v35  ;;  %v4163_v2 = vld [vmem:[#allocation38_spill] sm:$0xff]  ;;  %v4165_v35 = vld [vmem:[#allocation47_spill] sm:$0xff] }
 0x18d   :  { %v2650_v18 = vpack.c.bf16 %v2099_v11, %v2099_v11  ;;  %v2051_v15 = vadd.f32 %v3718_v32, %v1995_v46  ;;  %v2866_v56 = vpop.f32.mrf.mxu0  ;;  %v2966_v49 = vpop.f32.mrf.mxu1  ;;  %v4168_v40 = vld [vmem:[#allocation2_spill] sm:$0xff] }
 0x18e   :  { %2344 = vst.msk [vmem:[%s4066_s3 + $0x8c] sm:$0xf] %vm2308_vm3, %v2648_v0  ;;  %v2098_v25 = vmax.f32 %v2049_v58, 0.0  ;;  %v1996_v16 = vmax.f32 %v1898_v24, %v1947_v13  ;;  %v1998_v50 = vmax.f32 %v1900_v63, %v1949_v1  ;;  %v1901_v21 = vmax.f32 %v4157_v48, %v2866_v56  ;;  %v4164_v13 = vld [vmem:[#allocation45_spill] sm:$0xff]  ;;  %v4166_v58 = vld [vmem:[#allocation48_spill] sm:$0xff] }
 0x18f   :  { %2346 = vst.msk [vmem:[%s4066_s3 + $0x94] sm:$0xf] %vm2308_vm3, %v2650_v18  ;;  %v2100_v5 = vmax.f32 %v2051_v15, 0.0  ;;  %v1431_v38 = vpop.f32.mrf.mxu0  ;;  %v1831_v41 = vpop.f32.mrf.mxu1  ;;  %v1952_v4 = vmax.f32 %v4163_v2, %v2966_v49  ;;  %v4167_v24 = vld [vmem:[#allocation56_spill] sm:$0xff] }
 0x190   :  { %v2649_v3 = vpack.c.bf16 %v2098_v25, %v2098_v25  ;;  %v2052_v6 = vadd.f32 %v3718_v32, %v1996_v16  ;;  %v2054_v57 = vadd.f32 %v3718_v32, %v1998_v50  ;;  %v1899_v12 = vmax.f32 %v4156_v47, %v1431_v38  ;;  %v4169_v50 = vld [vmem:[#allocation50_spill] sm:$0xff]  ;;  %v4171_v47 = vld [vmem:[#allocation3_spill] sm:$0xff] }
 0x191   :  { %v2651_v19 = vpack.c.bf16 %v2100_v5, %v2100_v5  ;;  %v1950_v28 = vmax.f32 %v4158_v22, %v1831_v41  ;;  %v2869_v44 = vpop.f32.mrf.mxu0  ;;  %v2969_v52 = vpop.f32.mrf.mxu1  ;;  %v1859_v1 = vmax.f32 %v4168_v40, %v4167_v24  ;;  %v4173_v22 = vld [vmem:[#allocation49_spill] sm:$0xff] }
 0x192   :  { %2345 = vst.msk [vmem:[%s4066_s3 + $0x90] sm:$0xf] %vm2308_vm3, %v2649_v3  ;;  %v2101_v59 = vmax.f32 %v2052_v6, 0.0  ;;  %v2103_v37 = vmax.f32 %v2054_v57, 0.0  ;;  %v1997_v61 = vmax.f32 %v1899_v12, %v1948_v60  ;;  %v1904_v20 = vmax.f32 %v4161_v33, %v2869_v44  ;;  %v4170_v57 = vld [vmem:[#allocation53_spill] sm:$0xff] }
 0x193   :  { %2347 = vst.msk [vmem:[%s4066_s3 + $0x98] sm:$0xf] %vm2308_vm3, %v2651_v19  ;;  %v1999_v17 = vmax.f32 %v1901_v21, %v1950_v28  ;;  %v1444_v45 = vpop.f32.mrf.mxu0  ;;  %v1844_v7 = vpop.f32.mrf.mxu1  ;;  %v1860_v12 = vmax.f32 %v4171_v47, %v4170_v57  ;;  %v4172_v19 = vld [vmem:[#allocation52_spill] sm:$0xff] }
 0x194   :  { %v2652_v8 = vpack.c.bf16 %v2101_v59, %v2101_v59  ;;  %v2654_v26 = vpack.c.bf16 %v2103_v37, %v2103_v37  ;;  %v2053_v27 = vadd.f32 %v3718_v32, %v1997_v61  ;;  %v1902_v23 = vmax.f32 %v4160_v29, %v1444_v45 }
 0x195   :  { %v2055_v31 = vadd.f32 %v3718_v32, %v1999_v17  ;;  %v1953_v53 = vmax.f32 %v4162_v34, %v1844_v7  ;;  %v2870_v36 = vpop.f32.mrf.mxu0  ;;  %v2970_v51 = vpop.f32.mrf.mxu1  ;;  %v1955_v48 = vmax.f32 %v4172_v19, %v2969_v52 }
 0x196   :  { %2348 = vst.msk [vmem:[%s4066_s3 + $0x9c] sm:$0xf] %vm2308_vm3, %v2652_v8  ;;  %2350 = vst.msk [vmem:[%s4066_s3 + $0xa4] sm:$0xf] %vm2308_vm3, %v2654_v26  ;;  %v2102_v54 = vmax.f32 %v2053_v27, 0.0  ;;  %v2000_v42 = vmax.f32 %v1902_v23, %v1951_v10  ;;  %v1905_v11 = vmax.f32 %v4164_v13, %v2870_v36  ;;  %v4175_v27 = vld [vmem:[#allocation46_spill] sm:$0xff] }
 0x197   :  { %v2104_v43 = vmax.f32 %v2055_v31, 0.0  ;;  %v2002_v30 = vmax.f32 %v1904_v20, %v1953_v53  ;;  %v1447_v46 = vpop.f32.mrf.mxu0  ;;  %v1847_v14 = vpop.f32.mrf.mxu1  ;;  %v1956_v29 = vmax.f32 %v4175_v27, %v2970_v51  ;;  %v4176_v31 = vld [vmem:[#allocation54_spill] sm:$0xff] }
 0x198   :  { %v2653_v63 = vpack.c.bf16 %v2102_v54, %v2102_v54  ;;  %v2056_v9 = vadd.f32 %v3718_v32, %v2000_v42  ;;  %v1903_v0 = vmax.f32 %v4165_v35, %v1447_v46  ;;  %v1954_v55 = vmax.f32 %v4166_v58, %v1847_v14 }
 0x199   :  { %v2655_v18 = vpack.c.bf16 %v2104_v43, %v2104_v43  ;;  %v2058_v15 = vadd.f32 %v3718_v32, %v2002_v30  ;;  %v2873_v56 = vpop.f32.mrf.mxu0 }
 0x19a   :  { %2349 = vst.msk [vmem:[%s4066_s3 + $0xa0] sm:$0xf] %vm2308_vm3, %v2653_v63  ;;  %v2105_v49 = vmax.f32 %v2056_v9, 0.0  ;;  %v2001_v25 = vmax.f32 %v1903_v0, %v1952_v4  ;;  %v2003_v16 = vmax.f32 %v1905_v11, %v1954_v55  ;;  %v1908_v39 = vmax.f32 %v2873_v56, %v4169_v50 }
 0x19b   :  { %2351 = vst.msk [vmem:[%s4066_s3 + $0xa8] sm:$0xf] %vm2308_vm3, %v2655_v18  ;;  %v2107_v60 = vmax.f32 %v2058_v15, 0.0  ;;  %v1460_v5 = vpop.f32.mrf.mxu0 }
 0x19c   :  { %v2656_v38 = vpack.c.bf16 %v2105_v49, %v2105_v49  ;;  %v2057_v41 = vadd.f32 %v3718_v32, %v2001_v25  ;;  %v2059_v3 = vadd.f32 %v3718_v32, %v2003_v16  ;;  %v1957_v6 = vmax.f32 %v1859_v1, %v1908_v39 }
 0x19d   :  { %v2658_v21 = vpack.c.bf16 %v2107_v60, %v2107_v60  ;;  %v1906_v28 = vmax.f32 %v4173_v22, %v1460_v5  ;;  %v2874_v44 = vpop.f32.mrf.mxu0 }
 0x19e   :  { %2352 = vst.msk [vmem:[%s4066_s3 + $0xac] sm:$0xf] %vm2308_vm3, %v2656_v38  ;;  %v2106_v59 = vmax.f32 %v2057_v41, 0.0  ;;  %v2108_v37 = vmax.f32 %v2059_v3, 0.0  ;;  %v2013_v61 = vadd.f32 %v3718_v32, %v1957_v6  ;;  %v1909_v10 = vmax.f32 %v2874_v44, %v4174_v62 }
 0x19f   :  { %2354 = vst.msk [vmem:[%s4066_s3 + $0xb4] sm:$0xf] %vm2308_vm3, %v2658_v21  ;;  %v2004_v52 = vmax.f32 %v1906_v28, %v1955_v48  ;;  %v1463_v17 = vpop.f32.mrf.mxu0 }
 0x1a0   :  { %v2657_v45 = vpack.c.bf16 %v2106_v59, %v2106_v59  ;;  %v2659_v7 = vpack.c.bf16 %v2108_v37, %v2108_v37  ;;  %v2062_v8 = vmax.f32 %v2013_v61, 0.0  ;;  %v1958_v26 = vmax.f32 %v1860_v12, %v1909_v10 }
 0x1a1   :  { %v2060_v23 = vadd.f32 %v3718_v32, %v2004_v52  ;;  %v1907_v33 = vmax.f32 %v4176_v31, %v1463_v17 }
 0x1a2   :  { %2353 = vst.msk [vmem:[%s4066_s3 + $0xb0] sm:$0xf] %vm2308_vm3, %v2657_v45  ;;  %2355 = vst.msk [vmem:[%s4066_s3 + $0xb8] sm:$0xf] %vm2308_vm3, %v2659_v7  ;;  %v2613_v20 = vpack.c.bf16 %v2062_v8, %v2062_v8  ;;  %v2014_v34 = vadd.f32 %v3718_v32, %v1958_v26 }
 0x1a3   :  { %v2109_v53 = vmax.f32 %v2060_v23, 0.0  ;;  %v2005_v36 = vmax.f32 %v1907_v33, %v1956_v29 }
 0x1a4   :  { %2309 = vst.msk [vmem:[%s4066_s3] sm:$0xf] %vm2308_vm3, %v2613_v20  ;;  %v2063_v51 = vmax.f32 %v2014_v34, 0.0 }
 0x1a5   :  { %v2660_v54 = vpack.c.bf16 %v2109_v53, %v2109_v53  ;;  %v2061_v42 = vadd.f32 %v3718_v32, %v2005_v36 }
 0x1a6   :  { %v2614_v2 = vpack.c.bf16 %v2063_v51, %v2063_v51 }
 0x1a7   :  { %2356 = vst.msk [vmem:[%s4066_s3 + $0xbc] sm:$0xf] %vm2308_vm3, %v2660_v54  ;;  %v2110_v4 = vmax.f32 %v2061_v42, 0.0 }
 0x1a8   :  { %2310 = vst.msk [vmem:[%s4066_s3 + $0x4] sm:$0xf] %vm2308_vm3, %v2614_v2 }
 0x1a9   :  { %v2661_v43 = vpack.c.bf16 %v2110_v4, %v2110_v4 }
 0x1ab   :  { %2357 = vst.msk [vmem:[%s4066_s3 + $0xc0] sm:$0xf] %vm2308_vm3, %v2661_v43 }

// kernel: net_forward.3
= control target key start
LH: loop header
LB: loop body
LE: loop exit
PB: predicated region body
PF: predicated region fallthrough
CT: control target
= control target key end

     0   :  { %v3673_v1 = vmov 0   ;;  %vm660_vm0 = vcmask 179200   ;;  %vm811_vm1 = vcmask 1042432   ;;  %s4711_s0 = inlined_call_operand.vmem [shape: bf16[800,150], index: 0, kind: input, shape index: {}]   ;;  %s4712_s1 = inlined_call_operand.vmem [shape: bf16[150,16], index: 1, kind: input, shape index: {}]   ;;  %s4713_s2 = inlined_call_operand.vmem [shape: f32[1,16], index: 2, kind: input, shape index: {}]   ;;  %s4714_s3 = inlined_call_operand.vmem [shape: bf16[400,120], index: 3, kind: input, shape index: {}]   ;;  %s4715_s4 = inlined_call_operand.vmem [shape: f32[1,120], index: 4, kind: input, shape index: {}]   ;;  %s4716_s5 = inlined_call_operand.vmem [shape: bf16[120,84], index: 5, kind: input, shape index: {}]   ;;  %s4717_s6 = inlined_call_operand.vmem [shape: f32[1,84], index: 6, kind: input, shape index: {}]   ;;  %s4718_s7 = inlined_call_operand.vmem [shape: bf16[84,10], index: 7, kind: input, shape index: {}]   ;;  %s4719_s8 = inlined_call_operand.vmem [shape: f32[1,10], index: 8, kind: input, shape index: {}]   ;;  %s4720_s9 = inlined_call_operand.hbm [shape: f32[2,10], index: 9, kind: output, shape index: {}]  }
   0x1   :  { %v3452_v0 = vld [vmem:[%s4712_s1 + $0x38] sm:$0xff]   ;;  %815 = vmatprep.subr.bf16.mxu0 %v3673_v1  ;;  %3428 = vmatprep.subr.bf16.mxu1 %v3673_v1  ;;  %v3453_v2 = vld [vmem:[%s4712_s1 + $0x30] sm:$0xff]   ;;  %v3454_v3 = vld [vmem:[%s4712_s1 + $0x28] sm:$0xff]  }
   0x2   :  { %816 = vmatpush1.bf16.msra.mxu0 %v3452_v0  ;;  %3438 = vmatpush1.bf16.msra.mxu1 %v3452_v0  ;;  %v3455_v4 = vld [vmem:[%s4712_s1 + $0x20] sm:$0xff]   ;;  %v3456_v6 = vld [vmem:[%s4712_s1 + $0x18] sm:$0xff]   ;;  %v3457_v7 = vld [vmem:[%s4712_s1 + $0x10] sm:$0xff]  }
   0x3   :  { %817 = vmatprep.subr.bf16.mxu0 %v3673_v1  ;;  %3429 = vmatprep.subr.bf16.mxu1 %v3673_v1  ;;  %v3464_v5 = vld [vmem:[%s4711_s0 + $0x4] ss:$8 sps:$4 sm:$0xff]   ;;  %v3460_v10 = vld [vmem:[%s4712_s1 + $0x48] ss:$0 sps:$4 sm:$0x77]  }
   0x4   :  { %3056 = vmatprep.mubr.msk.bf16.mxu0 %vm660_vm0, %v3464_v5  ;;  %v3458_v8 = vld [vmem:[%s4712_s1 + $0x8] sm:$0xff]   ;;  %v3459_v9 = vld [vmem:[%s4712_s1] sm:$0xff]   ;;  %v813_v11 = vsel %vm811_vm1, %v3460_v10, 0  ;;  %v3465_v14 = vld [vmem:[%s4711_s0 + $0x14] ss:$8 sps:$4 sm:$0xff]  }
   0x5   :  { %v3461_v12 = vld [vmem:[%s4712_s1 + $0x40] sm:$0xff]   ;;  %v3467_v15 = vld [vmem:[%s4711_s0 + $0x10] ss:$8 sps:$4 sm:$0xff]   ;;  %v3471_v18 = vld [vmem:[%s4711_s0 + $0x34] ss:$8 sps:$4 sm:$0xff]  }
   0x6   :  { %818 = vmatpush1.bf16.msra.mxu0 %v3453_v2  ;;  %3439 = vmatpush1.bf16.msra.mxu1 %v3453_v2  ;;  %v3462_v13 = vld [vmem:[%s4711_s0] ss:$8 sps:$4 sm:$0xff]   ;;  %v3468_v16 = vld [vmem:[%s4711_s0 + $0x24] ss:$8 sps:$4 sm:$0xff]   ;;  %v3473_v19 = vld [vmem:[%s4711_s0 + $0x30] ss:$8 sps:$4 sm:$0xff]  }
   0x7   :  { %819 = vmatprep.subr.bf16.mxu0 %v3673_v1  ;;  %3430 = vmatprep.subr.bf16.mxu1 %v3673_v1  ;;  %v3470_v17 = vld [vmem:[%s4711_s0 + $0x20] ss:$8 sps:$4 sm:$0xff]   ;;  %v3474_v20 = vld [vmem:[%s4711_s0 + $0x44] ss:$8 sps:$4 sm:$0xff]   ;;  %v3477_v22 = vld [vmem:[%s4711_s0 + $0x54] ss:$8 sps:$4 sm:$0xff]  }
   0x8   :  { %v3476_v21 = vld [vmem:[%s4711_s0 + $0x40] ss:$8 sps:$4 sm:$0xff]   ;;  %v3479_v23 = vld [vmem:[%s4711_s0 + $0x50] ss:$8 sps:$4 sm:$0xff]   ;;  %v3480_v24 = vld [vmem:[%s4711_s0 + $0x64] ss:$8 sps:$4 sm:$0xff]  }
   0xa   :  { %820 = vmatpush1.bf16.msra.mxu0 %v3454_v3  ;;  %3440 = vmatpush1.bf16.msra.mxu1 %v3454_v3 }
   0xb   :  { %821 = vmatprep.subr.bf16.mxu0 %v3673_v1  ;;  %3431 = vmatprep.subr.bf16.mxu1 %v3673_v1 }
   0xe   :  { %822 = vmatpush1.bf16.msra.mxu0 %v3455_v4  ;;  %3441 = vmatpush1.bf16.msra.mxu1 %v3455_v4 }
   0xf   :  { %823 = vmatprep.subr.bf16.mxu0 %v3673_v1  ;;  %3432 = vmatprep.subr.bf16.mxu1 %v3673_v1 }
  0x12   :  { %824 = vmatpush1.bf16.msra.mxu0 %v3456_v6  ;;  %3442 = vmatpush1.bf16.msra.mxu1 %v3456_v6 }
  0x13   :  { %825 = vmatprep.subr.bf16.mxu0 %v3673_v1  ;;  %3433 = vmatprep.subr.bf16.mxu1 %v3673_v1 }
  0x16   :  { %826 = vmatpush1.bf16.msra.mxu0 %v3457_v7  ;;  %3443 = vmatpush1.bf16.msra.mxu1 %v3457_v7 }
  0x17   :  { %827 = vmatprep.subr.bf16.mxu0 %v3673_v1  ;;  %3434 = vmatprep.subr.bf16.mxu1 %v3673_v1 }
  0x1a   :  { %828 = vmatpush1.bf16.msra.mxu0 %v3458_v8  ;;  %3444 = vmatpush1.bf16.msra.mxu1 %v3458_v8 }
  0x1b   :  { %829 = vmatprep.subr.bf16.mxu0 %v3673_v1  ;;  %3435 = vmatprep.subr.bf16.mxu1 %v3673_v1 }
  0x1e   :  { %830 = vmatpush1.bf16.msra.mxu0 %v3459_v9  ;;  %3445 = vmatpush1.bf16.msra.mxu1 %v3459_v9 }
  0x1f   :  { %843 = vmatprep.subr.bf16.mxu0 %v3673_v1  ;;  %3436 = vmatprep.subr.bf16.mxu1 %v3673_v1 }
  0x22   :  { %844 = vmatpush2.bf16.msra.mxu0 %v813_v11  ;;  %3446 = vmatpush2.bf16.msra.mxu1 %v813_v11 }
  0x23   :  { %845 = vmatprep.subr.bf16.mxu0 %v3673_v1  ;;  %3437 = vmatprep.subr.bf16.mxu1 %v3673_v1 }
  0x26   :  { %846 = vmatpush2.bf16.msra.mxu0 %v3461_v12  ;;  %3447 = vmatpush2.bf16.msra.mxu1 %v3461_v12 }
  0x29   :  { %848 = vmatmul.mubr.bf16.vlgmr.msra.gmra.mxu0 %v3462_v13 }
  0x2a   :  { %3057 = vmatprep.mubr.msk.bf16.mxu0 %vm660_vm0, %v3465_v14 }
  0x31   :  { %856 = vmatmul.mubr.bf16.gmra.mxu0 %v3467_v15 }
  0x32   :  { %3058 = vmatprep.mubr.msk.bf16.mxu0 %vm660_vm0, %v3468_v16 }
  0x39   :  { %864 = vmatmul.mubr.bf16.gmra.mxu0 %v3470_v17 }
  0x3a   :  { %3059 = vmatprep.mubr.msk.bf16.mxu0 %vm660_vm0, %v3471_v18 }
  0x41   :  { %872 = vmatmul.mubr.bf16.gmra.mxu0 %v3473_v19 }
  0x42   :  { %3060 = vmatprep.mubr.msk.bf16.mxu0 %vm660_vm0, %v3474_v20 }
  0x49   :  { %880 = vmatmul.mubr.bf16.gmra.mxu0 %v3476_v21 }
  0x4a   :  { %3061 = vmatprep.mubr.msk.bf16.mxu0 %vm660_vm0, %v3477_v22 }
  0x51   :  { %888 = vmatmul.mubr.bf16.gmra.mxu0 %v3479_v23 }
  0x52   :  { %3062 = vmatprep.mubr.msk.bf16.mxu0 %vm660_vm0, %v3480_v24 }
  0x53   :  { %14 = vsyncpa [#allocation3], 0  ;;  %v3482_v25 = vld [vmem:[%s4711_s0 + $0x60] ss:$8 sps:$4 sm:$0xff]   ;;  %v3483_v26 = vld [vmem:[%s4711_s0 + $0x74] ss:$8 sps:$4 sm:$0xff]  }
  0x54   :  { %v3485_v27 = vld [vmem:[%s4711_s0 + $0x70] ss:$8 sps:$4 sm:$0xff]   ;;  %v3486_v28 = vld [vmem:[%s4711_s0 + $0x84] ss:$8 sps:$4 sm:$0xff]   ;;  %v3488_v29 = vld [vmem:[%s4711_s0 + $0x80] ss:$8 sps:$4 sm:$0xff]  }
  0x55   :  { %v3489_v30 = vld [vmem:[%s4711_s0 + $0x94] ss:$8 sps:$4 sm:$0xff]   ;;  %v3491_v31 = vld [vmem:[%s4711_s0 + $0x90] ss:$8 sps:$4 sm:$0xff]   ;;  %v3492_v32 = vld [vmem:[%s4711_s0 + $0xa4] ss:$8 sps:$4 sm:$0xff]  }
  0x56   :  { %v3494_v33 = vld [vmem:[%s4711_s0 + $0xa0] ss:$8 sps:$4 sm:$0xff]   ;;  %v3495_v34 = vld [vmem:[%s4711_s0 + $0xb4] ss:$8 sps:$4 sm:$0xff]   ;;  %v3497_v35 = vld [vmem:[%s4711_s0 + $0xb0] ss:$8 sps:$4 sm:$0xff]  }
  0x57   :  { %v3498_v36 = vld [vmem:[%s4711_s0 + $0xc4] ss:$8 sps:$4 sm:$0xff]   ;;  %v3500_v37 = vld [vmem:[%s4711_s0 + $0xc0] ss:$8 sps:$4 sm:$0xff]   ;;  %v3501_v38 = vld [vmem:[%s4711_s0 + $0xd4] ss:$8 sps:$4 sm:$0xff]  }
  0x58   :  { %v3551_v39 = vld [vmem:[%s4711_s0 + $0x294] ss:$8 sps:$4 sm:$0xff]   ;;  %v3549_v40 = vld [vmem:[%s4711_s0 + $0x290] ss:$8 sps:$4 sm:$0xff]   ;;  %v3504_v42 = vld [vmem:[%s4711_s0 + $0xe4] ss:$8 sps:$4 sm:$0xff]  }
  0x59   :  { %896 = vmatmul.mubr.bf16.gmra.mxu0 %v3482_v25  ;;  %3097 = vmatprep.mubr.msk.bf16.mxu1 %vm660_vm0, %v3551_v39  ;;  %v3503_v41 = vld [vmem:[%s4711_s0 + $0xd0] ss:$8 sps:$4 sm:$0xff]   ;;  %v3555_v43 = vld [vmem:[%s4711_s0 + $0x2a4] ss:$8 sps:$4 sm:$0xff]   ;;  %v3557_v44 = vld [vmem:[%s4711_s0 + $0x2a0] ss:$8 sps:$4 sm:$0xff]  }
  0x5a   :  { %3063 = vmatprep.mubr.msk.bf16.mxu0 %vm660_vm0, %v3483_v26  ;;  %1176 = vmatmul.mubr.bf16.vlgmr.msra.gmra.mxu1 %v3549_v40  ;;  %v3506_v45 = vld [vmem:[%s4711_s0 + $0xe0] ss:$8 sps:$4 sm:$0xff]   ;;  %v3507_v46 = vld [vmem:[%s4711_s0 + $0xf4] ss:$8 sps:$4 sm:$0xff]   ;;  %v3563_v48 = vld [vmem:[%s4711_s0 + $0x2b0] ss:$8 sps:$4 sm:$0xff]  }
  0x5b   :  { %3098 = vmatprep.mubr.msk.bf16.mxu1 %vm660_vm0, %v3555_v43  ;;  %v3561_v47 = vld [vmem:[%s4711_s0 + $0x2b4] ss:$8 sps:$4 sm:$0xff]   ;;  %v3509_v49 = vld [vmem:[%s4711_s0 + $0xf0] ss:$8 sps:$4 sm:$0xff]   ;;  %v3510_v50 = vld [vmem:[%s4711_s0 + $0x104] ss:$8 sps:$4 sm:$0xff]  }
  0x5c   :  { %v3567_v51 = vld [vmem:[%s4711_s0 + $0x2c4] ss:$8 sps:$4 sm:$0xff]   ;;  %v3569_v52 = vld [vmem:[%s4711_s0 + $0x2c0] ss:$8 sps:$4 sm:$0xff]   ;;  %v3513_v54 = vld [vmem:[%s4711_s0 + $0x114] ss:$8 sps:$4 sm:$0xff]  }
  0x5d   :  { %v3512_v53 = vld [vmem:[%s4711_s0 + $0x100] ss:$8 sps:$4 sm:$0xff]   ;;  %v3573_v55 = vld [vmem:[%s4711_s0 + $0x2d4] ss:$8 sps:$4 sm:$0xff]   ;;  %v3575_v56 = vld [vmem:[%s4711_s0 + $0x2d0] ss:$8 sps:$4 sm:$0xff]  }
  0x5e   :  { %v3515_v57 = vld [vmem:[%s4711_s0 + $0x110] ss:$8 sps:$4 sm:$0xff]   ;;  %v3516_v58 = vld [vmem:[%s4711_s0 + $0x124] ss:$8 sps:$4 sm:$0xff]   ;;  %v3581_v60 = vld [vmem:[%s4711_s0 + $0x2e0] ss:$8 sps:$4 sm:$0xff]  }
  0x5f   :  { %v3579_v59 = vld [vmem:[%s4711_s0 + $0x2e4] ss:$8 sps:$4 sm:$0xff]   ;;  %v3518_v61 = vld [vmem:[%s4711_s0 + $0x120] ss:$8 sps:$4 sm:$0xff]   ;;  %v3519_v62 = vld [vmem:[%s4711_s0 + $0x134] ss:$8 sps:$4 sm:$0xff]  }
  0x60   :  { %v3585_v63 = vld [vmem:[%s4711_s0 + $0x2f4] ss:$8 sps:$4 sm:$0xff]   ;;  %v3587_v0 = vld [vmem:[%s4711_s0 + $0x2f0] ss:$8 sps:$4 sm:$0xff]   ;;  %v3522_v2 = vld [vmem:[%s4711_s0 + $0x144] ss:$8 sps:$4 sm:$0xff]  }
  0x61   :  { %904 = vmatmul.mubr.bf16.gmra.mxu0 %v3485_v27  ;;  %v3521_v1 = vld [vmem:[%s4711_s0 + $0x130] ss:$8 sps:$4 sm:$0xff]   ;;  %v3591_v3 = vld [vmem:[%s4711_s0 + $0x304] ss:$8 sps:$4 sm:$0xff]   ;;  %v3593_v4 = vld [vmem:[%s4711_s0 + $0x300] ss:$8 sps:$4 sm:$0xff]  }
  0x62   :  { %3064 = vmatprep.mubr.msk.bf16.mxu0 %vm660_vm0, %v3486_v28  ;;  %1184 = vmatmul.mubr.bf16.gmra.mxu1 %v3557_v44  ;;  %v3524_v5 = vld [vmem:[%s4711_s0 + $0x140] ss:$8 sps:$4 sm:$0xff]   ;;  %v3525_v6 = vld [vmem:[%s4711_s0 + $0x154] ss:$8 sps:$4 sm:$0xff]   ;;  %v3599_v8 = vld [vmem:[%s4711_s0 + $0x310] ss:$8 sps:$4 sm:$0xff]  }
  0x63   :  { %3099 = vmatprep.mubr.msk.bf16.mxu1 %vm660_vm0, %v3561_v47  ;;  %v3597_v7 = vld [vmem:[%s4711_s0 + $0x314] ss:$8 sps:$4 sm:$0xff]   ;;  %v3527_v9 = vld [vmem:[%s4711_s0 + $0x150] ss:$8 sps:$4 sm:$0xff]   ;;  %v3528_v10 = vld [vmem:[%s4711_s0 + $0x164] ss:$8 sps:$4 sm:$0xff]  }
  0x64   :  { %v3530_v11 = vld [vmem:[%s4711_s0 + $0x160] ss:$8 sps:$4 sm:$0xff]   ;;  %v3531_v12 = vld [vmem:[%s4711_s0 + $0x174] ss:$8 sps:$4 sm:$0xff]   ;;  %v3533_v13 = vld [vmem:[%s4711_s0 + $0x170] ss:$8 sps:$4 sm:$0xff]  }
  0x65   :  { %v3534_v14 = vld [vmem:[%s4711_s0 + $0x184] ss:$8 sps:$4 sm:$0xff]   ;;  %v3536_v15 = vld [vmem:[%s4711_s0 + $0x180] ss:$8 sps:$4 sm:$0xff]   ;;  %v3537_v16 = vld [vmem:[%s4711_s0 + $0x194] ss:$8 sps:$4 sm:$0xff]  }
  0x66   :  { %v3539_v20 = vld [vmem:[%s4711_s0 + $0x190] ss:$8 sps:$4 sm:$0xff]   ;;  %v3540_v21 = vld [vmem:[%s4711_s0 + $0x1a4] ss:$8 sps:$4 sm:$0xff]   ;;  %v3542_v26 = vld [vmem:[%s4711_s0 + $0x1a0] ss:$8 sps:$4 sm:$0xff]  }
  0x67   :  { %v3543_v27 = vld [vmem:[%s4711_s0 + $0x1b4] ss:$8 sps:$4 sm:$0xff]   ;;  %v3554_v44 = vld [vmem:[%s4711_s0 + $0x1d0] ss:$8 sps:$4 sm:$0xff]   ;;  %vm3675_vm2 = vmmov 0   ;;  %vm1392_vm3 = vcmask 130048  }
  0x68   :  { %v3552_v39 = vld [vmem:[%s4711_s0 + $0x1d4] ss:$8 sps:$4 sm:$0xff]   ;;  %vm2785_vm4 = vcmask 1043456   ;;  %vm2886_vm5 = vcmask 1041408   ;;  %vm2781_vm6 = vcmask 982016   ;;  %vm2882_vm7 = vcmask 687104  }
  0x69   :  { %912 = vmatmul.mubr.bf16.gmra.mxu0 %v3488_v29  ;;  %s3676_s17 = smov [#allocation2]   ;;  %vm2930_vm8 = vcmask 74752  }
  0x6a   :  { %3065 = vmatprep.mubr.msk.bf16.mxu0 %vm660_vm0, %v3489_v30  ;;  %1192 = vmatmul.mubr.bf16.gmra.mxu1 %v3563_v48 }
  0x6b   :  { %3100 = vmatprep.mubr.msk.bf16.mxu1 %vm660_vm0, %v3567_v51  ;;  %v3564_v51 = vld [vmem:[%s4711_s0 + $0x1f4] ss:$8 sps:$4 sm:$0xff]  }
  0x71   :  { %920 = vmatmul.mubr.bf16.gmra.mxu0 %v3491_v31 }
  0x72   :  { %3066 = vmatprep.mubr.msk.bf16.mxu0 %vm660_vm0, %v3492_v32  ;;  %1200 = vmatmul.mubr.bf16.gmra.mxu1 %v3569_v52  ;;  %v3545_v32 = vld [vmem:[%s4711_s0 + $0x1b0] ss:$8 sps:$4 sm:$0xff]  }
  0x73   :  { %3101 = vmatprep.mubr.msk.bf16.mxu1 %vm660_vm0, %v3573_v55 }
  0x79   :  { %928 = vmatmul.mubr.bf16.gmra.mxu0 %v3494_v33  ;;  %v3546_v33 = vld [vmem:[%s4711_s0 + $0x1c4] ss:$8 sps:$4 sm:$0xff]  }
  0x7a   :  { %3067 = vmatprep.mubr.msk.bf16.mxu0 %vm660_vm0, %v3495_v34  ;;  %1208 = vmatmul.mubr.bf16.gmra.mxu1 %v3575_v56  ;;  %v3566_v56 = vld [vmem:[%s4711_s0 + $0x1f0] ss:$8 sps:$4 sm:$0xff]  }
  0x7b   :  { %3102 = vmatprep.mubr.msk.bf16.mxu1 %vm660_vm0, %v3579_v59 }
  0x81   :  { %936 = vmatmul.mubr.bf16.gmra.mxu0 %v3497_v35 }
  0x82   :  { %3068 = vmatprep.mubr.msk.bf16.mxu0 %vm660_vm0, %v3498_v36  ;;  %1216 = vmatmul.mubr.bf16.gmra.mxu1 %v3581_v60 }
  0x83   :  { %3103 = vmatprep.mubr.msk.bf16.mxu1 %vm660_vm0, %v3585_v63  ;;  %v3576_v63 = vld [vmem:[%s4711_s0 + $0x214] ss:$8 sps:$4 sm:$0xff]  }
  0x89   :  { %944 = vmatmul.mubr.bf16.gmra.mxu0 %v3500_v37 }
  0x8a   :  { %3069 = vmatprep.mubr.msk.bf16.mxu0 %vm660_vm0, %v3501_v38  ;;  %1224 = vmatmul.mubr.bf16.gmra.mxu1 %v3587_v0  ;;  %v3548_v38 = vld [vmem:[%s4711_s0 + $0x1c0] ss:$8 sps:$4 sm:$0xff]  }
  0x8b   :  { %3104 = vmatprep.mubr.msk.bf16.mxu1 %vm660_vm0, %v3591_v3 }
  0x91   :  { %952 = vmatmul.mubr.bf16.gmra.mxu0 %v3503_v41 }
  0x92   :  { %3070 = vmatprep.mubr.msk.bf16.mxu0 %vm660_vm0, %v3504_v42  ;;  %1232 = vmatmul.mubr.bf16.gmra.mxu1 %v3593_v4  ;;  %v3578_v4 = vld [vmem:[%s4711_s0 + $0x210] ss:$8 sps:$4 sm:$0xff]  }
  0x93   :  { %3105 = vmatprep.mubr.msk.bf16.mxu1 %vm660_vm0, %v3597_v7 }
  0x99   :  { %960 = vmatmul.mubr.bf16.gmra.mxu0 %v3506_v45  ;;  %v3558_v45 = vld [vmem:[%s4711_s0 + $0x1e4] ss:$8 sps:$4 sm:$0xff]  }
  0x9a   :  { %3071 = vmatprep.mubr.msk.bf16.mxu0 %vm660_vm0, %v3507_v46  ;;  %1240 = vmatmul.mubr.bf16.gmra.mxu1 %v3599_v8 }
  0xa1   :  { %968 = vmatmul.mubr.bf16.gmra.mxu0 %v3509_v49 }
  0xa2   :  { %3072 = vmatprep.mubr.msk.bf16.mxu0 %vm660_vm0, %v3510_v50  ;;  %v3560_v50 = vld [vmem:[%s4711_s0 + $0x1e0] ss:$8 sps:$4 sm:$0xff]  }
  0xa9   :  { %976 = vmatmul.mubr.bf16.gmra.mxu0 %v3512_v53 }
  0xaa   :  { %3073 = vmatprep.mubr.msk.bf16.mxu0 %vm660_vm0, %v3513_v54 }
  0xb1   :  { %984 = vmatmul.mubr.bf16.gmra.mxu0 %v3515_v57  ;;  %v3570_v57 = vld [vmem:[%s4711_s0 + $0x204] ss:$8 sps:$4 sm:$0xff]  }
  0xb2   :  { %3074 = vmatprep.mubr.msk.bf16.mxu0 %vm660_vm0, %v3516_v58 }
  0xb9   :  { %992 = vmatmul.mubr.bf16.gmra.mxu0 %v3518_v61 }
  0xba   :  { %3075 = vmatprep.mubr.msk.bf16.mxu0 %vm660_vm0, %v3519_v62  ;;  %v3572_v62 = vld [vmem:[%s4711_s0 + $0x200] ss:$8 sps:$4 sm:$0xff]  }
  0xc1   :  { %1000 = vmatmul.mubr.bf16.gmra.mxu0 %v3521_v1 }
  0xc2   :  { %3076 = vmatprep.mubr.msk.bf16.mxu0 %vm660_vm0, %v3522_v2 }
  0xc9   :  { %1008 = vmatmul.mubr.bf16.gmra.mxu0 %v3524_v5  ;;  %v3582_v5 = vld [vmem:[%s4711_s0 + $0x224] ss:$8 sps:$4 sm:$0xff]  }
  0xca   :  { %3077 = vmatprep.mubr.msk.bf16.mxu0 %vm660_vm0, %v3525_v6 }
  0xd1   :  { %1016 = vmatmul.mubr.bf16.gmra.mxu0 %v3527_v9 }
  0xd2   :  { %3078 = vmatprep.mubr.msk.bf16.mxu0 %vm660_vm0, %v3528_v10  ;;  %v3584_v10 = vld [vmem:[%s4711_s0 + $0x220] ss:$8 sps:$4 sm:$0xff]  }
  0xd9   :  { %1024 = vmatmul.mubr.bf16.gmra.mxu0 %v3530_v11  ;;  %v3588_v11 = vld [vmem:[%s4711_s0 + $0x234] ss:$8 sps:$4 sm:$0xff]  }
  0xda   :  { %3079 = vmatprep.mubr.msk.bf16.mxu0 %vm660_vm0, %v3531_v12 }
  0xe1   :  { %1032 = vmatmul.mubr.bf16.gmra.mxu0 %v3533_v13 }
  0xe2   :  { %3080 = vmatprep.mubr.msk.bf16.mxu0 %vm660_vm0, %v3534_v14 }
  0xe9   :  { %v3998_v17 = vpop.f32.mrf.mxu0  ;;  %1040 = vmatmul.mubr.bf16.gmra.mxu0 %v3536_v15 }
  0xea   :  { %4723 = vst [vmem:[#allocation5_spill] sm:$0xff] %v3998_v17  ;;  %3081 = vmatprep.mubr.msk.bf16.mxu0 %vm660_vm0, %v3537_v16  ;;  %v3590_v16 = vld [vmem:[%s4711_s0 + $0x230] ss:$8 sps:$4 sm:$0xff]  }
  0xeb   :  { %v851_v18 = vpop.f32.mrf.mxu0 }
  0xec   :  { %v3594_v18 = vld [vmem:[%s4711_s0 + $0x244] ss:$8 sps:$4 sm:$0xff]  }
  0xed   :  { %v4001_v19 = vpop.f32.mrf.mxu0 }
  0xee   :  { %4724 = vst [vmem:[#allocation6_spill] sm:$0xff] %v4001_v19 }
  0xef   :  { %v854_v22 = vpop.f32.mrf.mxu0 }
  0xf1   :  { %v4009_v23 = vpop.f32.mrf.mxu0  ;;  %1048 = vmatmul.mubr.bf16.gmra.mxu0 %v3539_v20 }
  0xf2   :  { %4725 = vst [vmem:[#allocation7_spill] sm:$0xff] %v4009_v23  ;;  %3082 = vmatprep.mubr.msk.bf16.mxu0 %vm660_vm0, %v3540_v21 }
  0xf3   :  { %v859_v24 = vpop.f32.mrf.mxu0 }
  0xf5   :  { %v4012_v25 = vpop.f32.mrf.mxu0 }
  0xf6   :  { %4726 = vst [vmem:[#allocation8_spill] sm:$0xff] %v4012_v25 }
  0xf7   :  { %v862_v28 = vpop.f32.mrf.mxu0 }
  0xf9   :  { %v4020_v29 = vpop.f32.mrf.mxu0  ;;  %1056 = vmatmul.mubr.bf16.gmra.mxu0 %v3542_v26  ;;  %v3596_v26 = vld [vmem:[%s4711_s0 + $0x240] ss:$8 sps:$4 sm:$0xff]  }
  0xfa   :  { %4727 = vst [vmem:[#allocation9_spill] sm:$0xff] %v4020_v29  ;;  %3083 = vmatprep.mubr.msk.bf16.mxu0 %vm660_vm0, %v3543_v27  ;;  %v3600_v27 = vld [vmem:[%s4711_s0 + $0x254] ss:$8 sps:$4 sm:$0xff]  }
  0xfb   :  { %v867_v30 = vpop.f32.mrf.mxu0 }
  0xfd   :  { %v4023_v31 = vpop.f32.mrf.mxu0 }
  0xfe   :  { %4728 = vst [vmem:[#allocation10_spill] sm:$0xff] %v4023_v31 }
  0xff   :  { %v870_v34 = vpop.f32.mrf.mxu0 }
 0x100   :  { %v3602_v34 = vld [vmem:[%s4711_s0 + $0x250] ss:$8 sps:$4 sm:$0xff]  }
 0x101   :  { %v4031_v35 = vpop.f32.mrf.mxu0  ;;  %1064 = vmatmul.mubr.bf16.gmra.mxu0 %v3545_v32 }
 0x102   :  { %4729 = vst [vmem:[#allocation11_spill] sm:$0xff] %v4031_v35  ;;  %3084 = vmatprep.mubr.msk.bf16.mxu0 %vm660_vm0, %v3546_v33 }
 0x103   :  { %v875_v36 = vpop.f32.mrf.mxu0 }
 0x105   :  { %v4034_v37 = vpop.f32.mrf.mxu0 }
 0x107   :  { %v878_v40 = vpop.f32.mrf.mxu0 }
 0x109   :  { %v4042_v41 = vpop.f32.mrf.mxu0  ;;  %1072 = vmatmul.mubr.bf16.gmra.mxu0 %v3548_v38  ;;  %v3603_v38 = vld [vmem:[%s4711_s0 + $0x264] ss:$8 sps:$4 sm:$0xff]  }
 0x10a   :  { %3085 = vmatprep.mubr.msk.bf16.mxu0 %vm660_vm0, %v3552_v39 }
 0x10b   :  { %v883_v42 = vpop.f32.mrf.mxu0 }
 0x10d   :  { %v4045_v43 = vpop.f32.mrf.mxu0 }
 0x10f   :  { %v886_v46 = vpop.f32.mrf.mxu0 }
 0x111   :  { %v4053_v47 = vpop.f32.mrf.mxu0  ;;  %1080 = vmatmul.mubr.bf16.gmra.mxu0 %v3554_v44 }
 0x112   :  { %3086 = vmatprep.mubr.msk.bf16.mxu0 %vm660_vm0, %v3558_v45 }
 0x113   :  { %v891_v48 = vpop.f32.mrf.mxu0 }
 0x115   :  { %v4056_v49 = vpop.f32.mrf.mxu0 }
 0x117   :  { %v894_v52 = vpop.f32.mrf.mxu0 }
 0x118   :  { %v3606_v52 = vld [vmem:[%s4711_s0 + $0x274] ss:$8 sps:$4 sm:$0xff]  }
 0x119   :  { %v4064_v53 = vpop.f32.mrf.mxu0  ;;  %1088 = vmatmul.mubr.bf16.gmra.mxu0 %v3560_v50  ;;  %v3605_v50 = vld [vmem:[%s4711_s0 + $0x260] ss:$8 sps:$4 sm:$0xff]  }
 0x11a   :  { %3087 = vmatprep.mubr.msk.bf16.mxu0 %vm660_vm0, %v3564_v51  ;;  %v4138_v36 = vpop.f32.mrf.mxu1 }
 0x11b   :  { %v899_v54 = vpop.f32.mrf.mxu0 }
 0x11c   :  { %v1179_v40 = vpop.f32.mrf.mxu1 }
 0x11d   :  { %v4067_v55 = vpop.f32.mrf.mxu0 }
 0x11e   :  { %v4145_v44 = vpop.f32.mrf.mxu1 }
 0x11f   :  { %v902_v58 = vpop.f32.mrf.mxu0 }
 0x120   :  { %v1182_v46 = vpop.f32.mrf.mxu1 }
 0x121   :  { %v4075_v59 = vpop.f32.mrf.mxu0  ;;  %1096 = vmatmul.mubr.bf16.gmra.mxu0 %v3566_v56 }
 0x122   :  { %3088 = vmatprep.mubr.msk.bf16.mxu0 %vm660_vm0, %v3570_v57  ;;  %v4153_v51 = vpop.f32.mrf.mxu1 }
 0x123   :  { %v907_v60 = vpop.f32.mrf.mxu0 }
 0x124   :  { %v1187_v56 = vpop.f32.mrf.mxu1 }
 0x125   :  { %v4078_v61 = vpop.f32.mrf.mxu0 }
 0x126   :  { %v4160_v58 = vpop.f32.mrf.mxu1 }
 0x127   :  { %v910_v0 = vpop.f32.mrf.mxu0 }
 0x128   :  { %v3608_v0 = vld [vmem:[%s4711_s0 + $0x270] ss:$8 sps:$4 sm:$0xff]  }
 0x129   :  { %v4086_v1 = vpop.f32.mrf.mxu0  ;;  %1104 = vmatmul.mubr.bf16.gmra.mxu0 %v3572_v62  ;;  %v1190_v62 = vpop.f32.mrf.mxu1 }
 0x12a   :  { %3089 = vmatprep.mubr.msk.bf16.mxu0 %vm660_vm0, %v3576_v63 }
 0x12b   :  { %v915_v2 = vpop.f32.mrf.mxu0 }
 0x12c   :  { %v4168_v2 = vpop.f32.mrf.mxu1 }
 0x12d   :  { %v4089_v3 = vpop.f32.mrf.mxu0 }
 0x12f   :  { %v918_v6 = vpop.f32.mrf.mxu0 }
 0x130   :  { %v1195_v6 = vpop.f32.mrf.mxu1 }
 0x131   :  { %v4097_v7 = vpop.f32.mrf.mxu0  ;;  %1112 = vmatmul.mubr.bf16.gmra.mxu0 %v3578_v4  ;;  %v3609_v4 = vld [vmem:[%s4711_s0 + $0x284] ss:$8 sps:$4 sm:$0xff]  }
 0x132   :  { %3090 = vmatprep.mubr.msk.bf16.mxu0 %vm660_vm0, %v3582_v5 }
 0x133   :  { %v923_v8 = vpop.f32.mrf.mxu0 }
 0x135   :  { %v4100_v9 = vpop.f32.mrf.mxu0 }
 0x137   :  { %v926_v12 = vpop.f32.mrf.mxu0 }
 0x139   :  { %v4108_v13 = vpop.f32.mrf.mxu0  ;;  %1120 = vmatmul.mubr.bf16.gmra.mxu0 %v3584_v10  ;;  %v4175_v10 = vpop.f32.mrf.mxu1 }
 0x13a   :  { %3091 = vmatprep.mubr.msk.bf16.mxu0 %vm660_vm0, %v3588_v11  ;;  %v3612_v11 = vld [vmem:[%s4714_s3 + $0x8] sm:$0xff]  }
 0x13b   :  { %v931_v14 = vpop.f32.mrf.mxu0 }
 0x13c   :  { %v4721_v14 = vmov 0.0  }
 0x13d   :  { %v4111_v15 = vpop.f32.mrf.mxu0  ;;  %3242 = vmatprep.subr.bf16.mxu1 %v4721_v14 }
 0x13e   :  { %3243 = vmatpush3.bf16.msra.mxu1 %v3612_v11 }
 0x13f   :  { %v934_v20 = vpop.f32.mrf.mxu0  ;;  %3248 = vmatprep.subr.bf16.mxu1 %v4721_v14 }
 0x140   :  { %v3611_v20 = vld [vmem:[%s4711_s0 + $0x280] ss:$8 sps:$4 sm:$0xff]  }
 0x141   :  { %v4119_v21 = vpop.f32.mrf.mxu0  ;;  %1128 = vmatmul.mubr.bf16.gmra.mxu0 %v3590_v16  ;;  %v1198_v16 = vpop.f32.mrf.mxu1 }
 0x142   :  { %3092 = vmatprep.mubr.msk.bf16.mxu0 %vm660_vm0, %v3594_v18 }
 0x143   :  { %v939_v22 = vpop.f32.mrf.mxu0 }
 0x144   :  { %v4187_v22 = vpop.f32.mrf.mxu1 }
 0x145   :  { %v4122_v24 = vpop.f32.mrf.mxu0 }
 0x147   :  { %v942_v28 = vpop.f32.mrf.mxu0 }
 0x149   :  { %v4130_v30 = vpop.f32.mrf.mxu0  ;;  %1136 = vmatmul.mubr.bf16.gmra.mxu0 %v3596_v26 }
 0x14a   :  { %4730 = vst [vmem:[#allocation12_spill] sm:$0xff] %v4130_v30  ;;  %3093 = vmatprep.mubr.msk.bf16.mxu0 %vm660_vm0, %v3600_v27  ;;  %v1203_v27 = vpop.f32.mrf.mxu1 }
 0x14b   :  { %v947_v32 = vpop.f32.mrf.mxu0 }
 0x14c   :  { %v4192_v32 = vpop.f32.mrf.mxu1 }
 0x14d   :  { %v4133_v33 = vpop.f32.mrf.mxu0 }
 0x14e   :  { %4731 = vst [vmem:[#allocation13_spill] sm:$0xff] %v4133_v33 }
 0x14f   :  { %v950_v39 = vpop.f32.mrf.mxu0 }
 0x151   :  { %v4143_v42 = vpop.f32.mrf.mxu0  ;;  %1144 = vmatmul.mubr.bf16.gmra.mxu0 %v3602_v34 }
 0x152   :  { %4732 = vst [vmem:[#allocation14_spill] sm:$0xff] %v4143_v42  ;;  %3094 = vmatprep.mubr.msk.bf16.mxu0 %vm660_vm0, %v3603_v38  ;;  %v1206_v38 = vpop.f32.mrf.mxu1 }
 0x153   :  { %v955_v45 = vpop.f32.mrf.mxu0 }
 0x154   :  { %v4196_v40 = vpop.f32.mrf.mxu1 }
 0x155   :  { %v4148_v48 = vpop.f32.mrf.mxu0 }
 0x156   :  { %4733 = vst [vmem:[#allocation15_spill] sm:$0xff] %v4148_v48  ;;  %v1211_v46 = vpop.f32.mrf.mxu1 }
 0x157   :  { %v958_v54 = vpop.f32.mrf.mxu0 }
 0x159   :  { %v4158_v57 = vpop.f32.mrf.mxu0  ;;  %1152 = vmatmul.mubr.bf16.gmra.mxu0 %v3605_v50 }
 0x15a   :  { %4734 = vst [vmem:[#allocation16_spill] sm:$0xff] %v4158_v57  ;;  %3095 = vmatprep.mubr.msk.bf16.mxu0 %vm660_vm0, %v3606_v52  ;;  %v4200_v52 = vpop.f32.mrf.mxu1 }
 0x15b   :  { %v963_v60 = vpop.f32.mrf.mxu0 }
 0x15c   :  { %v1214_v56 = vpop.f32.mrf.mxu1 }
 0x15d   :  { %v4163_v63 = vpop.f32.mrf.mxu0 }
 0x15e   :  { %4735 = vst [vmem:[#allocation17_spill] sm:$0xff] %v4163_v63  ;;  %v4204_v62 = vpop.f32.mrf.mxu1 }
 0x15f   :  { %v966_v5 = vpop.f32.mrf.mxu0 }
 0x161   :  { %v4173_v8 = vpop.f32.mrf.mxu0  ;;  %1160 = vmatmul.mubr.bf16.gmra.mxu0 %v3608_v0 }
 0x162   :  { %4736 = vst [vmem:[#allocation18_spill] sm:$0xff] %v4173_v8  ;;  %3096 = vmatprep.mubr.msk.bf16.mxu0 %vm660_vm0, %v3609_v4  ;;  %v1219_v4 = vpop.f32.mrf.mxu1 }
 0x163   :  { %v971_v12 = vpop.f32.mrf.mxu0 }
 0x164   :  { %v4208_v6 = vpop.f32.mrf.mxu1 }
 0x165   :  { %v4182_v18 = vpop.f32.mrf.mxu0 }
 0x166   :  { %4737 = vst [vmem:[#allocation19_spill] sm:$0xff] %v4182_v18  ;;  %v1222_v12 = vpop.f32.mrf.mxu1 }
 0x167   :  { %v974_v26 = vpop.f32.mrf.mxu0 }
 0x169   :  { %v4190_v28 = vpop.f32.mrf.mxu0  ;;  %1168 = vmatmul.mubr.bf16.gmra.mxu0 %v3611_v20  ;;  %v4212_v20 = vpop.f32.mrf.mxu1 }
 0x16b   :  { %v979_v34 = vpop.f32.mrf.mxu0  ;;  %v1227_v27 = vpop.f32.mrf.mxu1 }
 0x16d   :  { %v4194_v39 = vpop.f32.mrf.mxu0  ;;  %v4216_v38 = vpop.f32.mrf.mxu1 }
 0x16f   :  { %v982_v45 = vpop.f32.mrf.mxu0  ;;  %v1230_v46 = vpop.f32.mrf.mxu1 }
 0x171   :  { %v4198_v50 = vpop.f32.mrf.mxu0  ;;  %v4220_v56 = vpop.f32.mrf.mxu1 }
 0x173   :  { %v987_v54 = vpop.f32.mrf.mxu0  ;;  %v1235_v4 = vpop.f32.mrf.mxu1 }
 0x175   :  { %v4202_v60 = vpop.f32.mrf.mxu0  ;;  %v4224_v12 = vpop.f32.mrf.mxu1 }
 0x177   :  { %v990_v0 = vpop.f32.mrf.mxu0  ;;  %v1238_v35 = vpop.f32.mrf.mxu1 }
 0x179   :  { %v4206_v5 = vpop.f32.mrf.mxu0  ;;  %v4228_v27 = vpop.f32.mrf.mxu1 }
 0x17a   :  { %4738 = vst [vmem:[#allocation20_spill] sm:$0xff] %v4228_v27 }
 0x17b   :  { %v995_v11 = vpop.f32.mrf.mxu0  ;;  %v1243_v31 = vpop.f32.mrf.mxu1 }
 0x17c   :  { %v4740_v31 = vmov 0.0  }
 0x17d   :  { %v4210_v16 = vpop.f32.mrf.mxu0  ;;  %v4232_v46 = vpop.f32.mrf.mxu1  ;;  %3244 = vmatprep.mubr.msk.bf16.mxu1 %vm3675_vm2, %v4740_v31 }
 0x17e   :  { %4739 = vst [vmem:[#allocation21_spill] sm:$0xff] %v4232_v46 }
 0x17f   :  { %v998_v26 = vpop.f32.mrf.mxu0  ;;  %v1246_v29 = vpop.f32.mrf.mxu1 }
 0x181   :  { %v4214_v34 = vpop.f32.mrf.mxu0 }
 0x183   :  { %v1003_v45 = vpop.f32.mrf.mxu0 }
 0x185   :  { %v4218_v54 = vpop.f32.mrf.mxu0 }
 0x187   :  { %v1006_v0 = vpop.f32.mrf.mxu0 }
 0x189   :  { %v4222_v11 = vpop.f32.mrf.mxu0 }
 0x18b   :  { %v1011_v14 = vpop.f32.mrf.mxu0 }
 0x18d   :  { %v4226_v26 = vpop.f32.mrf.mxu0 }
 0x18f   :  { %v1014_v18 = vpop.f32.mrf.mxu0 }
 0x191   :  { %v4230_v45 = vpop.f32.mrf.mxu0 }
 0x193   :  { %v1019_v8 = vpop.f32.mrf.mxu0 }
 0x195   :  { %v4234_v0 = vpop.f32.mrf.mxu0 }
 0x197   :  { %v1022_v4 = vpop.f32.mrf.mxu0 }
 0x199   :  { %v4236_v63 = vpop.f32.mrf.mxu0 }
 0x19b   :  { %v1027_v25 = vpop.f32.mrf.mxu0 }
 0x19d   :  { %v4238_v14 = vpop.f32.mrf.mxu0 }
 0x19f   :  { %v1030_v35 = vpop.f32.mrf.mxu0 }
 0x1a1   :  { %v4240_v57 = vpop.f32.mrf.mxu0 }
 0x1a3   :  { %v1035_v23 = vpop.f32.mrf.mxu0 }
 0x1a5   :  { %v4244_v18 = vpop.f32.mrf.mxu0 }
 0x1a7   :  { %v1038_v8 = vpop.f32.mrf.mxu0 }
 0x1a9   :  { %v4246_v29 = vpop.f32.mrf.mxu0 }
 0x1ab   :  { %v1043_v48 = vpop.f32.mrf.mxu0 }
 0x1ad   :  { %v4248_v4 = vpop.f32.mrf.mxu0 }
 0x1ae   :  { %4741 = vst [vmem:[#allocation22_spill] sm:$0xff] %v4248_v4 }
 0x1af   :  { %v1046_v19 = vpop.f32.mrf.mxu0 }
 0x1b1   :  { %v4250_v25 = vpop.f32.mrf.mxu0 }
 0x1b2   :  { %4742 = vst [vmem:[#allocation23_spill] sm:$0xff] %v4250_v25 }
 0x1b3   :  { %v1051_v42 = vpop.f32.mrf.mxu0 }
 0x1b4   :  { %v1255_v42 = vmax.f32 %v4034_v37, %v4190_v28 }
 0x1b5   :  { %v4252_v35 = vpop.f32.mrf.mxu0 }
 0x1b7   :  { %v1054_v17 = vpop.f32.mrf.mxu0 }
 0x1b9   :  { %v4254_v23 = vpop.f32.mrf.mxu0 }
 0x1ba   :  { %4743 = vst [vmem:[#allocation24_spill] sm:$0xff] %v4254_v23 }
 0x1bb   :  { %v1059_v33 = vpop.f32.mrf.mxu0 }
 0x1bd   :  { %v4256_v46 = vpop.f32.mrf.mxu0 }
 0x1be   :  { %4744 = vst [vmem:[#allocation25_spill] sm:$0xff] %v4256_v46 }
 0x1bf   :  { %v1062_v31 = vpop.f32.mrf.mxu0 }
 0x1c0   :  { %v1256_v31 = vmax.f32 %v4042_v41, %v4194_v39 }
 0x1c1   :  { %v4258_v30 = vpop.f32.mrf.mxu0 }
 0x1c3   :  { %v1067_v8 = vpop.f32.mrf.mxu0 }
 0x1c5   :  { %v4260_v27 = vpop.f32.mrf.mxu0 }
 0x1c6   :  { %4745 = vst [vmem:[#allocation26_spill] sm:$0xff] %v4260_v27 }
 0x1c7   :  { %v1070_v48 = vpop.f32.mrf.mxu0 }
 0x1c9   :  { %v4262_v4 = vpop.f32.mrf.mxu0 }
 0x1ca   :  { %4746 = vst [vmem:[#allocation27_spill] sm:$0xff] %v4262_v4 }
 0x1cb   :  { %v1075_v19 = vpop.f32.mrf.mxu0 }
 0x1cc   :  { %v1257_v19 = vmax.f32 %v4045_v43, %v4198_v50 }
 0x1cd   :  { %v1076_v25 = vpop.f32.mrf.mxu0 }
 0x1ce   :  { %v1280_v17 = vmax.f32 %v1076_v25, %v4138_v36 }
 0x1cf   :  { %v1078_v23 = vpop.f32.mrf.mxu0 }
 0x1d0   :  { %v4267_v33 = vmax.f32 %v1255_v42, %v1280_v17  ;;  %v1258_v23 = vmax.f32 %v4053_v47, %v4202_v60  ;;  %v1260_v42 = vmax.f32 %v4064_v53, %v4210_v16 }
 0x1d1   :  { %v1081_v46 = vpop.f32.mrf.mxu0 }
 0x1d2   :  { %v1281_v8 = vmax.f32 %v1081_v46, %v4145_v44  ;;  %v1259_v46 = vmax.f32 %v4056_v49, %v4206_v5 }
 0x1d3   :  { %v1083_v27 = vpop.f32.mrf.mxu0 }
 0x1d4   :  { %v4272_v48 = vmax.f32 %v1256_v31, %v1281_v8  ;;  %v1261_v31 = vmax.f32 %v4067_v55, %v4214_v34 }
 0x1d5   :  { %v1084_v4 = vpop.f32.mrf.mxu0 }
 0x1d6   :  { %v1282_v37 = vmax.f32 %v1084_v4, %v4153_v51 }
 0x1d7   :  { %v1086_v28 = vpop.f32.mrf.mxu0 }
 0x1d8   :  { %v4277_v36 = vmax.f32 %v1257_v19, %v1282_v37  ;;  %v1262_v19 = vmax.f32 %v4075_v59, %v4218_v54  ;;  %v1263_v28 = vmax.f32 %v4078_v61, %v4222_v11 }
 0x1d9   :  { %v1089_v25 = vpop.f32.mrf.mxu0 }
 0x1da   :  { %v1283_v41 = vmax.f32 %v1089_v25, %v4160_v58 }
 0x1db   :  { %v1091_v39 = vpop.f32.mrf.mxu0 }
 0x1dc   :  { %v4282_v44 = vmax.f32 %v1258_v23, %v1283_v41  ;;  %v1264_v23 = vmax.f32 %v4086_v1, %v4226_v26  ;;  %v1265_v39 = vmax.f32 %v4089_v3, %v4230_v45 }
 0x1dd   :  { %v1092_v27 = vpop.f32.mrf.mxu0 }
 0x1de   :  { %v1284_v43 = vmax.f32 %v1092_v27, %v4168_v2 }
 0x1df   :  { %v1094_v50 = vpop.f32.mrf.mxu0 }
 0x1e0   :  { %v4287_v51 = vmax.f32 %v1259_v46, %v1284_v43  ;;  %v1266_v46 = vmax.f32 %v4097_v7, %v4234_v0  ;;  %v1267_v50 = vmax.f32 %v4100_v9, %v4236_v63 }
 0x1e1   :  { %v1097_v4 = vpop.f32.mrf.mxu0 }
 0x1e2   :  { %v1285_v47 = vmax.f32 %v1097_v4, %v4175_v10 }
 0x1e3   :  { %v1099_v60 = vpop.f32.mrf.mxu0 }
 0x1e4   :  { %v4292_v58 = vmax.f32 %v1260_v42, %v1285_v47  ;;  %v1268_v42 = vmax.f32 %v4108_v13, %v4238_v14  ;;  %v1269_v60 = vmax.f32 %v4111_v15, %v4240_v57 }
 0x1e5   :  { %v1100_v17 = vpop.f32.mrf.mxu0 }
 0x1e6   :  { %v1286_v49 = vmax.f32 %v1100_v17, %v4187_v22 }
 0x1e7   :  { %v1102_v5 = vpop.f32.mrf.mxu0 }
 0x1e8   :  { %v4297_v2 = vmax.f32 %v1261_v31, %v1286_v49  ;;  %v1270_v31 = vmax.f32 %v4119_v21, %v4244_v18  ;;  %v1271_v5 = vmax.f32 %v4122_v24, %v4246_v29 }
 0x1e9   :  { %v1105_v8 = vpop.f32.mrf.mxu0 }
 0x1ea   :  { %v1287_v53 = vmax.f32 %v1105_v8, %v4192_v32  ;;  %v4747_v8 = vld [vmem:[#allocation20_spill] sm:$0xff] }
 0x1eb   :  { %v1107_v16 = vpop.f32.mrf.mxu0 }
 0x1ec   :  { %v4302_v10 = vmax.f32 %v1262_v19, %v1287_v53  ;;  %v4748_v53 = vld [vmem:[#allocation22_spill] sm:$0xff]  ;;  %v4749_v16 = vld [vmem:[#allocation12_spill] sm:$0xff] }
 0x1ed   :  { %v1108_v37 = vpop.f32.mrf.mxu0 }
 0x1ee   :  { %v1288_v55 = vmax.f32 %v1108_v37, %v4196_v40  ;;  %v1272_v37 = vmax.f32 %v4749_v16, %v4748_v53 }
 0x1ef   :  { %v1110_v34 = vpop.f32.mrf.mxu0 }
 0x1f0   :  { %v4307_v22 = vmax.f32 %v1263_v28, %v1288_v55  ;;  %v4750_v28 = vld [vmem:[#allocation21_spill] sm:$0xff] }
 0x1f1   :  { %v1113_v25 = vpop.f32.mrf.mxu0  ;;  %v4751_v34 = vld [vmem:[#allocation13_spill] sm:$0xff] }
 0x1f2   :  { %v1289_v59 = vmax.f32 %v1113_v25, %v4200_v52  ;;  %v4752_v25 = vld [vmem:[#allocation5_spill] sm:$0xff] }
 0x1f3   :  { %v1115_v54 = vpop.f32.mrf.mxu0 }
 0x1f4   :  { %v4312_v32 = vmax.f32 %v1264_v23, %v1289_v59  ;;  %v1248_v23 = vmax.f32 %v4752_v25, %v4751_v34  ;;  %v4753_v59 = vld [vmem:[#allocation23_spill] sm:$0xff]  ;;  %v4763_v25 = vld [vmem:[#allocation17_spill] sm:$0xff] }
 0x1f5   :  { %v1116_v41 = vpop.f32.mrf.mxu0 }
 0x1f6   :  { %v1290_v61 = vmax.f32 %v1116_v41, %v4204_v62 }
 0x1f7   :  { %v1118_v11 = vpop.f32.mrf.mxu0 }
 0x1f8   :  { %v4317_v40 = vmax.f32 %v1265_v39, %v1290_v61  ;;  %v4754_v39 = vld [vmem:[#allocation14_spill] sm:$0xff] }
 0x1f9   :  { %v1121_v27 = vpop.f32.mrf.mxu0  ;;  %v4755_v61 = vld [vmem:[#allocation6_spill] sm:$0xff] }
 0x1fa   :  { %v1291_v1 = vmax.f32 %v1121_v27, %v4208_v6  ;;  %v1249_v11 = vmax.f32 %v4755_v61, %v4754_v39 }
 0x1fb   :  { %v1123_v26 = vpop.f32.mrf.mxu0 }
 0x1fc   :  { %v4322_v52 = vmax.f32 %v1266_v46, %v1291_v1  ;;  %v4365_v26 = vld [vmem:[%s4713_s2] ss:$0 sm:$0xff] }
 0x1fd   :  { %v1124_v43 = vpop.f32.mrf.mxu0 }
 0x1fe   :  { %v1292_v3 = vmax.f32 %v1124_v43, %v4212_v20 }
 0x1ff   :  { %v1126_v45 = vpop.f32.mrf.mxu0 }
 0x200   :  { %v4327_v62 = vmax.f32 %v1267_v50, %v1292_v3  ;;  %v4756_v50 = vld [vmem:[#allocation15_spill] sm:$0xff] }
 0x201   :  { %v1129_v4 = vpop.f32.mrf.mxu0  ;;  %v4757_v3 = vld [vmem:[#allocation7_spill] sm:$0xff] }
 0x202   :  { %v1293_v7 = vmax.f32 %v1129_v4, %v4216_v38  ;;  %v1250_v45 = vmax.f32 %v4757_v3, %v4756_v50 }
 0x203   :  { %v1131_v0 = vpop.f32.mrf.mxu0 }
 0x204   :  { %v4332_v6 = vmax.f32 %v1268_v42, %v1293_v7  ;;  %v4758_v42 = vld [vmem:[#allocation24_spill] sm:$0xff] }
 0x205   :  { %v1132_v47 = vpop.f32.mrf.mxu0 }
 0x206   :  { %v1294_v9 = vmax.f32 %v1132_v47, %v4220_v56 }
 0x207   :  { %v1134_v63 = vpop.f32.mrf.mxu0 }
 0x208   :  { %v4337_v20 = vmax.f32 %v1269_v60, %v1294_v9 }
 0x209   :  { %v1137_v17 = vpop.f32.mrf.mxu0 }
 0x20a   :  { %v1295_v13 = vmax.f32 %v1137_v17, %v4224_v12 }
 0x20b   :  { %v1139_v14 = vpop.f32.mrf.mxu0 }
 0x20c   :  { %v4342_v38 = vmax.f32 %v1270_v31, %v1295_v13  ;;  %v4759_v31 = vld [vmem:[#allocation25_spill] sm:$0xff] }
 0x20d   :  { %v1140_v49 = vpop.f32.mrf.mxu0 }
 0x20e   :  { %v1296_v15 = vmax.f32 %v1140_v49, %v4747_v8  ;;  %v4760_v49 = vld [vmem:[#allocation16_spill] sm:$0xff] }
 0x20f   :  { %v1142_v57 = vpop.f32.mrf.mxu0 }
 0x210   :  { %v4347_v56 = vmax.f32 %v1271_v5, %v1296_v15  ;;  %v4761_v5 = vld [vmem:[#allocation8_spill] sm:$0xff]  ;;  %v4762_v57 = vmov 0.0  }
 0x211   :  { %v1145_v19 = vpop.f32.mrf.mxu0  ;;  %v1251_v8 = vmax.f32 %v4761_v5, %v4760_v49  ;;  %v3618_v5 = vld [vmem:[%s4714_s3 + $0x38] sm:$0xff]  }
 0x212   :  { %v1297_v21 = vmax.f32 %v1145_v19, %v4750_v28  ;;  %v3614_v28 = vld [vmem:[%s4714_s3 + $0x18] sm:$0xff]  }
 0x213   :  { %v1147_v18 = vpop.f32.mrf.mxu0 }
 0x214   :  { %v4352_v12 = vmax.f32 %v1272_v37, %v1297_v21 }
 0x215   :  { %v1148_v55 = vpop.f32.mrf.mxu0 }
 0x216   :  { %v1273_v24 = vmax.f32 %v4753_v59, %v1148_v55 }
 0x217   :  { %v1150_v29 = vpop.f32.mrf.mxu0 }
 0x218   :  { %v4357_v54 = vmax.f32 %v1248_v23, %v1273_v24  ;;  %v4764_v23 = vld [vmem:[#allocation9_spill] sm:$0xff] }
 0x219   :  { %v1153_v41 = vpop.f32.mrf.mxu0  ;;  %v1252_v59 = vmax.f32 %v4764_v23, %v4763_v25  ;;  %v1340_v25 = vadd.f32 %v4365_v26, %v4282_v44  ;;  %v3622_v23 = vld [vmem:[%s4714_s3 + $0x58] sm:$0xff]  }
 0x21a   :  { %v1274_v27 = vmax.f32 %v4252_v35, %v1153_v41  ;;  %v3613_v35 = vld [vmem:[%s4714_s3 + $0x10] sm:$0xff]  }
 0x21b   :  { %v1155_v46 = vpop.f32.mrf.mxu0 }
 0x21c   :  { %v1299_v1 = vmax.f32 %v1249_v11, %v1274_v27  ;;  %v4765_v27 = vld [vmem:[#allocation26_spill] sm:$0xff] }
 0x21d   :  { %v1156_v43 = vpop.f32.mrf.mxu0 }
 0x21e   :  { %v1331_v4 = vadd.f32 %v4365_v26, %v1299_v1  ;;  %v1275_v7 = vmax.f32 %v4758_v42, %v1156_v43  ;;  %v4766_v1 = vld [vmem:[#allocation18_spill] sm:$0xff] }
 0x21f   :  { %v1158_v0 = vpop.f32.mrf.mxu0  ;;  %v4767_v43 = vld [vmem:[#allocation10_spill] sm:$0xff] }
 0x220   :  { %v1356_v47 = vmax.f32 %v1331_v4, 0.0  ;;  %v1300_v60 = vmax.f32 %v1250_v45, %v1275_v7  ;;  %v1253_v50 = vmax.f32 %v4767_v43, %v4766_v1  ;;  %v3616_v4 = vld [vmem:[%s4714_s3 + $0x28] sm:$0xff]   ;;  %v4768_v0 = vld [vmem:[#allocation27_spill] sm:$0xff]  ;;  %v1344_v1 = vadd.f32 %v4365_v26, %v4302_v10 }
 0x221   :  { %v1161_v9 = vpop.f32.mrf.mxu0  ;;  %v3626_v43 = vld [vmem:[%s4714_s3 + $0x78] sm:$0xff]  }
 0x222   :  { %v1383_v63 = vpack.c.bf16 %v1356_v47, %v1356_v47  ;;  %v1332_v17 = vadd.f32 %v4365_v26, %v1300_v60  ;;  %v1276_v13 = vmax.f32 %v4759_v31, %v1161_v9  ;;  %v4769_v60 = vld [vmem:[#allocation19_spill] sm:$0xff] }
 0x223   :  { %v1163_v14 = vpop.f32.mrf.mxu0  ;;  %v4770_v9 = vld [vmem:[#allocation11_spill] sm:$0xff] }
 0x224   :  { %3245 = vmatmul.mubr.msk.bf16.vlgmr.msra.gmra.mxu1 %vm1392_vm3, %v1383_v63  ;;  %v1357_v19 = vmax.f32 %v1332_v17, 0.0  ;;  %v1301_v53 = vmax.f32 %v1251_v8, %v1276_v13  ;;  %v3617_v31 = vld [vmem:[%s4714_s3 + $0x30] sm:$0xff]   ;;  %v1337_v8 = vadd.f32 %v4365_v26, %v4267_v33 }
 0x225   :  { %3249 = vmatpush3.bf16.msra.mxu1 %v3613_v35  ;;  %v1164_v15 = vpop.f32.mrf.mxu0  ;;  %3250 = vmatprep.mubr.msk.bf16.mxu1 %vm3675_vm2, %v4762_v57  ;;  %v1254_v35 = vmax.f32 %v4770_v9, %v4769_v60  ;;  %v3629_v60 = vld [vmem:[%s4714_s3 + $0x90] sm:$0xff]  }
 0x226   :  { %3254 = vmatprep.subr.bf16.mxu1 %v4762_v57  ;;  %v1436_v21 = vpack.c.bf16 %v1357_v19, %v1357_v19  ;;  %v1333_v18 = vadd.f32 %v4365_v26, %v1301_v53  ;;  %v1277_v55 = vmax.f32 %v4258_v30, %v1164_v15  ;;  %v3615_v30 = vld [vmem:[%s4714_s3 + $0x20] sm:$0xff]   ;;  %v1362_v19 = vmax.f32 %v1337_v8, 0.0 }
 0x227   :  { %v1166_v16 = vpop.f32.mrf.mxu0  ;;  %v3619_v53 = vld [vmem:[%s4714_s3 + $0x40] sm:$0xff]  }
 0x228   :  { %v1358_v29 = vmax.f32 %v1333_v18, 0.0  ;;  %v1302_v41 = vmax.f32 %v1252_v59, %v1277_v55  ;;  %v1696_v16 = vpack.c.bf16 %v1362_v19, %v1362_v19  ;;  %v1339_v18 = vadd.f32 %v4365_v26, %v4277_v36  ;;  %v3621_v55 = vld [vmem:[%s4714_s3 + $0x50] sm:$0xff]  }
 0x229   :  { %v1169_v37 = vpop.f32.mrf.mxu0  ;;  %v1365_v36 = vmax.f32 %v1340_v25, 0.0  ;;  %v3633_v19 = vld [vmem:[%s4714_s3 + $0xb0] sm:$0xff]   ;;  %v1330_v25 = vadd.f32 %v4365_v26, %v4357_v54 }
 0x22a   :  { %v1488_v61 = vpack.c.bf16 %v1358_v29, %v1358_v29  ;;  %v1334_v11 = vadd.f32 %v4365_v26, %v1302_v41  ;;  %v1278_v46 = vmax.f32 %v4765_v27, %v1169_v37  ;;  %v1338_v37 = vadd.f32 %v4365_v26, %v4272_v48  ;;  %v3623_v29 = vld [vmem:[%s4714_s3 + $0x60] sm:$0xff]   ;;  %v3625_v27 = vld [vmem:[%s4714_s3 + $0x70] sm:$0xff]  }
 0x22b   :  { %v1171_v34 = vpop.f32.mrf.mxu0  ;;  %v1364_v48 = vmax.f32 %v1339_v18, 0.0  ;;  %v1852_v59 = vpack.c.bf16 %v1365_v36, %v1365_v36 }
 0x22c   :  { %3251 = vmatmul.mubr.msk.bf16.vlgmr.msra.gmra.mxu1 %vm1392_vm3, %v1436_v21  ;;  %v1359_v3 = vmax.f32 %v1334_v11, 0.0  ;;  %v1303_v45 = vmax.f32 %v1253_v50, %v1278_v46  ;;  %v1363_v33 = vmax.f32 %v1338_v37, 0.0  ;;  %v1343_v11 = vadd.f32 %v4365_v26, %v4297_v2  ;;  %v3634_v37 = vld [vmem:[%s4714_s3 + $0xb8] sm:$0xff]  }
 0x22d   :  { %3255 = vmatpush3.bf16.msra.mxu1 %v3614_v28  ;;  %v1172_v24 = vpop.f32.mrf.mxu0  ;;  %3256 = vmatprep.mubr.msk.bf16.mxu1 %vm3675_vm2, %v4762_v57  ;;  %v3620_v28 = vld [vmem:[%s4714_s3 + $0x48] sm:$0xff]   ;;  %v1800_v34 = vpack.c.bf16 %v1364_v48, %v1364_v48  ;;  %v1369_v2 = vmax.f32 %v1344_v1, 0.0  ;;  %v1354_v48 = vadd.f32 %v4365_v26, %v4352_v12  ;;  %v1355_v12 = vmax.f32 %v1330_v25, 0.0 }
 0x22e   :  { %3260 = vmatprep.subr.bf16.mxu1 %v4762_v57  ;;  %v1540_v42 = vpack.c.bf16 %v1359_v3, %v1359_v3  ;;  %v1335_v7 = vadd.f32 %v4365_v26, %v1303_v45  ;;  %v1279_v47 = vmax.f32 %v4768_v0, %v1172_v24  ;;  %v1748_v21 = vpack.c.bf16 %v1363_v33, %v1363_v33  ;;  %v3627_v45 = vld [vmem:[%s4714_s3 + $0x80] sm:$0xff]  }
 0x22f   :  { %v1174_v39 = vpop.f32.mrf.mxu0  ;;  %v1341_v24 = vadd.f32 %v4365_v26, %v4287_v51  ;;  %v2060_v50 = vpack.c.bf16 %v1369_v2, %v1369_v2  ;;  %v1345_v3 = vadd.f32 %v4365_v26, %v4307_v22  ;;  %v1380_v36 = vpack.c.bf16 %v1355_v12, %v1355_v12 }
 0x230   :  { %v1360_v63 = vmax.f32 %v1335_v7, 0.0  ;;  %v1304_v17 = vmax.f32 %v1254_v35, %v1279_v47  ;;  %v1342_v39 = vadd.f32 %v4365_v26, %v4292_v58  ;;  %v1368_v58 = vmax.f32 %v1343_v11, 0.0  ;;  %v3628_v7 = vld [vmem:[%s4714_s3 + $0x88] sm:$0xff]  }
 0x231   :  { %v1366_v44 = vmax.f32 %v1341_v24, 0.0  ;;  %v1370_v10 = vmax.f32 %v1345_v3, 0.0  ;;  %v1347_v47 = vadd.f32 %v4365_v26, %v4317_v40  ;;  %v1348_v35 = vadd.f32 %v4365_v26, %v4322_v52 }
 0x232   :  { %v1592_v13 = vpack.c.bf16 %v1360_v63, %v1360_v63  ;;  %v1336_v14 = vadd.f32 %v4365_v26, %v1304_v17  ;;  %v1367_v51 = vmax.f32 %v1342_v39, 0.0  ;;  %v2008_v46 = vpack.c.bf16 %v1368_v58, %v1368_v58  ;;  %v3630_v63 = vld [vmem:[%s4714_s3 + $0x98] sm:$0xff]  }
 0x233   :  { %v1904_v41 = vpack.c.bf16 %v1366_v44, %v1366_v44  ;;  %v1373_v40 = vmax.f32 %v1348_v35, 0.0 }
 0x234   :  { %3257 = vmatmul.mubr.msk.bf16.vlgmr.msra.gmra.mxu1 %vm1392_vm3, %v1488_v61  ;;  %v1361_v49 = vmax.f32 %v1336_v14, 0.0  ;;  %v1956_v61 = vpack.c.bf16 %v1367_v51, %v1367_v51 }
 0x235   :  { %3261 = vmatpush3.bf16.msra.mxu1 %v3615_v30  ;;  %3262 = vmatprep.mubr.msk.bf16.mxu1 %vm3675_vm2, %v4762_v57  ;;  %v3624_v30 = vld [vmem:[%s4714_s3 + $0x68] sm:$0xff]   ;;  %v2268_v17 = vpack.c.bf16 %v1373_v40, %v1373_v40 }
 0x236   :  { %3266 = vmatprep.subr.bf16.mxu1 %v4762_v57  ;;  %v1644_v15 = vpack.c.bf16 %v1361_v49, %v1361_v49  ;;  %v1350_v49 = vadd.f32 %v4365_v26, %v4332_v6 }
 0x23c   :  { %3263 = vmatmul.mubr.msk.bf16.vlgmr.msra.gmra.mxu1 %vm1392_vm3, %v1540_v42  ;;  %v1346_v42 = vadd.f32 %v4365_v26, %v4312_v32  ;;  %v1372_v32 = vmax.f32 %v1347_v47, 0.0 }
 0x23d   :  { %3267 = vmatpush3.bf16.msra.mxu1 %v3616_v4  ;;  %3268 = vmatprep.mubr.msk.bf16.mxu1 %vm3675_vm2, %v4762_v57  ;;  %v2112_v4 = vpack.c.bf16 %v1370_v10, %v1370_v10 }
 0x23e   :  { %3272 = vmatprep.subr.bf16.mxu1 %v4762_v57  ;;  %v1371_v22 = vmax.f32 %v1346_v42, 0.0  ;;  %v2216_v9 = vpack.c.bf16 %v1372_v32, %v1372_v32 }
 0x240   :  { %v2164_v0 = vpack.c.bf16 %v1371_v22, %v1371_v22 }
 0x244   :  { %3269 = vmatmul.mubr.msk.bf16.vlgmr.msra.gmra.mxu1 %vm1392_vm3, %v1592_v13  ;;  %v3631_v13 = vld [vmem:[%s4714_s3 + $0xa0] sm:$0xff]  }
 0x245   :  { %3273 = vmatpush3.bf16.msra.mxu1 %v3617_v31  ;;  %3274 = vmatprep.mubr.msk.bf16.mxu1 %vm3675_vm2, %v4762_v57  ;;  %v1349_v31 = vadd.f32 %v4365_v26, %v4327_v62  ;;  %v1375_v62 = vmax.f32 %v1350_v49, 0.0 }
 0x246   :  { %3278 = vmatprep.subr.bf16.mxu1 %v4762_v57 }
 0x247   :  { %v1374_v52 = vmax.f32 %v1349_v31, 0.0  ;;  %v2372_v8 = vpack.c.bf16 %v1375_v62, %v1375_v62 }
 0x249   :  { %v2320_v14 = vpack.c.bf16 %v1374_v52, %v1374_v52 }
 0x24c   :  { %3275 = vmatmul.mubr.msk.bf16.vlgmr.msra.gmra.mxu1 %vm1392_vm3, %v1644_v15  ;;  %v1351_v15 = vadd.f32 %v4365_v26, %v4337_v20 }
 0x24d   :  { %3279 = vmatpush3.bf16.msra.mxu1 %v3618_v5  ;;  %3280 = vmatprep.mubr.msk.bf16.mxu1 %vm3675_vm2, %v4762_v57  ;;  %v3632_v5 = vld [vmem:[%s4714_s3 + $0xa8] sm:$0xff]  }
 0x24e   :  { %3284 = vmatprep.subr.bf16.mxu1 %v4762_v57  ;;  %v1376_v6 = vmax.f32 %v1351_v15, 0.0 }
 0x254   :  { %3281 = vmatmul.mubr.msk.bf16.vlgmr.msra.gmra.mxu1 %vm1392_vm3, %v1696_v16  ;;  %v1352_v16 = vadd.f32 %v4365_v26, %v4342_v38 }
 0x255   :  { %3285 = vmatpush3.bf16.msra.mxu1 %v3619_v53  ;;  %3286 = vmatprep.mubr.msk.bf16.mxu1 %vm3675_vm2, %v4762_v57  ;;  %v2424_v53 = vpack.c.bf16 %v1376_v6, %v1376_v6 }
 0x256   :  { %3290 = vmatprep.subr.bf16.mxu1 %v4762_v57  ;;  %v1377_v20 = vmax.f32 %v1352_v16, 0.0  ;;  %v3638_v16 = vld [vmem:[%s4716_s5 + $0x30] sm:$0xff]  }
 0x258   :  { %v2476_v33 = vpack.c.bf16 %v1377_v20, %v1377_v20 }
 0x25c   :  { %3287 = vmatmul.mubr.msk.bf16.vlgmr.msra.gmra.mxu1 %vm1392_vm3, %v1748_v21  ;;  %v3635_v21 = vld [vmem:[%s4714_s3 + $0xc0] sm:$0xff]  }
 0x25d   :  { %3291 = vmatpush3.bf16.msra.mxu1 %v3620_v28  ;;  %3292 = vmatprep.mubr.msk.bf16.mxu1 %vm3675_vm2, %v4762_v57  ;;  %v1353_v28 = vadd.f32 %v4365_v26, %v4347_v56  ;;  %v1379_v56 = vmax.f32 %v1354_v48, 0.0  ;;  %v3641_v48 = vld [vmem:[%s4716_s5 + $0x18] sm:$0xff]  }
 0x25e   :  { %3296 = vmatprep.subr.bf16.mxu1 %v4762_v57 }
 0x25f   :  { %v1378_v38 = vmax.f32 %v1353_v28, 0.0 }
 0x261   :  { %v2528_v18 = vpack.c.bf16 %v1378_v38, %v1378_v38  ;;  %v3640_v38 = vld [vmem:[%s4716_s5 + $0x20] sm:$0xff]  }
 0x264   :  { %3293 = vmatmul.mubr.msk.bf16.vlgmr.msra.gmra.mxu1 %vm1392_vm3, %v1800_v34  ;;  %v2580_v34 = vpack.c.bf16 %v1379_v56, %v1379_v56 }
 0x265   :  { %3297 = vmatpush3.bf16.msra.mxu1 %v3621_v55  ;;  %3298 = vmatprep.mubr.msk.bf16.mxu1 %vm3675_vm2, %v4762_v57  ;;  %v3636_v55 = vld [vmem:[%s4714_s3] sm:$0xff]  }
 0x266   :  { %3302 = vmatprep.subr.bf16.mxu1 %v4762_v57 }
 0x26c   :  { %3299 = vmatmul.mubr.msk.bf16.vlgmr.msra.gmra.mxu1 %vm1392_vm3, %v1852_v59 }
 0x26d   :  { %3303 = vmatpush3.bf16.msra.mxu1 %v3622_v23  ;;  %3304 = vmatprep.mubr.msk.bf16.mxu1 %vm3675_vm2, %v4762_v57 }
 0x26e   :  { %3308 = vmatprep.subr.bf16.mxu1 %v4762_v57 }
 0x274   :  { %3305 = vmatmul.mubr.msk.bf16.vlgmr.msra.gmra.mxu1 %vm1392_vm3, %v1904_v41 }
 0x275   :  { %3309 = vmatpush3.bf16.msra.mxu1 %v3623_v29  ;;  %3310 = vmatprep.mubr.msk.bf16.mxu1 %vm3675_vm2, %v4762_v57 }
 0x276   :  { %3314 = vmatprep.subr.bf16.mxu1 %v4762_v57 }
 0x27c   :  { %3311 = vmatmul.mubr.msk.bf16.vlgmr.msra.gmra.mxu1 %vm1392_vm3, %v1956_v61 }
 0x27d   :  { %3315 = vmatpush3.bf16.msra.mxu1 %v3624_v30  ;;  %3316 = vmatprep.mubr.msk.bf16.mxu1 %vm3675_vm2, %v4762_v57 }
 0x27e   :  { %3320 = vmatprep.subr.bf16.mxu1 %v4762_v57 }
 0x284   :  { %3317 = vmatmul.mubr.msk.bf16.vlgmr.msra.gmra.mxu1 %vm1392_vm3, %v2008_v46 }
 0x285   :  { %3321 = vmatpush3.bf16.msra.mxu1 %v3625_v27  ;;  %3322 = vmatprep.mubr.msk.bf16.mxu1 %vm3675_vm2, %v4762_v57 }
 0x286   :  { %3326 = vmatprep.subr.bf16.mxu1 %v4762_v57 }
 0x28c   :  { %3323 = vmatmul.mubr.msk.bf16.vlgmr.msra.gmra.mxu1 %vm1392_vm3, %v2060_v50 }
 0x28d   :  { %3327 = vmatpush3.bf16.msra.mxu1 %v3626_v43  ;;  %3328 = vmatprep.mubr.msk.bf16.mxu1 %vm3675_vm2, %v4762_v57 }
 0x28e   :  { %3332 = vmatprep.subr.bf16.mxu1 %v4762_v57 }
 0x294   :  { %3329 = vmatmul.mubr.msk.bf16.vlgmr.msra.gmra.mxu1 %vm1392_vm3, %v2112_v4 }
 0x295   :  { %3333 = vmatpush3.bf16.msra.mxu1 %v3627_v45  ;;  %3334 = vmatprep.mubr.msk.bf16.mxu1 %vm3675_vm2, %v4762_v57 }
 0x296   :  { %3338 = vmatprep.subr.bf16.mxu1 %v4762_v57 }
 0x29c   :  { %3335 = vmatmul.mubr.msk.bf16.vlgmr.msra.gmra.mxu1 %vm1392_vm3, %v2164_v0 }
 0x29d   :  { %3339 = vmatpush3.bf16.msra.mxu1 %v3628_v7  ;;  %3340 = vmatprep.mubr.msk.bf16.mxu1 %vm3675_vm2, %v4762_v57 }
 0x29e   :  { %3344 = vmatprep.subr.bf16.mxu1 %v4762_v57 }
 0x2a4   :  { %3341 = vmatmul.mubr.msk.bf16.vlgmr.msra.gmra.mxu1 %vm1392_vm3, %v2216_v9 }
 0x2a5   :  { %3345 = vmatpush3.bf16.msra.mxu1 %v3629_v60  ;;  %3346 = vmatprep.mubr.msk.bf16.mxu1 %vm3675_vm2, %v4762_v57 }
 0x2a6   :  { %3350 = vmatprep.subr.bf16.mxu1 %v4762_v57 }
 0x2ac   :  { %3347 = vmatmul.mubr.msk.bf16.vlgmr.msra.gmra.mxu1 %vm1392_vm3, %v2268_v17 }
 0x2ad   :  { %3351 = vmatpush3.bf16.msra.mxu1 %v3630_v63  ;;  %3352 = vmatprep.mubr.msk.bf16.mxu1 %vm3675_vm2, %v4762_v57 }
 0x2ae   :  { %3356 = vmatprep.subr.bf16.mxu1 %v4762_v57 }
 0x2b4   :  { %3353 = vmatmul.mubr.msk.bf16.vlgmr.msra.gmra.mxu1 %vm1392_vm3, %v2320_v14 }
 0x2b5   :  { %3357 = vmatpush3.bf16.msra.mxu1 %v3631_v13  ;;  %3358 = vmatprep.mubr.msk.bf16.mxu1 %vm3675_vm2, %v4762_v57 }
 0x2b6   :  { %3362 = vmatprep.subr.bf16.mxu1 %v4762_v57 }
 0x2bc   :  { %3359 = vmatmul.mubr.msk.bf16.vlgmr.msra.gmra.mxu1 %vm1392_vm3, %v2372_v8  ;;  %v3637_v8 = vld [vmem:[%s4716_s5 + $0x38] ss:$0 sps:$4 sm:$0xff]  }
 0x2bd   :  { %3363 = vmatpush3.bf16.msra.mxu1 %v3632_v5  ;;  %3364 = vmatprep.mubr.msk.bf16.mxu1 %vm3675_vm2, %v4762_v57  ;;  %v2787_v6 = vsel %vm2785_vm4, %v3637_v8, 0 }
 0x2be   :  { %3368 = vmatprep.subr.bf16.mxu1 %v4762_v57 }
 0x2c4   :  { %3365 = vmatmul.mubr.msk.bf16.vlgmr.msra.gmra.mxu1 %vm1392_vm3, %v2424_v53 }
 0x2c5   :  { %3369 = vmatpush3.bf16.msra.mxu1 %v3633_v19  ;;  %3370 = vmatprep.mubr.msk.bf16.mxu1 %vm3675_vm2, %v4762_v57 }
 0x2c6   :  { %3374 = vmatprep.subr.bf16.mxu1 %v4762_v57 }
 0x2cc   :  { %3371 = vmatmul.mubr.msk.bf16.vlgmr.msra.gmra.mxu1 %vm1392_vm3, %v2476_v33  ;;  %v3639_v33 = vld [vmem:[%s4716_s5 + $0x28] sm:$0xff]  }
 0x2cd   :  { %3375 = vmatpush3.bf16.msra.mxu1 %v3634_v37  ;;  %3376 = vmatprep.mubr.msk.bf16.mxu1 %vm3675_vm2, %v4762_v57 }
 0x2ce   :  { %3380 = vmatprep.subr.bf16.mxu1 %v4762_v57 }
 0x2d4   :  { %3377 = vmatmul.mubr.msk.bf16.vlgmr.msra.gmra.mxu1 %vm1392_vm3, %v2528_v18 }
 0x2d5   :  { %3381 = vmatpush3.bf16.msra.mxu1 %v3635_v21  ;;  %3382 = vmatprep.mubr.msk.bf16.mxu1 %vm3675_vm2, %v4762_v57 }
 0x2d6   :  { %3386 = vmatprep.subr.bf16.mxu1 %v4762_v57 }
 0x2dc   :  { %3383 = vmatmul.mubr.msk.bf16.vlgmr.msra.gmra.mxu1 %vm1392_vm3, %v2580_v34  ;;  %v3642_v34 = vld [vmem:[%s4716_s5 + $0x10] sm:$0xff]  }
 0x2dd   :  { %3387 = vmatpush3.bf16.msra.mxu1 %v3636_v55  ;;  %3388 = vmatprep.mubr.msk.bf16.mxu1 %vm3675_vm2, %v4762_v57 }
 0x2de   :  { %3392 = vmatprep.subr.bf16.mxu1 %v4762_v57 }
 0x2e4   :  { %v4594_v23 = vpop.f32.mrf.mxu1  ;;  %3389 = vmatmul.mubr.msk.bf16.vlgmr.msra.gmra.mxu1 %vm1392_vm3, %v1380_v36  ;;  %v3643_v36 = vld [vmem:[%s4716_s5 + $0x8] sm:$0xff]  }
 0x2e5   :  { %3408 = vmatprep.mubr.msk.bf16.mxu1 %vm3675_vm2, %v4762_v57  ;;  %3393 = vmatpush3.bf16.msra.mxu1 %v2787_v6 }
 0x2e6   :  { %v3246_v59 = vpop.f32.mrf.mxu1  ;;  %3394 = vmatprep.subr.bf16.mxu1 %v4762_v57 }
 0x2e8   :  { %v1433_v24 = vpop.f32.mrf.mxu1 }
 0x2e9   :  { %3395 = vmatpush3.bf16.msra.mxu1 %v3638_v16 }
 0x2ea   :  { %v3247_v54 = vpop.f32.mrf.mxu1  ;;  %3396 = vmatprep.subr.bf16.mxu1 %v4762_v57 }
 0x2eb   :  { %v3644_v54 = vld [vmem:[%s4716_s5] sm:$0xff]  }
 0x2ec   :  { %v4599_v26 = vpop.f32.mrf.mxu1 }
 0x2ed   :  { %3397 = vmatpush3.bf16.msra.mxu1 %v3639_v33 }
 0x2ee   :  { %v3252_v44 = vpop.f32.mrf.mxu1  ;;  %3398 = vmatprep.subr.bf16.mxu1 %v4762_v57 }
 0x2f0   :  { %v1485_v29 = vpop.f32.mrf.mxu1 }
 0x2f1   :  { %3399 = vmatpush3.bf16.msra.mxu1 %v3640_v38 }
 0x2f2   :  { %v3253_v41 = vpop.f32.mrf.mxu1  ;;  %3400 = vmatprep.subr.bf16.mxu1 %v4762_v57 }
 0x2f4   :  { %v4601_v39 = vpop.f32.mrf.mxu1 }
 0x2f5   :  { %3401 = vmatpush3.bf16.msra.mxu1 %v3641_v48 }
 0x2f6   :  { %v3258_v51 = vpop.f32.mrf.mxu1  ;;  %3402 = vmatprep.subr.bf16.mxu1 %v4762_v57 }
 0x2f8   :  { %v1537_v30 = vpop.f32.mrf.mxu1 }
 0x2f9   :  { %3403 = vmatpush3.bf16.msra.mxu1 %v3642_v34 }
 0x2fa   :  { %v3259_v61 = vpop.f32.mrf.mxu1  ;;  %3404 = vmatprep.subr.bf16.mxu1 %v4762_v57 }
 0x2fc   :  { %v4603_v11 = vpop.f32.mrf.mxu1 }
 0x2fd   :  { %3405 = vmatpush3.bf16.msra.mxu1 %v3643_v36 }
 0x2fe   :  { %v3264_v58 = vpop.f32.mrf.mxu1  ;;  %3406 = vmatprep.subr.bf16.mxu1 %v4762_v57 }
 0x300   :  { %v1589_v27 = vpop.f32.mrf.mxu1 }
 0x301   :  { %3407 = vmatpush3.bf16.msra.mxu1 %v3644_v54 }
 0x302   :  { %v3265_v46 = vpop.f32.mrf.mxu1  ;;  %3412 = vmatprep.subr.bf16.mxu1 %v4762_v57 }
 0x304   :  { %v4605_v1 = vpop.f32.mrf.mxu1 }
 0x306   :  { %v3270_v2 = vpop.f32.mrf.mxu1 }
 0x308   :  { %v1641_v43 = vpop.f32.mrf.mxu1 }
 0x30a   :  { %v3271_v50 = vpop.f32.mrf.mxu1 }
 0x30c   :  { %v4607_v3 = vpop.f32.mrf.mxu1 }
 0x30e   :  { %v3276_v10 = vpop.f32.mrf.mxu1 }
 0x310   :  { %v1693_v45 = vpop.f32.mrf.mxu1 }
 0x312   :  { %v3277_v4 = vpop.f32.mrf.mxu1 }
 0x314   :  { %v4609_v42 = vpop.f32.mrf.mxu1 }
 0x316   :  { %v3282_v22 = vpop.f32.mrf.mxu1 }
 0x318   :  { %v1745_v7 = vpop.f32.mrf.mxu1 }
 0x31a   :  { %v3283_v0 = vpop.f32.mrf.mxu1 }
 0x31c   :  { %v4611_v47 = vpop.f32.mrf.mxu1 }
 0x31e   :  { %v3288_v32 = vpop.f32.mrf.mxu1 }
 0x320   :  { %v1797_v60 = vpop.f32.mrf.mxu1 }
 0x322   :  { %v3289_v9 = vpop.f32.mrf.mxu1 }
 0x324   :  { %v4613_v35 = vpop.f32.mrf.mxu1 }
 0x326   :  { %v3294_v40 = vpop.f32.mrf.mxu1 }
 0x328   :  { %v1849_v63 = vpop.f32.mrf.mxu1 }
 0x32a   :  { %v3295_v17 = vpop.f32.mrf.mxu1 }
 0x32c   :  { %v4615_v31 = vpop.f32.mrf.mxu1 }
 0x32e   :  { %v3300_v52 = vpop.f32.mrf.mxu1 }
 0x330   :  { %v1901_v13 = vpop.f32.mrf.mxu1 }
 0x332   :  { %v3301_v14 = vpop.f32.mrf.mxu1 }
 0x334   :  { %v4617_v49 = vpop.f32.mrf.mxu1 }
 0x336   :  { %v3306_v62 = vpop.f32.mrf.mxu1 }
 0x338   :  { %v1953_v5 = vpop.f32.mrf.mxu1 }
 0x33a   :  { %v3307_v15 = vpop.f32.mrf.mxu1 }
 0x33c   :  { %v4622_v19 = vpop.f32.mrf.mxu1 }
 0x33e   :  { %v3312_v53 = vpop.f32.mrf.mxu1 }
 0x340   :  { %v2005_v20 = vpop.f32.mrf.mxu1 }
 0x342   :  { %v3313_v37 = vpop.f32.mrf.mxu1 }
 0x344   :  { %v4632_v28 = vpop.f32.mrf.mxu1 }
 0x346   :  { %v3318_v21 = vpop.f32.mrf.mxu1 }
 0x348   :  { %v2057_v18 = vpop.f32.mrf.mxu1 }
 0x34a   :  { %v3319_v56 = vpop.f32.mrf.mxu1 }
 0x34c   :  { %v4642_v55 = vpop.f32.mrf.mxu1 }
 0x34e   :  { %v3324_v25 = vpop.f32.mrf.mxu1 }
 0x350   :  { %v2109_v12 = vpop.f32.mrf.mxu1 }
 0x352   :  { %v3325_v59 = vpop.f32.mrf.mxu1 }
 0x354   :  { %v4652_v24 = vpop.f32.mrf.mxu1 }
 0x356   :  { %v3330_v44 = vpop.f32.mrf.mxu1 }
 0x358   :  { %v2161_v29 = vpop.f32.mrf.mxu1 }
 0x35a   :  { %v3331_v41 = vpop.f32.mrf.mxu1 }
 0x35c   :  { %v2210_v51 = vpop.f32.mrf.mxu1 }
 0x35e   :  { %v3336_v30 = vpop.f32.mrf.mxu1 }
 0x360   :  { %v2213_v61 = vpop.f32.mrf.mxu1 }
 0x362   :  { %v3337_v58 = vpop.f32.mrf.mxu1 }
 0x364   :  { %v2262_v27 = vpop.f32.mrf.mxu1 }
 0x366   :  { %v3342_v46 = vpop.f32.mrf.mxu1 }
 0x368   :  { %v2265_v2 = vpop.f32.mrf.mxu1 }
 0x36a   :  { %v3343_v43 = vpop.f32.mrf.mxu1 }
 0x36c   :  { %v2314_v50 = vpop.f32.mrf.mxu1 }
 0x36e   :  { %v3348_v10 = vpop.f32.mrf.mxu1 }
 0x36f   :  { %v3648_v10 = vld [vmem:[%s4718_s7 + $0x10] sm:$0xff]  }
 0x370   :  { %v2317_v45 = vpop.f32.mrf.mxu1 }
 0x371   :  { %v3649_v45 = vld [vmem:[%s4718_s7 + $0x8] sm:$0xff]  }
 0x372   :  { %v3349_v4 = vpop.f32.mrf.mxu1 }
 0x373   :  { %v3650_v4 = vld [vmem:[%s4718_s7] sm:$0xff]  }
 0x374   :  { %v2366_v22 = vpop.f32.mrf.mxu1 }
 0x376   :  { %v3354_v7 = vpop.f32.mrf.mxu1 }
 0x378   :  { %v2369_v0 = vpop.f32.mrf.mxu1 }
 0x37a   :  { %v3355_v32 = vpop.f32.mrf.mxu1 }
 0x37c   :  { %v2418_v60 = vpop.f32.mrf.mxu1 }
 0x37e   :  { %v3360_v9 = vpop.f32.mrf.mxu1 }
 0x380   :  { %v2421_v40 = vpop.f32.mrf.mxu1 }
 0x382   :  { %v3361_v63 = vpop.f32.mrf.mxu1 }
 0x384   :  { %v2470_v17 = vpop.f32.mrf.mxu1 }
 0x386   :  { %v3366_v52 = vpop.f32.mrf.mxu1 }
 0x388   :  { %v2473_v13 = vpop.f32.mrf.mxu1 }
 0x38a   :  { %v3367_v14 = vpop.f32.mrf.mxu1 }
 0x38c   :  { %v2522_v62 = vpop.f32.mrf.mxu1 }
 0x38e   :  { %v3372_v5 = vpop.f32.mrf.mxu1 }
 0x390   :  { %v2525_v8 = vpop.f32.mrf.mxu1 }
 0x392   :  { %v3373_v15 = vpop.f32.mrf.mxu1 }
 0x394   :  { %v2574_v6 = vpop.f32.mrf.mxu1 }
 0x396   :  { %v3378_v53 = vpop.f32.mrf.mxu1 }
 0x398   :  { %v2577_v16 = vpop.f32.mrf.mxu1 }
 0x39a   :  { %v3379_v20 = vpop.f32.mrf.mxu1 }
 0x39c   :  { %v2626_v37 = vpop.f32.mrf.mxu1 }
 0x39e   :  { %v3384_v33 = vpop.f32.mrf.mxu1 }
 0x3a0   :  { %v2629_v38 = vpop.f32.mrf.mxu1 }
 0x3a2   :  { %v3385_v21 = vpop.f32.mrf.mxu1 }
 0x3a4   :  { %v2675_v18 = vpop.f32.mrf.mxu1 }
 0x3a5   :  { %v2676_v48 = vadd.f32 %v2675_v18, %v4594_v23 }
 0x3a6   :  { %v3390_v56 = vpop.f32.mrf.mxu1 }
 0x3a7   :  { %v2681_v34 = vadd.f32 %v2676_v48, %v4599_v26 }
 0x3a8   :  { %v2678_v25 = vpop.f32.mrf.mxu1 }
 0x3a9   :  { %v2682_v12 = vadd.f32 %v2681_v34, %v4601_v39 }
 0x3aa   :  { %v3391_v36 = vpop.f32.mrf.mxu1 }
 0x3ab   :  { %v2683_v59 = vadd.f32 %v2682_v12, %v4603_v11 }
 0x3ad   :  { %v2684_v54 = vadd.f32 %v2683_v59, %v4605_v1 }
 0x3af   :  { %v2685_v44 = vadd.f32 %v2684_v54, %v4607_v3 }
 0x3b1   :  { %v2686_v29 = vadd.f32 %v2685_v44, %v4609_v42 }
 0x3b3   :  { %v2687_v41 = vadd.f32 %v2686_v29, %v4611_v47 }
 0x3b5   :  { %v2688_v30 = vadd.f32 %v2687_v41, %v4613_v35 }
 0x3b7   :  { %v2689_v23 = vadd.f32 %v2688_v30, %v4615_v31  ;;  %v3157_v31 = vld [vmem:[%s4715_s4] ss:$0 sm:$0xff] }
 0x3b9   :  { %v2690_v26 = vadd.f32 %v2689_v23, %v4617_v49 }
 0x3bb   :  { %v2691_v61 = vadd.f32 %v2690_v26, %v4622_v19 }
 0x3bd   :  { %v2692_v39 = vadd.f32 %v2691_v61, %v4632_v28  ;;  %v3645_v28 = vld [vmem:[%s4718_s7 + $0x28] ss:$0 sps:$4 sm:$0x33]  }
 0x3bf   :  { %v2693_v11 = vadd.f32 %v2692_v39, %v4642_v55 }
 0x3c1   :  { %v2694_v1 = vadd.f32 %v2693_v11, %v4652_v24 }
 0x3c3   :  { %v2695_v58 = vadd.f32 %v2694_v1, %v2210_v51  ;;  %v2888_v51 = vsel %vm2886_vm5, %v3645_v28, 0 }
 0x3c5   :  { %v2696_v3 = vadd.f32 %v2695_v58, %v2262_v27  ;;  %v3646_v27 = vld [vmem:[%s4718_s7 + $0x20] sm:$0xff]  }
 0x3c7   :  { %v2697_v46 = vadd.f32 %v2696_v3, %v2314_v50  ;;  %v3647_v50 = vld [vmem:[%s4718_s7 + $0x18] sm:$0xff]   ;;  %s2938_s7 = sshll.u32 %s3676_s17, 4  ;;  %s2939_s7 = int_to_ptr.vmem [resolvable:$true] %s2938_s7 }
 0x3c8   :  { %p3656_p1 = scmp.lt.s32.totalorder %s2939_s7, %s2939_s7 }
 0x3c9   :  { %v2698_v42 = vadd.f32 %v2697_v46, %v2366_v22  ;;  %v3158_v22 = vld [vmem:[%s4717_s6] ss:$0 sm:$0xff]  ;;  %s3651_s6 = scalar_lea.vmem %s2939_s7, 32 }
 0x3ca   :  { %p3652_p0 = scmp.ne.s32.totalorder %s2939_s7, %s3651_s6  ;;  %p3657_p2 = scmp.lt.s32.totalorder %s3651_s6, %s3651_s6 }
 0x3cb   :  { %v2699_v2 = vadd.f32 %v2698_v42, %v2418_v60 }
 0x3cc   :  { %p3658_p3 = por %p3657_p2, %p3656_p1 }
 0x3cd   :  { %v2700_v47 = vadd.f32 %v2699_v2, %v2470_v17 }
 0x3ce   :  { %p3659_p4 = pnand %p3658_p3, %p3652_p0 }
 0x3cf   :  { %v2701_v43 = vadd.f32 %v2700_v47, %v2522_v62 }
 0x3d1   :  { %v2702_v35 = vadd.f32 %v2701_v43, %v2574_v6 }
 0x3d3   :  { %v2703_v49 = vadd.f32 %v2702_v35, %v2626_v37 }
 0x3d5   :  { %v2711_v19 = vadd.f32 %v3157_v31, %v2703_v49 }
 0x3d7   :  { %v2712_v55 = vmax.f32 %v2711_v19, 0.0 }
 0x3d9   :  { %v2713_v24 = vpack.c.bf16 %v2712_v55, %v2712_v55 }
 0x3db   :  { %3409 = vmatmul.mubr.msk.bf16.vlgmr.msra.gmra.mxu1 %vm2781_vm6, %v2713_v24 }
 0x3dc   :  { %3413 = vmatpush3.bf16.msra.mxu1 %v2888_v51  ;;  %3424 = vmatprep.mubr.msk.bf16.mxu1 %vm3675_vm2, %v4762_v57 }
 0x3dd   :  { %3414 = vmatprep.subr.bf16.mxu1 %v4762_v57 }
 0x3e0   :  { %3415 = vmatpush3.bf16.msra.mxu1 %v3646_v27 }
 0x3e1   :  { %3416 = vmatprep.subr.bf16.mxu1 %v4762_v57 }
 0x3e4   :  { %3417 = vmatpush3.bf16.msra.mxu1 %v3647_v50 }
 0x3e5   :  { %3418 = vmatprep.subr.bf16.mxu1 %v4762_v57 }
 0x3e8   :  { %3419 = vmatpush3.bf16.msra.mxu1 %v3648_v10 }
 0x3e9   :  { %3420 = vmatprep.subr.bf16.mxu1 %v4762_v57 }
 0x3ec   :  { %3421 = vmatpush3.bf16.msra.mxu1 %v3649_v45 }
 0x3ed   :  { %3422 = vmatprep.subr.bf16.mxu1 %v4762_v57  ;;  %v3168_v57 = vld [vmem:[%s4719_s8] ss:$0 sm:$0xff] }
 0x3f0   :  { %3423 = vmatpush3.bf16.msra.mxu1 %v3650_v4 }
 0x49b   :  { %v2823_v7 = vpop.f32.mrf.mxu1 }
 0x49c   :  { %v2824_v0 = vadd.f32 %v3158_v22, %v2823_v7 }
 0x49d   :  { %v3410_v32 = vpop.f32.mrf.mxu1 }
 0x49e   :  { %v2829_v60 = vmax.f32 %v2824_v0, 0.0 }
 0x49f   :  { %v2826_v9 = vpop.f32.mrf.mxu1 }
 0x4a0   :  { %v2830_v40 = vpack.c.bf16 %v2829_v60, %v2829_v60 }
 0x4a1   :  { %v3411_v63 = vpop.f32.mrf.mxu1 }
 0x4a2   :  { %3425 = vmatmul.mubr.msk.bf16.vlgmr.msra.gmra.mxu1 %vm2882_vm7, %v2830_v40 }
 0x562   :  { %v2924_v17 = vpop.f32.mrf.mxu1 }
 0x563   :  { %v2925_v52 = vadd.f32 %v3168_v57, %v2924_v17 }
 0x564   :  { %v3426_v13 = vpop.f32.mrf.mxu1 }
 0x565   :  { %2931 = vst.msk [vmem:[#allocation2] sm:$0x3] %vm2930_vm8, %v2925_v52 }
 0x566   :  { %v2927_v14 = vpop.f32.mrf.mxu1 }
 0x567   :  { %3662 = shalt.err (!%p3659_p4)
}
 0x568   :  { %2941 = dma.vmem_to_hbm [thread:$0]  %s2939_s7, 32, %s4720_s9, [#allocation3]   ;;  %v3427_v62 = vpop.f32.mrf.mxu1 }
 0x569   :  { %3671 = dma.done.wait [#allocation3], 32  }
 0x56a   :  { %3672 = vsyncadd [#allocation3], 4294967264 }
 0x56b   :  { %2945 = vsyncpa [#allocation3], 1 }

</bundles_post_ra>
